<compile_context>
chip_gen: v5e
topology: v5e:2x2
jax: 0.10.0
libtpu: 0.0.40
codegen_flags: <defaults>
</compile_context>

<pallas_src>
import functools

import jax
import jax.numpy as jnp
from jax import lax
from jax.experimental import pallas as pl
from jax.experimental.pallas import tpu as pltpu

MXU_DTYPE = jnp.bfloat16          # matmul operand dtype (f32 accumulation)
VMEM_LIMIT = 32 * 1024 * 1024     # safe on v5e/v6e/v7x; fused tiles are small
MAX_ROW_TILE = 256                # row tile for the "parallel" grid axis


# ----------------------------------------------------------------------------- in-kernel helpers
def _ln(x_f32, g_ref, b_ref):
    """LayerNorm in f32 (torch eps=1e-5); g/b refs are (1, d)."""
    mu = jnp.mean(x_f32, axis=-1, keepdims=True)
    var = jnp.mean(jnp.square(x_f32 - mu), axis=-1, keepdims=True)
    return (x_f32 - mu) * lax.rsqrt(var + 1e-5) * g_ref[...] + b_ref[...]


def _gelu_tanh(x):
    # tanh-approx GELU (EUP path); ~1e-3 abs diff vs torch's exact erf GELU.
    c = 0.7978845608028654  # sqrt(2/pi)
    return 0.5 * x * (1.0 + jnp.tanh(c * (x + 0.044715 * x * x * x)))


def _attend(q, k, v, heads, dim_head, scale):
    """All heads in one grid step; lane-dense (rows, heads*dim_head) output."""
    bm = MXU_DTYPE
    outs = []
    for h in range(heads):                      # static unroll, single kernel invocation
        sl = slice(h * dim_head, (h + 1) * dim_head)
        # QK^T via dot_general contracting last dims (MXU-native, no XLU transpose).
        s = lax.dot_general(q[:, sl].astype(bm), k[:, sl].astype(bm),
                            (((1,), (1,)), ((), ())),
                            preferred_element_type=jnp.float32) * scale
        m = jnp.max(s, axis=-1, keepdims=True)
        p = jnp.exp(s - m)
        l = jnp.sum(p, axis=-1, keepdims=True)
        attn = p * pl.reciprocal(l, approx=True)            # EUP reciprocal
        outs.append(jnp.dot(attn.astype(bm), v[:, sl].astype(bm),
                            preferred_element_type=jnp.float32))
    return jnp.concatenate(outs, axis=-1)       # (rows, heads*dim_head), lane-dense


# ----------------------------------------------------------------------------- kernels
def _fused_attn_kernel(*refs, heads, dim_head, scale, add_residual, final_proj):
    """PreNorm + multi-head attention + out-proj (+ residual) (+ to_logits)."""
    if final_proj:
        (x_ref, ctx_ref, ng, nb, cng, cnb,
         wq, wk, wv, wo, bo, wl, bl, o_ref) = refs
    else:
        (x_ref, ctx_ref, ng, nb, cng, cnb,
         wq, wk, wv, wo, bo, o_ref) = refs

    bm = MXU_DTYPE
    x = x_ref[...].astype(jnp.float32)                   # (tile_q, qdim)
    xn = _ln(x, ng, nb)
    ctxn = _ln(ctx_ref[...].astype(jnp.float32), cng, cnb)  # (nk, ctx_dim)

    q = jnp.dot(xn.astype(bm), wq[...], preferred_element_type=jnp.float32)
    k = jnp.dot(ctxn.astype(bm), wk[...], preferred_element_type=jnp.float32)
    v = jnp.dot(ctxn.astype(bm), wv[...], preferred_element_type=jnp.float32)

    # TODO(synk): for very long encoder contexts on v7x (64 MiB VMEM), tile nk with an
    # online-softmax accumulator instead of materializing full K/V/scores per tile.
    o = _attend(q, k, v, heads, dim_head, scale)

    out = jnp.dot(o.astype(bm), wo[...], preferred_element_type=jnp.float32) + bo[...]
    if add_residual:
        out = out + x
    if final_proj:
        out = jnp.dot(out.astype(bm), wl[...], preferred_element_type=jnp.float32) + bl[...]
    o_ref[...] = out.astype(o_ref.dtype)


def _fused_ff_kernel(x_ref, ng, nb, w1a, b1a, w1g, b1g, w2, b2, o_ref, *, add_residual):
    """PreNorm + Linear(d,4d) x2 + GEGLU + Linear(4d,d) (+ residual), fully in VMEM."""
    bm = MXU_DTYPE
    x = x_ref[...].astype(jnp.float32)
    xn = _ln(x, ng, nb).astype(bm)
    a = jnp.dot(xn, w1a[...], preferred_element_type=jnp.float32) + b1a[...]   # value half
    g = jnp.dot(xn, w1g[...], preferred_element_type=jnp.float32) + b1g[...]   # gate half
    h = a * _gelu_tanh(g)                                                      # GEGLU
    out = jnp.dot(h.astype(bm), w2[...], preferred_element_type=jnp.float32) + b2[...]
    if add_residual:
        out = out + x
    o_ref[...] = out.astype(o_ref.dtype)


# ----------------------------------------------------------------------------- wrappers
def _row_tiling(n):
    tile = min(n, MAX_ROW_TILE)
    return tile, pl.cdiv(n, tile)


def fused_attention(x, ctx, p, heads, dim_head, *, add_residual,
                    final_w=None, final_b=None):
    nq, qdim = x.shape
    nk, ctx_dim = ctx.shape
    inner = heads * dim_head
    final_proj = final_w is not None
    out_dim = final_w.shape[1] if final_proj else qdim
    tile_m, grid_m = _row_tiling(nq)

    # self-attention (ctx is x) reuses the x-norm params, matching "context = normed x"
    cng = p.get("ctx_norm_g", p["norm_g"])
    cnb = p.get("ctx_norm_b", p["norm_b"])

    kern = functools.partial(_fused_attn_kernel, heads=heads, dim_head=dim_head,
                             scale=dim_head ** -0.5, add_residual=add_residual,
                             final_proj=final_proj)
    in_specs = [
        pl.BlockSpec((tile_m, qdim), lambda i: (i, 0)),     # x (query-row tile)
        pl.BlockSpec((nk, ctx_dim), lambda i: (0, 0)),      # full context
        pl.BlockSpec((1, qdim), lambda i: (0, 0)),          # norm gamma
        pl.BlockSpec((1, qdim), lambda i: (0, 0)),          # norm beta
        pl.BlockSpec((1, ctx_dim), lambda i: (0, 0)),       # ctx norm gamma
        pl.BlockSpec((1, ctx_dim), lambda i: (0, 0)),       # ctx norm beta
        pl.BlockSpec((qdim, inner), lambda i: (0, 0)),      # wq
        pl.BlockSpec((ctx_dim, inner), lambda i: (0, 0)),   # wk
        pl.BlockSpec((ctx_dim, inner), lambda i: (0, 0)),   # wv
        pl.BlockSpec((inner, qdim), lambda i: (0, 0)),      # wo
        pl.BlockSpec((1, qdim), lambda i: (0, 0)),          # bo
    ]
    args = [x, ctx,
            p["norm_g"].reshape(1, qdim), p["norm_b"].reshape(1, qdim),
            cng.reshape(1, ctx_dim), cnb.reshape(1, ctx_dim),
            p["wq"], p["wk"], p["wv"], p["wo"], p["bo"].reshape(1, qdim)]
    if final_proj:
        in_specs += [pl.BlockSpec((qdim, out_dim), lambda i: (0, 0)),
                     pl.BlockSpec((1, out_dim), lambda i: (0, 0))]
        args += [final_w, final_b.reshape(1, out_dim)]

    return pl.pallas_call(
        kern,
        out_shape=jax.ShapeDtypeStruct((nq, out_dim), x.dtype),
        grid=(grid_m,),
        in_specs=in_specs,
        out_specs=pl.BlockSpec((tile_m, out_dim), lambda i: (i, 0)),
        compiler_params=pltpu.CompilerParams(
            dimension_semantics=("parallel",),
            vmem_limit_bytes=VMEM_LIMIT),
    )(*args)


def fused_ff(x, p, *, add_residual=True):
    n, d = x.shape
    dh = p["w1a"].shape[1]
    tile_m, grid_m = _row_tiling(n)
    kern = functools.partial(_fused_ff_kernel, add_residual=add_residual)
    return pl.pallas_call(
        kern,
        out_shape=jax.ShapeDtypeStruct((n, d), x.dtype),
        grid=(grid_m,),
        in_specs=[
            pl.BlockSpec((tile_m, d), lambda i: (i, 0)),
            pl.BlockSpec((1, d), lambda i: (0, 0)),
            pl.BlockSpec((1, d), lambda i: (0, 0)),
            pl.BlockSpec((d, dh), lambda i: (0, 0)),
            pl.BlockSpec((1, dh), lambda i: (0, 0)),
            pl.BlockSpec((d, dh), lambda i: (0, 0)),
            pl.BlockSpec((1, dh), lambda i: (0, 0)),
            pl.BlockSpec((dh, d), lambda i: (0, 0)),
            pl.BlockSpec((1, d), lambda i: (0, 0)),
        ],
        out_specs=pl.BlockSpec((tile_m, d), lambda i: (i, 0)),
        compiler_params=pltpu.CompilerParams(
            dimension_semantics=("parallel",),
            vmem_limit_bytes=VMEM_LIMIT),
    )(x, p["norm_g"].reshape(1, d), p["norm_b"].reshape(1, d),
      p["w1a"], p["b1a"].reshape(1, dh), p["w1g"], p["b1g"].reshape(1, dh),
      p["w2"], p["b2"].reshape(1, d))


# ----------------------------------------------------------------------------- model
def perceiver_io(data, queries, params, cfg):
    # data: (1, seq, dim); queries: (nq, queries_dim) or (1, nq, queries_dim)
    x = data[0]
    q = queries if queries.ndim == 2 else queries[0]
    lat = params["latents"]

    # encoder cross attention + FF (residuals fused into the kernels)
    lat = fused_attention(lat, x, params["enc_attn"],
                          cfg["cross_heads"], cfg["cross_dim_head"], add_residual=True)
    lat = fused_ff(lat, params["enc_ff"], add_residual=True)

    # latent self-attention tower
    for layer in params["layers"]:
        lat = fused_attention(lat, lat, layer["attn"],
                              cfg["latent_heads"], cfg["latent_dim_head"], add_residual=True)
        lat = fused_ff(lat, layer["ff"], add_residual=True)

    # decoder cross attention (no residual, decoder_ff=False) + fused to_logits proj
    logits = fused_attention(q, lat, params["dec_attn"],
                             cfg["cross_heads"], cfg["cross_dim_head"],
                             add_residual=False,
                             final_w=params["to_logits_w"], final_b=params["to_logits_b"])
    return logits[None]   # restore the unsqueezed batch dim -> (1, nq, logits_dim)


def perceiver_sequence_reducer(x, queries, params, cfg):
    # PyTorch forward: x.unsqueeze(0); then Perceiver(x, queries=queries)
    return perceiver_io(x[None], queries, params, cfg)


# ----------------------------------------------------------------------------- params
def init_params(key, cfg):
    keys = iter(jax.random.split(key, 128))

    def w(shape, scale=0.02):
        # matmul weights stored in bf16 (MXU operands; f32 accumulation in-kernel)
        return (scale * jax.random.normal(next(keys), shape, jnp.float32)).astype(MXU_DTYPE)

    def attn_params(qdim, ctx_dim, heads, dim_head, with_ctx_norm):
        inner = heads * dim_head
        p = {
            "norm_g": jnp.ones((qdim,), jnp.float32),
            "norm_b": jnp.zeros((qdim,), jnp.float32),
            "wq": w((qdim, inner)),
            "wk": w((ctx_dim, inner)),   # split of the no-bias to_kv weight (equivalent)
            "wv": w((ctx_dim, inner)),
            "wo": w((inner, qdim)),
            "bo": jnp.zeros((qdim,), jnp.float32),
        }
        if with_ctx_norm:
            p["ctx_norm_g"] = jnp.ones((ctx_dim,), jnp.float32)
            p["ctx_norm_b"] = jnp.zeros((ctx_dim,), jnp.float32)
        return p

    def ff_params(dim, mult=4):
        h = dim * mult
        return {
            "norm_g": jnp.ones((dim,), jnp.float32),
            "norm_b": jnp.zeros((dim,), jnp.float32),
            # GEGLU weight split into value / gate halves (lane-clean, equivalent math)
            "w1a": w((dim, h)), "b1a": jnp.zeros((h,), jnp.float32),
            "w1g": w((dim, h)), "b1g": jnp.zeros((h,), jnp.float32),
            "w2": w((h, dim)), "b2": jnp.zeros((dim,), jnp.float32),
        }

    return {
        "latents": jax.random.normal(next(keys), (cfg["num_latents"], cfg["latent_dim"]),
                                     jnp.float32),
        "enc_attn": attn_params(cfg["latent_dim"], cfg["dim"],
                                cfg["cross_heads"], cfg["cross_dim_head"], True),
        "enc_ff": ff_params(cfg["latent_dim"]),
        "layers": [
            {
                "attn": attn_params(cfg["latent_dim"], cfg["latent_dim"],
                                    cfg["latent_heads"], cfg["latent_dim_head"], False),
                "ff": ff_params(cfg["latent_dim"]),
            }
            for _ in range(cfg["depth"])
        ],
        "dec_attn": attn_params(cfg["queries_dim"], cfg["latent_dim"],
                                cfg["cross_heads"], cfg["cross_dim_head"], True),
        "to_logits_w": w((cfg["queries_dim"], cfg["logits_dim"])),
        "to_logits_b": jnp.zeros((cfg["logits_dim"],), jnp.float32),
    }


# ----------------------------------------------------------------------------- main
if __name__ == "__main__":
    # small synthetic config (embed_dim=32 instead of 256)
    cfg = dict(
        dim=32, queries_dim=32, logits_dim=32,
        num_latents=8, latent_dim=64, depth=2,
        cross_heads=1, latent_heads=4,
        cross_dim_head=16, latent_dim_head=16,
    )
    key = jax.random.PRNGKey(0)
    kp, kx, kq = jax.random.split(key, 3)
    params = init_params(kp, cfg)

    seq, nq = 8, 6
    x = jax.random.normal(kx, (seq, cfg["dim"]), jnp.float32)               # (seq, embed_dim)
    queries = jax.random.normal(kq, (nq, cfg["queries_dim"]), jnp.float32)  # (nq, embed_dim)

    fwd = jax.jit(lambda xx, qq: perceiver_sequence_reducer(xx, qq, params, cfg))
    out = fwd(x, queries)
    out = jax.block_until_ready(out)
    assert out.shape == (1, nq, cfg["logits_dim"]), out.shape
    assert jnp.all(jnp.isfinite(out))
    print("KERNEL_OK")
</pallas_src>

<mosaic_0001>
module attributes {stable_mosaic.version = 11 : i64} {
  func.func @_fused_attn_kernel(%arg0: i32, %arg1: memref<8x64xf32, #tpu.memory_space<vmem>>, %arg2: memref<8x32xf32, #tpu.memory_space<vmem>>, %arg3: memref<1x64xf32, #tpu.memory_space<vmem>>, %arg4: memref<1x64xf32, #tpu.memory_space<vmem>>, %arg5: memref<1x32xf32, #tpu.memory_space<vmem>>, %arg6: memref<1x32xf32, #tpu.memory_space<vmem>>, %arg7: memref<64x16xbf16, #tpu.memory_space<vmem>>, %arg8: memref<32x16xbf16, #tpu.memory_space<vmem>>, %arg9: memref<32x16xbf16, #tpu.memory_space<vmem>>, %arg10: memref<16x64xbf16, #tpu.memory_space<vmem>>, %arg11: memref<1x64xf32, #tpu.memory_space<vmem>>, %arg12: memref<8x64xf32, #tpu.memory_space<vmem>>) attributes {dimension_semantics = [#tpu.dimension_semantics<parallel>], iteration_bounds = array<i64: 1>, scalar_prefetch = 0 : i64, scratch_operands = 0 : i64, tpu.core_type = #tpu.core_type<tc>, window_params = [{transform_indices = @transform_0, window_bounds = array<i64: 8, 64>}, {pipeline_mode = #tpu.pipeline_mode<synchronous>, transform_indices = @transform_1, window_bounds = array<i64: 8, 32>}, {pipeline_mode = #tpu.pipeline_mode<synchronous>, transform_indices = @transform_2, window_bounds = array<i64: 1, 64>}, {pipeline_mode = #tpu.pipeline_mode<synchronous>, transform_indices = @transform_3, window_bounds = array<i64: 1, 64>}, {pipeline_mode = #tpu.pipeline_mode<synchronous>, transform_indices = @transform_4, window_bounds = array<i64: 1, 32>}, {pipeline_mode = #tpu.pipeline_mode<synchronous>, transform_indices = @transform_5, window_bounds = array<i64: 1, 32>}, {pipeline_mode = #tpu.pipeline_mode<synchronous>, transform_indices = @transform_6, window_bounds = array<i64: 64, 16>}, {pipeline_mode = #tpu.pipeline_mode<synchronous>, transform_indices = @transform_7, window_bounds = array<i64: 32, 16>}, {pipeline_mode = #tpu.pipeline_mode<synchronous>, transform_indices = @transform_8, window_bounds = array<i64: 32, 16>}, {pipeline_mode = #tpu.pipeline_mode<synchronous>, transform_indices = @transform_9, window_bounds = array<i64: 16, 64>}, {pipeline_mode = #tpu.pipeline_mode<synchronous>, transform_indices = @transform_10, window_bounds = array<i64: 1, 64>}, {transform_indices = @transform_11, window_bounds = array<i64: 8, 64>}]} {
    %c0 = arith.constant 0 : index
    %c0_0 = arith.constant 0 : index
    %0 = vector.load %arg1[%c0, %c0_0] : memref<8x64xf32, #tpu.memory_space<vmem>>, vector<8x64xf32>
    %cst = arith.constant dense<0.000000e+00> : vector<8xf32>
    %1 = vector.multi_reduction <add>, %0, %cst [1] : vector<8x64xf32> to vector<8xf32>
    %2 = vector.shape_cast %1 : vector<8xf32> to vector<8x1xf32>
    %cst_1 = arith.constant 6.400000e+01 : f32
    %3 = vector.broadcast %cst_1 : f32 to vector<8x1xf32>
    %4 = arith.divf %2, %3 : vector<8x1xf32>
    %5 = vector.broadcast %4 : vector<8x1xf32> to vector<8x64xf32>
    %6 = arith.subf %0, %5 : vector<8x64xf32>
    %7 = arith.mulf %6, %6 : vector<8x64xf32>
    %cst_2 = arith.constant dense<0.000000e+00> : vector<8xf32>
    %8 = vector.multi_reduction <add>, %7, %cst_2 [1] : vector<8x64xf32> to vector<8xf32>
    %9 = vector.shape_cast %8 : vector<8xf32> to vector<8x1xf32>
    %cst_3 = arith.constant 6.400000e+01 : f32
    %10 = vector.broadcast %cst_3 : f32 to vector<8x1xf32>
    %11 = arith.divf %9, %10 : vector<8x1xf32>
    %12 = vector.broadcast %4 : vector<8x1xf32> to vector<8x64xf32>
    %13 = arith.subf %0, %12 : vector<8x64xf32>
    %cst_4 = arith.constant 9.99999974E-6 : f32
    %14 = vector.broadcast %cst_4 : f32 to vector<8x1xf32>
    %15 = arith.addf %11, %14 : vector<8x1xf32>
    %16 = math.rsqrt %15 : vector<8x1xf32>
    %17 = vector.broadcast %16 : vector<8x1xf32> to vector<8x64xf32>
    %18 = arith.mulf %13, %17 : vector<8x64xf32>
    %c0_5 = arith.constant 0 : index
    %c0_6 = arith.constant 0 : index
    %19 = vector.load %arg3[%c0_5, %c0_6] : memref<1x64xf32, #tpu.memory_space<vmem>>, vector<1x64xf32>
    %20 = vector.broadcast %19 : vector<1x64xf32> to vector<8x64xf32>
    %21 = arith.mulf %18, %20 : vector<8x64xf32>
    %c0_7 = arith.constant 0 : index
    %c0_8 = arith.constant 0 : index
    %22 = vector.load %arg4[%c0_7, %c0_8] : memref<1x64xf32, #tpu.memory_space<vmem>>, vector<1x64xf32>
    %23 = vector.broadcast %22 : vector<1x64xf32> to vector<8x64xf32>
    %24 = arith.addf %21, %23 : vector<8x64xf32>
    %c0_9 = arith.constant 0 : index
    %c0_10 = arith.constant 0 : index
    %25 = vector.load %arg2[%c0_9, %c0_10] : memref<8x32xf32, #tpu.memory_space<vmem>>, vector<8x32xf32>
    %cst_11 = arith.constant dense<0.000000e+00> : vector<8xf32>
    %26 = vector.multi_reduction <add>, %25, %cst_11 [1] : vector<8x32xf32> to vector<8xf32>
    %27 = vector.shape_cast %26 : vector<8xf32> to vector<8x1xf32>
    %cst_12 = arith.constant 3.200000e+01 : f32
    %28 = vector.broadcast %cst_12 : f32 to vector<8x1xf32>
    %29 = arith.divf %27, %28 : vector<8x1xf32>
    %30 = vector.broadcast %29 : vector<8x1xf32> to vector<8x32xf32>
    %31 = arith.subf %25, %30 : vector<8x32xf32>
    %32 = arith.mulf %31, %31 : vector<8x32xf32>
    %cst_13 = arith.constant dense<0.000000e+00> : vector<8xf32>
    %33 = vector.multi_reduction <add>, %32, %cst_13 [1] : vector<8x32xf32> to vector<8xf32>
    %34 = vector.shape_cast %33 : vector<8xf32> to vector<8x1xf32>
    %cst_14 = arith.constant 3.200000e+01 : f32
    %35 = vector.broadcast %cst_14 : f32 to vector<8x1xf32>
    %36 = arith.divf %34, %35 : vector<8x1xf32>
    %37 = vector.broadcast %29 : vector<8x1xf32> to vector<8x32xf32>
    %38 = arith.subf %25, %37 : vector<8x32xf32>
    %cst_15 = arith.constant 9.99999974E-6 : f32
    %39 = vector.broadcast %cst_15 : f32 to vector<8x1xf32>
    %40 = arith.addf %36, %39 : vector<8x1xf32>
    %41 = math.rsqrt %40 : vector<8x1xf32>
    %42 = vector.broadcast %41 : vector<8x1xf32> to vector<8x32xf32>
    %43 = arith.mulf %38, %42 : vector<8x32xf32>
    %c0_16 = arith.constant 0 : index
    %c0_17 = arith.constant 0 : index
    %44 = vector.load %arg5[%c0_16, %c0_17] : memref<1x32xf32, #tpu.memory_space<vmem>>, vector<1x32xf32>
    %45 = vector.broadcast %44 : vector<1x32xf32> to vector<8x32xf32>
    %46 = arith.mulf %43, %45 : vector<8x32xf32>
    %c0_18 = arith.constant 0 : index
    %c0_19 = arith.constant 0 : index
    %47 = vector.load %arg6[%c0_18, %c0_19] : memref<1x32xf32, #tpu.memory_space<vmem>>, vector<1x32xf32>
    %48 = vector.broadcast %47 : vector<1x32xf32> to vector<8x32xf32>
    %49 = arith.addf %46, %48 : vector<8x32xf32>
    %50 = arith.truncf %24 : vector<8x64xf32> to vector<8x64xbf16>
    %c0_20 = arith.constant 0 : index
    %c0_21 = arith.constant 0 : index
    %51 = vector.load %arg7[%c0_20, %c0_21] : memref<64x16xbf16, #tpu.memory_space<vmem>>, vector<64x16xbf16>
    %cst_22 = arith.constant dense<0.000000e+00> : vector<8x16xf32>
    %52 = tpu.matmul %50, %51, %cst_22 {dimension_numbers = #tpu.dot_dimension_numbers<[1], [0], [0], [1], [0, 0, 1, 1], [], []>} : vector<8x64xbf16>, vector<64x16xbf16>, vector<8x16xf32> -> vector<8x16xf32>
    %53 = arith.truncf %49 : vector<8x32xf32> to vector<8x32xbf16>
    %c0_23 = arith.constant 0 : index
    %c0_24 = arith.constant 0 : index
    %54 = vector.load %arg8[%c0_23, %c0_24] : memref<32x16xbf16, #tpu.memory_space<vmem>>, vector<32x16xbf16>
    %cst_25 = arith.constant dense<0.000000e+00> : vector<8x16xf32>
    %55 = tpu.matmul %53, %54, %cst_25 {dimension_numbers = #tpu.dot_dimension_numbers<[1], [0], [0], [1], [0, 0, 1, 1], [], []>} : vector<8x32xbf16>, vector<32x16xbf16>, vector<8x16xf32> -> vector<8x16xf32>
    %56 = arith.truncf %49 : vector<8x32xf32> to vector<8x32xbf16>
    %c0_26 = arith.constant 0 : index
    %c0_27 = arith.constant 0 : index
    %57 = vector.load %arg9[%c0_26, %c0_27] : memref<32x16xbf16, #tpu.memory_space<vmem>>, vector<32x16xbf16>
    %cst_28 = arith.constant dense<0.000000e+00> : vector<8x16xf32>
    %58 = tpu.matmul %56, %57, %cst_28 {dimension_numbers = #tpu.dot_dimension_numbers<[1], [0], [0], [1], [0, 0, 1, 1], [], []>} : vector<8x32xbf16>, vector<32x16xbf16>, vector<8x16xf32> -> vector<8x16xf32>
    %59 = arith.truncf %52 : vector<8x16xf32> to vector<8x16xbf16>
    %60 = arith.truncf %55 : vector<8x16xf32> to vector<8x16xbf16>
    %cst_29 = arith.constant dense<0.000000e+00> : vector<8x8xf32>
    %61 = tpu.matmul %59, %60, %cst_29 {dimension_numbers = #tpu.dot_dimension_numbers<[1], [1], [0], [0], [0, 0, 1, 0], [], []>} : vector<8x16xbf16>, vector<8x16xbf16>, vector<8x8xf32> -> vector<8x8xf32>
    %cst_30 = arith.constant 2.500000e-01 : f32
    %62 = vector.broadcast %cst_30 : f32 to vector<8x8xf32>
    %63 = arith.mulf %61, %62 : vector<8x8xf32>
    %cst_31 = arith.constant dense<0xFF800000> : vector<8xf32>
    %64 = vector.multi_reduction <maximumf>, %63, %cst_31 [1] : vector<8x8xf32> to vector<8xf32>
    %65 = vector.shape_cast %64 : vector<8xf32> to vector<8x1xf32>
    %66 = vector.broadcast %65 : vector<8x1xf32> to vector<8x8xf32>
    %67 = arith.subf %63, %66 : vector<8x8xf32>
    %68 = math.exp %67 : vector<8x8xf32>
    %cst_32 = arith.constant dense<0.000000e+00> : vector<8xf32>
    %69 = vector.multi_reduction <add>, %68, %cst_32 [1] : vector<8x8xf32> to vector<8xf32>
    %70 = vector.shape_cast %69 : vector<8xf32> to vector<8x1xf32>
    %71 = tpu.reciprocal %70 {approx = true} : vector<8x1xf32> -> vector<8x1xf32>
    %72 = vector.broadcast %71 : vector<8x1xf32> to vector<8x8xf32>
    %73 = arith.mulf %68, %72 : vector<8x8xf32>
    %74 = arith.truncf %73 : vector<8x8xf32> to vector<8x8xbf16>
    %75 = arith.truncf %58 : vector<8x16xf32> to vector<8x16xbf16>
    %cst_33 = arith.constant dense<0.000000e+00> : vector<8x16xf32>
    %76 = tpu.matmul %74, %75, %cst_33 {dimension_numbers = #tpu.dot_dimension_numbers<[1], [0], [0], [1], [0, 0, 1, 1], [], []>} : vector<8x8xbf16>, vector<8x16xbf16>, vector<8x16xf32> -> vector<8x16xf32>
    %77 = arith.truncf %76 : vector<8x16xf32> to vector<8x16xbf16>
    %c0_34 = arith.constant 0 : index
    %c0_35 = arith.constant 0 : index
    %78 = vector.load %arg10[%c0_34, %c0_35] : memref<16x64xbf16, #tpu.memory_space<vmem>>, vector<16x64xbf16>
    %cst_36 = arith.constant dense<0.000000e+00> : vector<8x64xf32>
    %79 = tpu.matmul %77, %78, %cst_36 {dimension_numbers = #tpu.dot_dimension_numbers<[1], [0], [0], [1], [0, 0, 1, 1], [], []>} : vector<8x16xbf16>, vector<16x64xbf16>, vector<8x64xf32> -> vector<8x64xf32>
    %c0_37 = arith.constant 0 : index
    %c0_38 = arith.constant 0 : index
    %80 = vector.load %arg11[%c0_37, %c0_38] : memref<1x64xf32, #tpu.memory_space<vmem>>, vector<1x64xf32>
    %81 = vector.broadcast %80 : vector<1x64xf32> to vector<8x64xf32>
    %82 = arith.addf %79, %81 : vector<8x64xf32>
    %83 = arith.addf %82, %0 : vector<8x64xf32>
    %c0_39 = arith.constant 0 : index
    %c0_40 = arith.constant 0 : index
    %84 = vector.load %arg12[%c0_39, %c0_40] : memref<8x64xf32, #tpu.memory_space<vmem>>, vector<8x64xf32>
    tpu.vector_store %arg12[%c0_39, %c0_40], %83 {strides = array<i32>} : memref<8x64xf32, #tpu.memory_space<vmem>>, vector<8x64xf32>,
    return
  }
  func.func @transform_0(%arg0: i32) -> (i32, i32) {
    %c0_i32 = arith.constant 0 : i32
    %c0_i32_0 = arith.constant 0 : i32
    return %arg0, %c0_i32 : i32, i32
  }
  func.func @transform_1(%arg0: i32) -> (i32, i32) {
    %c0_i32 = arith.constant 0 : i32
    %c0_i32_0 = arith.constant 0 : i32
    %c0_i32_1 = arith.constant 0 : i32
    return %c0_i32, %c0_i32_0 : i32, i32
  }
  func.func @transform_2(%arg0: i32) -> (i32, i32) {
    %c0_i32 = arith.constant 0 : i32
    %c0_i32_0 = arith.constant 0 : i32
    %c0_i32_1 = arith.constant 0 : i32
    return %c0_i32, %c0_i32_0 : i32, i32
  }
  func.func @transform_3(%arg0: i32) -> (i32, i32) {
    %c0_i32 = arith.constant 0 : i32
    %c0_i32_0 = arith.constant 0 : i32
    %c0_i32_1 = arith.constant 0 : i32
    return %c0_i32, %c0_i32_0 : i32, i32
  }
  func.func @transform_4(%arg0: i32) -> (i32, i32) {
    %c0_i32 = arith.constant 0 : i32
    %c0_i32_0 = arith.constant 0 : i32
    %c0_i32_1 = arith.constant 0 : i32
    return %c0_i32, %c0_i32_0 : i32, i32
  }
  func.func @transform_5(%arg0: i32) -> (i32, i32) {
    %c0_i32 = arith.constant 0 : i32
    %c0_i32_0 = arith.constant 0 : i32
    %c0_i32_1 = arith.constant 0 : i32
    return %c0_i32, %c0_i32_0 : i32, i32
  }
  func.func @transform_6(%arg0: i32) -> (i32, i32) {
    %c0_i32 = arith.constant 0 : i32
    %c0_i32_0 = arith.constant 0 : i32
    %c0_i32_1 = arith.constant 0 : i32
    return %c0_i32, %c0_i32_0 : i32, i32
  }
  func.func @transform_7(%arg0: i32) -> (i32, i32) {
    %c0_i32 = arith.constant 0 : i32
    %c0_i32_0 = arith.constant 0 : i32
    %c0_i32_1 = arith.constant 0 : i32
    return %c0_i32, %c0_i32_0 : i32, i32
  }
  func.func @transform_8(%arg0: i32) -> (i32, i32) {
    %c0_i32 = arith.constant 0 : i32
    %c0_i32_0 = arith.constant 0 : i32
    %c0_i32_1 = arith.constant 0 : i32
    return %c0_i32, %c0_i32_0 : i32, i32
  }
  func.func @transform_9(%arg0: i32) -> (i32, i32) {
    %c0_i32 = arith.constant 0 : i32
    %c0_i32_0 = arith.constant 0 : i32
    %c0_i32_1 = arith.constant 0 : i32
    return %c0_i32, %c0_i32_0 : i32, i32
  }
  func.func @transform_10(%arg0: i32) -> (i32, i32) {
    %c0_i32 = arith.constant 0 : i32
    %c0_i32_0 = arith.constant 0 : i32
    %c0_i32_1 = arith.constant 0 : i32
    return %c0_i32, %c0_i32_0 : i32, i32
  }
  func.func @transform_11(%arg0: i32) -> (i32, i32) {
    %c0_i32 = arith.constant 0 : i32
    %c0_i32_0 = arith.constant 0 : i32
    return %arg0, %c0_i32 : i32, i32
  }
}

module attributes {stable_mosaic.version = 11 : i64} {
  func.func @_fused_ff_kernel(%arg0: i32, %arg1: memref<8x64xf32, #tpu.memory_space<vmem>>, %arg2: memref<1x64xf32, #tpu.memory_space<vmem>>, %arg3: memref<1x64xf32, #tpu.memory_space<vmem>>, %arg4: memref<64x256xbf16, #tpu.memory_space<vmem>>, %arg5: memref<1x256xf32, #tpu.memory_space<vmem>>, %arg6: memref<64x256xbf16, #tpu.memory_space<vmem>>, %arg7: memref<1x256xf32, #tpu.memory_space<vmem>>, %arg8: memref<256x64xbf16, #tpu.memory_space<vmem>>, %arg9: memref<1x64xf32, #tpu.memory_space<vmem>>, %arg10: memref<8x64xf32, #tpu.memory_space<vmem>>) attributes {dimension_semantics = [#tpu.dimension_semantics<parallel>], iteration_bounds = array<i64: 1>, scalar_prefetch = 0 : i64, scratch_operands = 0 : i64, tpu.core_type = #tpu.core_type<tc>, window_params = [{transform_indices = @transform_0, window_bounds = array<i64: 8, 64>}, {pipeline_mode = #tpu.pipeline_mode<synchronous>, transform_indices = @transform_1, window_bounds = array<i64: 1, 64>}, {pipeline_mode = #tpu.pipeline_mode<synchronous>, transform_indices = @transform_2, window_bounds = array<i64: 1, 64>}, {pipeline_mode = #tpu.pipeline_mode<synchronous>, transform_indices = @transform_3, window_bounds = array<i64: 64, 256>}, {pipeline_mode = #tpu.pipeline_mode<synchronous>, transform_indices = @transform_4, window_bounds = array<i64: 1, 256>}, {pipeline_mode = #tpu.pipeline_mode<synchronous>, transform_indices = @transform_5, window_bounds = array<i64: 64, 256>}, {pipeline_mode = #tpu.pipeline_mode<synchronous>, transform_indices = @transform_6, window_bounds = array<i64: 1, 256>}, {pipeline_mode = #tpu.pipeline_mode<synchronous>, transform_indices = @transform_7, window_bounds = array<i64: 256, 64>}, {pipeline_mode = #tpu.pipeline_mode<synchronous>, transform_indices = @transform_8, window_bounds = array<i64: 1, 64>}, {transform_indices = @transform_9, window_bounds = array<i64: 8, 64>}]} {
    %c0 = arith.constant 0 : index
    %c0_0 = arith.constant 0 : index
    %0 = vector.load %arg1[%c0, %c0_0] : memref<8x64xf32, #tpu.memory_space<vmem>>, vector<8x64xf32>
    %cst = arith.constant dense<0.000000e+00> : vector<8xf32>
    %1 = vector.multi_reduction <add>, %0, %cst [1] : vector<8x64xf32> to vector<8xf32>
    %2 = vector.shape_cast %1 : vector<8xf32> to vector<8x1xf32>
    %cst_1 = arith.constant 6.400000e+01 : f32
    %3 = vector.broadcast %cst_1 : f32 to vector<8x1xf32>
    %4 = arith.divf %2, %3 : vector<8x1xf32>
    %5 = vector.broadcast %4 : vector<8x1xf32> to vector<8x64xf32>
    %6 = arith.subf %0, %5 : vector<8x64xf32>
    %7 = arith.mulf %6, %6 : vector<8x64xf32>
    %cst_2 = arith.constant dense<0.000000e+00> : vector<8xf32>
    %8 = vector.multi_reduction <add>, %7, %cst_2 [1] : vector<8x64xf32> to vector<8xf32>
    %9 = vector.shape_cast %8 : vector<8xf32> to vector<8x1xf32>
    %cst_3 = arith.constant 6.400000e+01 : f32
    %10 = vector.broadcast %cst_3 : f32 to vector<8x1xf32>
    %11 = arith.divf %9, %10 : vector<8x1xf32>
    %12 = vector.broadcast %4 : vector<8x1xf32> to vector<8x64xf32>
    %13 = arith.subf %0, %12 : vector<8x64xf32>
    %cst_4 = arith.constant 9.99999974E-6 : f32
    %14 = vector.broadcast %cst_4 : f32 to vector<8x1xf32>
    %15 = arith.addf %11, %14 : vector<8x1xf32>
    %16 = math.rsqrt %15 : vector<8x1xf32>
    %17 = vector.broadcast %16 : vector<8x1xf32> to vector<8x64xf32>
    %18 = arith.mulf %13, %17 : vector<8x64xf32>
    %c0_5 = arith.constant 0 : index
    %c0_6 = arith.constant 0 : index
    %19 = vector.load %arg2[%c0_5, %c0_6] : memref<1x64xf32, #tpu.memory_space<vmem>>, vector<1x64xf32>
    %20 = vector.broadcast %19 : vector<1x64xf32> to vector<8x64xf32>
    %21 = arith.mulf %18, %20 : vector<8x64xf32>
    %c0_7 = arith.constant 0 : index
    %c0_8 = arith.constant 0 : index
    %22 = vector.load %arg3[%c0_7, %c0_8] : memref<1x64xf32, #tpu.memory_space<vmem>>, vector<1x64xf32>
    %23 = vector.broadcast %22 : vector<1x64xf32> to vector<8x64xf32>
    %24 = arith.addf %21, %23 : vector<8x64xf32>
    %25 = arith.truncf %24 : vector<8x64xf32> to vector<8x64xbf16>
    %c0_9 = arith.constant 0 : index
    %c0_10 = arith.constant 0 : index
    %26 = vector.load %arg4[%c0_9, %c0_10] : memref<64x256xbf16, #tpu.memory_space<vmem>>, vector<64x256xbf16>
    %cst_11 = arith.constant dense<0.000000e+00> : vector<8x256xf32>
    %27 = tpu.matmul %25, %26, %cst_11 {dimension_numbers = #tpu.dot_dimension_numbers<[1], [0], [0], [1], [0, 0, 1, 1], [], []>} : vector<8x64xbf16>, vector<64x256xbf16>, vector<8x256xf32> -> vector<8x256xf32>
    %c0_12 = arith.constant 0 : index
    %c0_13 = arith.constant 0 : index
    %28 = vector.load %arg5[%c0_12, %c0_13] : memref<1x256xf32, #tpu.memory_space<vmem>>, vector<1x256xf32>
    %29 = vector.broadcast %28 : vector<1x256xf32> to vector<8x256xf32>
    %30 = arith.addf %27, %29 : vector<8x256xf32>
    %c0_14 = arith.constant 0 : index
    %c0_15 = arith.constant 0 : index
    %31 = vector.load %arg6[%c0_14, %c0_15] : memref<64x256xbf16, #tpu.memory_space<vmem>>, vector<64x256xbf16>
    %cst_16 = arith.constant dense<0.000000e+00> : vector<8x256xf32>
    %32 = tpu.matmul %25, %31, %cst_16 {dimension_numbers = #tpu.dot_dimension_numbers<[1], [0], [0], [1], [0, 0, 1, 1], [], []>} : vector<8x64xbf16>, vector<64x256xbf16>, vector<8x256xf32> -> vector<8x256xf32>
    %c0_17 = arith.constant 0 : index
    %c0_18 = arith.constant 0 : index
    %33 = vector.load %arg7[%c0_17, %c0_18] : memref<1x256xf32, #tpu.memory_space<vmem>>, vector<1x256xf32>
    %34 = vector.broadcast %33 : vector<1x256xf32> to vector<8x256xf32>
    %35 = arith.addf %32, %34 : vector<8x256xf32>
    %cst_19 = arith.constant 5.000000e-01 : f32
    %36 = vector.broadcast %cst_19 : f32 to vector<8x256xf32>
    %37 = arith.mulf %36, %35 : vector<8x256xf32>
    %cst_20 = arith.constant 4.471500e-02 : f32
    %38 = vector.broadcast %cst_20 : f32 to vector<8x256xf32>
    %39 = arith.mulf %38, %35 : vector<8x256xf32>
    %40 = arith.mulf %39, %35 : vector<8x256xf32>
    %41 = arith.mulf %40, %35 : vector<8x256xf32>
    %42 = arith.addf %35, %41 : vector<8x256xf32>
    %cst_21 = arith.constant 0.797884583 : f32
    %43 = vector.broadcast %cst_21 : f32 to vector<8x256xf32>
    %44 = arith.mulf %43, %42 : vector<8x256xf32>
    %45 = math.tanh %44 : vector<8x256xf32>
    %cst_22 = arith.constant 1.000000e+00 : f32
    %46 = vector.broadcast %cst_22 : f32 to vector<8x256xf32>
    %47 = arith.addf %46, %45 : vector<8x256xf32>
    %48 = arith.mulf %37, %47 : vector<8x256xf32>
    %49 = arith.mulf %30, %48 : vector<8x256xf32>
    %50 = arith.truncf %49 : vector<8x256xf32> to vector<8x256xbf16>
    %c0_23 = arith.constant 0 : index
    %c0_24 = arith.constant 0 : index
    %51 = vector.load %arg8[%c0_23, %c0_24] : memref<256x64xbf16, #tpu.memory_space<vmem>>, vector<256x64xbf16>
    %cst_25 = arith.constant dense<0.000000e+00> : vector<8x64xf32>
    %52 = tpu.matmul %50, %51, %cst_25 {dimension_numbers = #tpu.dot_dimension_numbers<[1], [0], [0], [1], [0, 0, 1, 1], [], []>} : vector<8x256xbf16>, vector<256x64xbf16>, vector<8x64xf32> -> vector<8x64xf32>
    %c0_26 = arith.constant 0 : index
    %c0_27 = arith.constant 0 : index
    %53 = vector.load %arg9[%c0_26, %c0_27] : memref<1x64xf32, #tpu.memory_space<vmem>>, vector<1x64xf32>
    %54 = vector.broadcast %53 : vector<1x64xf32> to vector<8x64xf32>
    %55 = arith.addf %52, %54 : vector<8x64xf32>
    %56 = arith.addf %55, %0 : vector<8x64xf32>
    %c0_28 = arith.constant 0 : index
    %c0_29 = arith.constant 0 : index
    %57 = vector.load %arg10[%c0_28, %c0_29] : memref<8x64xf32, #tpu.memory_space<vmem>>, vector<8x64xf32>
    tpu.vector_store %arg10[%c0_28, %c0_29], %56 {strides = array<i32>} : memref<8x64xf32, #tpu.memory_space<vmem>>, vector<8x64xf32>,
    return
  }
  func.func @transform_0(%arg0: i32) -> (i32, i32) {
    %c0_i32 = arith.constant 0 : i32
    %c0_i32_0 = arith.constant 0 : i32
    return %arg0, %c0_i32 : i32, i32
  }
  func.func @transform_1(%arg0: i32) -> (i32, i32) {
    %c0_i32 = arith.constant 0 : i32
    %c0_i32_0 = arith.constant 0 : i32
    %c0_i32_1 = arith.constant 0 : i32
    return %c0_i32, %c0_i32_0 : i32, i32
  }
  func.func @transform_2(%arg0: i32) -> (i32, i32) {
    %c0_i32 = arith.constant 0 : i32
    %c0_i32_0 = arith.constant 0 : i32
    %c0_i32_1 = arith.constant 0 : i32
    return %c0_i32, %c0_i32_0 : i32, i32
  }
  func.func @transform_3(%arg0: i32) -> (i32, i32) {
    %c0_i32 = arith.constant 0 : i32
    %c0_i32_0 = arith.constant 0 : i32
    %c0_i32_1 = arith.constant 0 : i32
    return %c0_i32, %c0_i32_0 : i32, i32
  }
  func.func @transform_4(%arg0: i32) -> (i32, i32) {
    %c0_i32 = arith.constant 0 : i32
    %c0_i32_0 = arith.constant 0 : i32
    %c0_i32_1 = arith.constant 0 : i32
    return %c0_i32, %c0_i32_0 : i32, i32
  }
  func.func @transform_5(%arg0: i32) -> (i32, i32) {
    %c0_i32 = arith.constant 0 : i32
    %c0_i32_0 = arith.constant 0 : i32
    %c0_i32_1 = arith.constant 0 : i32
    return %c0_i32, %c0_i32_0 : i32, i32
  }
  func.func @transform_6(%arg0: i32) -> (i32, i32) {
    %c0_i32 = arith.constant 0 : i32
    %c0_i32_0 = arith.constant 0 : i32
    %c0_i32_1 = arith.constant 0 : i32
    return %c0_i32, %c0_i32_0 : i32, i32
  }
  func.func @transform_7(%arg0: i32) -> (i32, i32) {
    %c0_i32 = arith.constant 0 : i32
    %c0_i32_0 = arith.constant 0 : i32
    %c0_i32_1 = arith.constant 0 : i32
    return %c0_i32, %c0_i32_0 : i32, i32
  }
  func.func @transform_8(%arg0: i32) -> (i32, i32) {
    %c0_i32 = arith.constant 0 : i32
    %c0_i32_0 = arith.constant 0 : i32
    %c0_i32_1 = arith.constant 0 : i32
    return %c0_i32, %c0_i32_0 : i32, i32
  }
  func.func @transform_9(%arg0: i32) -> (i32, i32) {
    %c0_i32 = arith.constant 0 : i32
    %c0_i32_0 = arith.constant 0 : i32
    return %arg0, %c0_i32 : i32, i32
  }
}

module attributes {stable_mosaic.version = 11 : i64} {
  func.func @_fused_attn_kernel(%arg0: i32, %arg1: memref<8x64xf32, #tpu.memory_space<vmem>>, %arg2: memref<8x64xf32, #tpu.memory_space<vmem>>, %arg3: memref<1x64xf32, #tpu.memory_space<vmem>>, %arg4: memref<1x64xf32, #tpu.memory_space<vmem>>, %arg5: memref<1x64xf32, #tpu.memory_space<vmem>>, %arg6: memref<1x64xf32, #tpu.memory_space<vmem>>, %arg7: memref<64x64xbf16, #tpu.memory_space<vmem>>, %arg8: memref<64x64xbf16, #tpu.memory_space<vmem>>, %arg9: memref<64x64xbf16, #tpu.memory_space<vmem>>, %arg10: memref<64x64xbf16, #tpu.memory_space<vmem>>, %arg11: memref<1x64xf32, #tpu.memory_space<vmem>>, %arg12: memref<8x64xf32, #tpu.memory_space<vmem>>) attributes {dimension_semantics = [#tpu.dimension_semantics<parallel>], iteration_bounds = array<i64: 1>, scalar_prefetch = 0 : i64, scratch_operands = 0 : i64, tpu.core_type = #tpu.core_type<tc>, window_params = [{transform_indices = @transform_0, window_bounds = array<i64: 8, 64>}, {pipeline_mode = #tpu.pipeline_mode<synchronous>, transform_indices = @transform_1, window_bounds = array<i64: 8, 64>}, {pipeline_mode = #tpu.pipeline_mode<synchronous>, transform_indices = @transform_2, window_bounds = array<i64: 1, 64>}, {pipeline_mode = #tpu.pipeline_mode<synchronous>, transform_indices = @transform_3, window_bounds = array<i64: 1, 64>}, {pipeline_mode = #tpu.pipeline_mode<synchronous>, transform_indices = @transform_4, window_bounds = array<i64: 1, 64>}, {pipeline_mode = #tpu.pipeline_mode<synchronous>, transform_indices = @transform_5, window_bounds = array<i64: 1, 64>}, {pipeline_mode = #tpu.pipeline_mode<synchronous>, transform_indices = @transform_6, window_bounds = array<i64: 64, 64>}, {pipeline_mode = #tpu.pipeline_mode<synchronous>, transform_indices = @transform_7, window_bounds = array<i64: 64, 64>}, {pipeline_mode = #tpu.pipeline_mode<synchronous>, transform_indices = @transform_8, window_bounds = array<i64: 64, 64>}, {pipeline_mode = #tpu.pipeline_mode<synchronous>, transform_indices = @transform_9, window_bounds = array<i64: 64, 64>}, {pipeline_mode = #tpu.pipeline_mode<synchronous>, transform_indices = @transform_10, window_bounds = array<i64: 1, 64>}, {transform_indices = @transform_11, window_bounds = array<i64: 8, 64>}]} {
    %c0 = arith.constant 0 : index
    %c0_0 = arith.constant 0 : index
    %0 = vector.load %arg1[%c0, %c0_0] : memref<8x64xf32, #tpu.memory_space<vmem>>, vector<8x64xf32>
    %cst = arith.constant dense<0.000000e+00> : vector<8xf32>
    %1 = vector.multi_reduction <add>, %0, %cst [1] : vector<8x64xf32> to vector<8xf32>
    %2 = vector.shape_cast %1 : vector<8xf32> to vector<8x1xf32>
    %cst_1 = arith.constant 6.400000e+01 : f32
    %3 = vector.broadcast %cst_1 : f32 to vector<8x1xf32>
    %4 = arith.divf %2, %3 : vector<8x1xf32>
    %5 = vector.broadcast %4 : vector<8x1xf32> to vector<8x64xf32>
    %6 = arith.subf %0, %5 : vector<8x64xf32>
    %7 = arith.mulf %6, %6 : vector<8x64xf32>
    %cst_2 = arith.constant dense<0.000000e+00> : vector<8xf32>
    %8 = vector.multi_reduction <add>, %7, %cst_2 [1] : vector<8x64xf32> to vector<8xf32>
    %9 = vector.shape_cast %8 : vector<8xf32> to vector<8x1xf32>
    %cst_3 = arith.constant 6.400000e+01 : f32
    %10 = vector.broadcast %cst_3 : f32 to vector<8x1xf32>
    %11 = arith.divf %9, %10 : vector<8x1xf32>
    %12 = vector.broadcast %4 : vector<8x1xf32> to vector<8x64xf32>
    %13 = arith.subf %0, %12 : vector<8x64xf32>
    %cst_4 = arith.constant 9.99999974E-6 : f32
    %14 = vector.broadcast %cst_4 : f32 to vector<8x1xf32>
    %15 = arith.addf %11, %14 : vector<8x1xf32>
    %16 = math.rsqrt %15 : vector<8x1xf32>
    %17 = vector.broadcast %16 : vector<8x1xf32> to vector<8x64xf32>
    %18 = arith.mulf %13, %17 : vector<8x64xf32>
    %c0_5 = arith.constant 0 : index
    %c0_6 = arith.constant 0 : index
    %19 = vector.load %arg3[%c0_5, %c0_6] : memref<1x64xf32, #tpu.memory_space<vmem>>, vector<1x64xf32>
    %20 = vector.broadcast %19 : vector<1x64xf32> to vector<8x64xf32>
    %21 = arith.mulf %18, %20 : vector<8x64xf32>
    %c0_7 = arith.constant 0 : index
    %c0_8 = arith.constant 0 : index
    %22 = vector.load %arg4[%c0_7, %c0_8] : memref<1x64xf32, #tpu.memory_space<vmem>>, vector<1x64xf32>
    %23 = vector.broadcast %22 : vector<1x64xf32> to vector<8x64xf32>
    %24 = arith.addf %21, %23 : vector<8x64xf32>
    %c0_9 = arith.constant 0 : index
    %c0_10 = arith.constant 0 : index
    %25 = vector.load %arg2[%c0_9, %c0_10] : memref<8x64xf32, #tpu.memory_space<vmem>>, vector<8x64xf32>
    %cst_11 = arith.constant dense<0.000000e+00> : vector<8xf32>
    %26 = vector.multi_reduction <add>, %25, %cst_11 [1] : vector<8x64xf32> to vector<8xf32>
    %27 = vector.shape_cast %26 : vector<8xf32> to vector<8x1xf32>
    %cst_12 = arith.constant 6.400000e+01 : f32
    %28 = vector.broadcast %cst_12 : f32 to vector<8x1xf32>
    %29 = arith.divf %27, %28 : vector<8x1xf32>
    %30 = vector.broadcast %29 : vector<8x1xf32> to vector<8x64xf32>
    %31 = arith.subf %25, %30 : vector<8x64xf32>
    %32 = arith.mulf %31, %31 : vector<8x64xf32>
    %cst_13 = arith.constant dense<0.000000e+00> : vector<8xf32>
    %33 = vector.multi_reduction <add>, %32, %cst_13 [1] : vector<8x64xf32> to vector<8xf32>
    %34 = vector.shape_cast %33 : vector<8xf32> to vector<8x1xf32>
    %cst_14 = arith.constant 6.400000e+01 : f32
    %35 = vector.broadcast %cst_14 : f32 to vector<8x1xf32>
    %36 = arith.divf %34, %35 : vector<8x1xf32>
    %37 = vector.broadcast %29 : vector<8x1xf32> to vector<8x64xf32>
    %38 = arith.subf %25, %37 : vector<8x64xf32>
    %cst_15 = arith.constant 9.99999974E-6 : f32
    %39 = vector.broadcast %cst_15 : f32 to vector<8x1xf32>
    %40 = arith.addf %36, %39 : vector<8x1xf32>
    %41 = math.rsqrt %40 : vector<8x1xf32>
    %42 = vector.broadcast %41 : vector<8x1xf32> to vector<8x64xf32>
    %43 = arith.mulf %38, %42 : vector<8x64xf32>
    %c0_16 = arith.constant 0 : index
    %c0_17 = arith.constant 0 : index
    %44 = vector.load %arg5[%c0_16, %c0_17] : memref<1x64xf32, #tpu.memory_space<vmem>>, vector<1x64xf32>
    %45 = vector.broadcast %44 : vector<1x64xf32> to vector<8x64xf32>
    %46 = arith.mulf %43, %45 : vector<8x64xf32>
    %c0_18 = arith.constant 0 : index
    %c0_19 = arith.constant 0 : index
    %47 = vector.load %arg6[%c0_18, %c0_19] : memref<1x64xf32, #tpu.memory_space<vmem>>, vector<1x64xf32>
    %48 = vector.broadcast %47 : vector<1x64xf32> to vector<8x64xf32>
    %49 = arith.addf %46, %48 : vector<8x64xf32>
    %50 = arith.truncf %24 : vector<8x64xf32> to vector<8x64xbf16>
    %c0_20 = arith.constant 0 : index
    %c0_21 = arith.constant 0 : index
    %51 = vector.load %arg7[%c0_20, %c0_21] : memref<64x64xbf16, #tpu.memory_space<vmem>>, vector<64x64xbf16>
    %cst_22 = arith.constant dense<0.000000e+00> : vector<8x64xf32>
    %52 = tpu.matmul %50, %51, %cst_22 {dimension_numbers = #tpu.dot_dimension_numbers<[1], [0], [0], [1], [0, 0, 1, 1], [], []>} : vector<8x64xbf16>, vector<64x64xbf16>, vector<8x64xf32> -> vector<8x64xf32>
    %53 = arith.truncf %49 : vector<8x64xf32> to vector<8x64xbf16>
    %c0_23 = arith.constant 0 : index
    %c0_24 = arith.constant 0 : index
    %54 = vector.load %arg8[%c0_23, %c0_24] : memref<64x64xbf16, #tpu.memory_space<vmem>>, vector<64x64xbf16>
    %cst_25 = arith.constant dense<0.000000e+00> : vector<8x64xf32>
    %55 = tpu.matmul %53, %54, %cst_25 {dimension_numbers = #tpu.dot_dimension_numbers<[1], [0], [0], [1], [0, 0, 1, 1], [], []>} : vector<8x64xbf16>, vector<64x64xbf16>, vector<8x64xf32> -> vector<8x64xf32>
    %56 = arith.truncf %49 : vector<8x64xf32> to vector<8x64xbf16>
    %c0_26 = arith.constant 0 : index
    %c0_27 = arith.constant 0 : index
    %57 = vector.load %arg9[%c0_26, %c0_27] : memref<64x64xbf16, #tpu.memory_space<vmem>>, vector<64x64xbf16>
    %cst_28 = arith.constant dense<0.000000e+00> : vector<8x64xf32>
    %58 = tpu.matmul %56, %57, %cst_28 {dimension_numbers = #tpu.dot_dimension_numbers<[1], [0], [0], [1], [0, 0, 1, 1], [], []>} : vector<8x64xbf16>, vector<64x64xbf16>, vector<8x64xf32> -> vector<8x64xf32>
    %59 = vector.extract_strided_slice %52 {offsets = [0, 0], sizes = [8, 16], strides = [1, 1]} : vector<8x64xf32> to vector<8x16xf32>
    %60 = arith.truncf %59 : vector<8x16xf32> to vector<8x16xbf16>
    %61 = vector.extract_strided_slice %55 {offsets = [0, 0], sizes = [8, 16], strides = [1, 1]} : vector<8x64xf32> to vector<8x16xf32>
    %62 = arith.truncf %61 : vector<8x16xf32> to vector<8x16xbf16>
    %cst_29 = arith.constant dense<0.000000e+00> : vector<8x8xf32>
    %63 = tpu.matmul %60, %62, %cst_29 {dimension_numbers = #tpu.dot_dimension_numbers<[1], [1], [0], [0], [0, 0, 1, 0], [], []>} : vector<8x16xbf16>, vector<8x16xbf16>, vector<8x8xf32> -> vector<8x8xf32>
    %cst_30 = arith.constant 2.500000e-01 : f32
    %64 = vector.broadcast %cst_30 : f32 to vector<8x8xf32>
    %65 = arith.mulf %63, %64 : vector<8x8xf32>
    %cst_31 = arith.constant dense<0xFF800000> : vector<8xf32>
    %66 = vector.multi_reduction <maximumf>, %65, %cst_31 [1] : vector<8x8xf32> to vector<8xf32>
    %67 = vector.shape_cast %66 : vector<8xf32> to vector<8x1xf32>
    %68 = vector.broadcast %67 : vector<8x1xf32> to vector<8x8xf32>
    %69 = arith.subf %65, %68 : vector<8x8xf32>
    %70 = math.exp %69 : vector<8x8xf32>
    %cst_32 = arith.constant dense<0.000000e+00> : vector<8xf32>
    %71 = vector.multi_reduction <add>, %70, %cst_32 [1] : vector<8x8xf32> to vector<8xf32>
    %72 = vector.shape_cast %71 : vector<8xf32> to vector<8x1xf32>
    %73 = tpu.reciprocal %72 {approx = true} : vector<8x1xf32> -> vector<8x1xf32>
    %74 = vector.broadcast %73 : vector<8x1xf32> to vector<8x8xf32>
    %75 = arith.mulf %70, %74 : vector<8x8xf32>
    %76 = arith.truncf %75 : vector<8x8xf32> to vector<8x8xbf16>
    %77 = vector.extract_strided_slice %58 {offsets = [0, 0], sizes = [8, 16], strides = [1, 1]} : vector<8x64xf32> to vector<8x16xf32>
    %78 = arith.truncf %77 : vector<8x16xf32> to vector<8x16xbf16>
    %cst_33 = arith.constant dense<0.000000e+00> : vector<8x16xf32>
    %79 = tpu.matmul %76, %78, %cst_33 {dimension_numbers = #tpu.dot_dimension_numbers<[1], [0], [0], [1], [0, 0, 1, 1], [], []>} : vector<8x8xbf16>, vector<8x16xbf16>, vector<8x16xf32> -> vector<8x16xf32>
    %80 = vector.extract_strided_slice %52 {offsets = [0, 16], sizes = [8, 16], strides = [1, 1]} : vector<8x64xf32> to vector<8x16xf32>
    %81 = arith.truncf %80 : vector<8x16xf32> to vector<8x16xbf16>
    %82 = vector.extract_strided_slice %55 {offsets = [0, 16], sizes = [8, 16], strides = [1, 1]} : vector<8x64xf32> to vector<8x16xf32>
    %83 = arith.truncf %82 : vector<8x16xf32> to vector<8x16xbf16>
    %cst_34 = arith.constant dense<0.000000e+00> : vector<8x8xf32>
    %84 = tpu.matmul %81, %83, %cst_34 {dimension_numbers = #tpu.dot_dimension_numbers<[1], [1], [0], [0], [0, 0, 1, 0], [], []>} : vector<8x16xbf16>, vector<8x16xbf16>, vector<8x8xf32> -> vector<8x8xf32>
    %cst_35 = arith.constant 2.500000e-01 : f32
    %85 = vector.broadcast %cst_35 : f32 to vector<8x8xf32>
    %86 = arith.mulf %84, %85 : vector<8x8xf32>
    %cst_36 = arith.constant dense<0xFF800000> : vector<8xf32>
    %87 = vector.multi_reduction <maximumf>, %86, %cst_36 [1] : vector<8x8xf32> to vector<8xf32>
    %88 = vector.shape_cast %87 : vector<8xf32> to vector<8x1xf32>
    %89 = vector.broadcast %88 : vector<8x1xf32> to vector<8x8xf32>
    %90 = arith.subf %86, %89 : vector<8x8xf32>
    %91 = math.exp %90 : vector<8x8xf32>
    %cst_37 = arith.constant dense<0.000000e+00> : vector<8xf32>
    %92 = vector.multi_reduction <add>, %91, %cst_37 [1] : vector<8x8xf32> to vector<8xf32>
    %93 = vector.shape_cast %92 : vector<8xf32> to vector<8x1xf32>
    %94 = tpu.reciprocal %93 {approx = true} : vector<8x1xf32> -> vector<8x1xf32>
    %95 = vector.broadcast %94 : vector<8x1xf32> to vector<8x8xf32>
    %96 = arith.mulf %91, %95 : vector<8x8xf32>
    %97 = arith.truncf %96 : vector<8x8xf32> to vector<8x8xbf16>
    %98 = vector.extract_strided_slice %58 {offsets = [0, 16], sizes = [8, 16], strides = [1, 1]} : vector<8x64xf32> to vector<8x16xf32>
    %99 = arith.truncf %98 : vector<8x16xf32> to vector<8x16xbf16>
    %cst_38 = arith.constant dense<0.000000e+00> : vector<8x16xf32>
    %100 = tpu.matmul %97, %99, %cst_38 {dimension_numbers = #tpu.dot_dimension_numbers<[1], [0], [0], [1], [0, 0, 1, 1], [], []>} : vector<8x8xbf16>, vector<8x16xbf16>, vector<8x16xf32> -> vector<8x16xf32>
    %101 = vector.extract_strided_slice %52 {offsets = [0, 32], sizes = [8, 16], strides = [1, 1]} : vector<8x64xf32> to vector<8x16xf32>
    %102 = arith.truncf %101 : vector<8x16xf32> to vector<8x16xbf16>
    %103 = vector.extract_strided_slice %55 {offsets = [0, 32], sizes = [8, 16], strides = [1, 1]} : vector<8x64xf32> to vector<8x16xf32>
    %104 = arith.truncf %103 : vector<8x16xf32> to vector<8x16xbf16>
    %cst_39 = arith.constant dense<0.000000e+00> : vector<8x8xf32>
    %105 = tpu.matmul %102, %104, %cst_39 {dimension_numbers = #tpu.dot_dimension_numbers<[1], [1], [0], [0], [0, 0, 1, 0], [], []>} : vector<8x16xbf16>, vector<8x16xbf16>, vector<8x8xf32> -> vector<8x8xf32>
    %cst_40 = arith.constant 2.500000e-01 : f32
    %106 = vector.broadcast %cst_40 : f32 to vector<8x8xf32>
    %107 = arith.mulf %105, %106 : vector<8x8xf32>
    %cst_41 = arith.constant dense<0xFF800000> : vector<8xf32>
    %108 = vector.multi_reduction <maximumf>, %107, %cst_41 [1] : vector<8x8xf32> to vector<8xf32>
    %109 = vector.shape_cast %108 : vector<8xf32> to vector<8x1xf32>
    %110 = vector.broadcast %109 : vector<8x1xf32> to vector<8x8xf32>
    %111 = arith.subf %107, %110 : vector<8x8xf32>
    %112 = math.exp %111 : vector<8x8xf32>
    %cst_42 = arith.constant dense<0.000000e+00> : vector<8xf32>
    %113 = vector.multi_reduction <add>, %112, %cst_42 [1] : vector<8x8xf32> to vector<8xf32>
    %114 = vector.shape_cast %113 : vector<8xf32> to vector<8x1xf32>
    %115 = tpu.reciprocal %114 {approx = true} : vector<8x1xf32> -> vector<8x1xf32>
    %116 = vector.broadcast %115 : vector<8x1xf32> to vector<8x8xf32>
    %117 = arith.mulf %112, %116 : vector<8x8xf32>
    %118 = arith.truncf %117 : vector<8x8xf32> to vector<8x8xbf16>
    %119 = vector.extract_strided_slice %58 {offsets = [0, 32], sizes = [8, 16], strides = [1, 1]} : vector<8x64xf32> to vector<8x16xf32>
    %120 = arith.truncf %119 : vector<8x16xf32> to vector<8x16xbf16>
    %cst_43 = arith.constant dense<0.000000e+00> : vector<8x16xf32>
    %121 = tpu.matmul %118, %120, %cst_43 {dimension_numbers = #tpu.dot_dimension_numbers<[1], [0], [0], [1], [0, 0, 1, 1], [], []>} : vector<8x8xbf16>, vector<8x16xbf16>, vector<8x16xf32> -> vector<8x16xf32>
    %122 = vector.extract_strided_slice %52 {offsets = [0, 48], sizes = [8, 16], strides = [1, 1]} : vector<8x64xf32> to vector<8x16xf32>
    %123 = arith.truncf %122 : vector<8x16xf32> to vector<8x16xbf16>
    %124 = vector.extract_strided_slice %55 {offsets = [0, 48], sizes = [8, 16], strides = [1, 1]} : vector<8x64xf32> to vector<8x16xf32>
    %125 = arith.truncf %124 : vector<8x16xf32> to vector<8x16xbf16>
    %cst_44 = arith.constant dense<0.000000e+00> : vector<8x8xf32>
    %126 = tpu.matmul %123, %125, %cst_44 {dimension_numbers = #tpu.dot_dimension_numbers<[1], [1], [0], [0], [0, 0, 1, 0], [], []>} : vector<8x16xbf16>, vector<8x16xbf16>, vector<8x8xf32> -> vector<8x8xf32>
    %cst_45 = arith.constant 2.500000e-01 : f32
    %127 = vector.broadcast %cst_45 : f32 to vector<8x8xf32>
    %128 = arith.mulf %126, %127 : vector<8x8xf32>
    %cst_46 = arith.constant dense<0xFF800000> : vector<8xf32>
    %129 = vector.multi_reduction <maximumf>, %128, %cst_46 [1] : vector<8x8xf32> to vector<8xf32>
    %130 = vector.shape_cast %129 : vector<8xf32> to vector<8x1xf32>
    %131 = vector.broadcast %130 : vector<8x1xf32> to vector<8x8xf32>
    %132 = arith.subf %128, %131 : vector<8x8xf32>
    %133 = math.exp %132 : vector<8x8xf32>
    %cst_47 = arith.constant dense<0.000000e+00> : vector<8xf32>
    %134 = vector.multi_reduction <add>, %133, %cst_47 [1] : vector<8x8xf32> to vector<8xf32>
    %135 = vector.shape_cast %134 : vector<8xf32> to vector<8x1xf32>
    %136 = tpu.reciprocal %135 {approx = true} : vector<8x1xf32> -> vector<8x1xf32>
    %137 = vector.broadcast %136 : vector<8x1xf32> to vector<8x8xf32>
    %138 = arith.mulf %133, %137 : vector<8x8xf32>
    %139 = arith.truncf %138 : vector<8x8xf32> to vector<8x8xbf16>
    %140 = vector.extract_strided_slice %58 {offsets = [0, 48], sizes = [8, 16], strides = [1, 1]} : vector<8x64xf32> to vector<8x16xf32>
    %141 = arith.truncf %140 : vector<8x16xf32> to vector<8x16xbf16>
    %cst_48 = arith.constant dense<0.000000e+00> : vector<8x16xf32>
    %142 = tpu.matmul %139, %141, %cst_48 {dimension_numbers = #tpu.dot_dimension_numbers<[1], [0], [0], [1], [0, 0, 1, 1], [], []>} : vector<8x8xbf16>, vector<8x16xbf16>, vector<8x16xf32> -> vector<8x16xf32>
    %143 = tpu.concatenate %79, %100, %121, %142 in 1 : vector<8x16xf32>, vector<8x16xf32>, vector<8x16xf32>, vector<8x16xf32> -> vector<8x64xf32>
    %144 = arith.truncf %143 : vector<8x64xf32> to vector<8x64xbf16>
    %c0_49 = arith.constant 0 : index
    %c0_50 = arith.constant 0 : index
    %145 = vector.load %arg10[%c0_49, %c0_50] : memref<64x64xbf16, #tpu.memory_space<vmem>>, vector<64x64xbf16>
    %cst_51 = arith.constant dense<0.000000e+00> : vector<8x64xf32>
    %146 = tpu.matmul %144, %145, %cst_51 {dimension_numbers = #tpu.dot_dimension_numbers<[1], [0], [0], [1], [0, 0, 1, 1], [], []>} : vector<8x64xbf16>, vector<64x64xbf16>, vector<8x64xf32> -> vector<8x64xf32>
    %c0_52 = arith.constant 0 : index
    %c0_53 = arith.constant 0 : index
    %147 = vector.load %arg11[%c0_52, %c0_53] : memref<1x64xf32, #tpu.memory_space<vmem>>, vector<1x64xf32>
    %148 = vector.broadcast %147 : vector<1x64xf32> to vector<8x64xf32>
    %149 = arith.addf %146, %148 : vector<8x64xf32>
    %150 = arith.addf %149, %0 : vector<8x64xf32>
    %c0_54 = arith.constant 0 : index
    %c0_55 = arith.constant 0 : index
    %151 = vector.load %arg12[%c0_54, %c0_55] : memref<8x64xf32, #tpu.memory_space<vmem>>, vector<8x64xf32>
    tpu.vector_store %arg12[%c0_54, %c0_55], %150 {strides = array<i32>} : memref<8x64xf32, #tpu.memory_space<vmem>>, vector<8x64xf32>,
    return
  }
  func.func @transform_0(%arg0: i32) -> (i32, i32) {
    %c0_i32 = arith.constant 0 : i32
    %c0_i32_0 = arith.constant 0 : i32
    return %arg0, %c0_i32 : i32, i32
  }
  func.func @transform_1(%arg0: i32) -> (i32, i32) {
    %c0_i32 = arith.constant 0 : i32
    %c0_i32_0 = arith.constant 0 : i32
    %c0_i32_1 = arith.constant 0 : i32
    return %c0_i32, %c0_i32_0 : i32, i32
  }
  func.func @transform_2(%arg0: i32) -> (i32, i32) {
    %c0_i32 = arith.constant 0 : i32
    %c0_i32_0 = arith.constant 0 : i32
    %c0_i32_1 = arith.constant 0 : i32
    return %c0_i32, %c0_i32_0 : i32, i32
  }
  func.func @transform_3(%arg0: i32) -> (i32, i32) {
    %c0_i32 = arith.constant 0 : i32
    %c0_i32_0 = arith.constant 0 : i32
    %c0_i32_1 = arith.constant 0 : i32
    return %c0_i32, %c0_i32_0 : i32, i32
  }
  func.func @transform_4(%arg0: i32) -> (i32, i32) {
    %c0_i32 = arith.constant 0 : i32
    %c0_i32_0 = arith.constant 0 : i32
    %c0_i32_1 = arith.constant 0 : i32
    return %c0_i32, %c0_i32_0 : i32, i32
  }
  func.func @transform_5(%arg0: i32) -> (i32, i32) {
    %c0_i32 = arith.constant 0 : i32
    %c0_i32_0 = arith.constant 0 : i32
    %c0_i32_1 = arith.constant 0 : i32
    return %c0_i32, %c0_i32_0 : i32, i32
  }
  func.func @transform_6(%arg0: i32) -> (i32, i32) {
    %c0_i32 = arith.constant 0 : i32
    %c0_i32_0 = arith.constant 0 : i32
    %c0_i32_1 = arith.constant 0 : i32
    return %c0_i32, %c0_i32_0 : i32, i32
  }
  func.func @transform_7(%arg0: i32) -> (i32, i32) {
    %c0_i32 = arith.constant 0 : i32
    %c0_i32_0 = arith.constant 0 : i32
    %c0_i32_1 = arith.constant 0 : i32
    return %c0_i32, %c0_i32_0 : i32, i32
  }
  func.func @transform_8(%arg0: i32) -> (i32, i32) {
    %c0_i32 = arith.constant 0 : i32
    %c0_i32_0 = arith.constant 0 : i32
    %c0_i32_1 = arith.constant 0 : i32
    return %c0_i32, %c0_i32_0 : i32, i32
  }
  func.func @transform_9(%arg0: i32) -> (i32, i32) {
    %c0_i32 = arith.constant 0 : i32
    %c0_i32_0 = arith.constant 0 : i32
    %c0_i32_1 = arith.constant 0 : i32
    return %c0_i32, %c0_i32_0 : i32, i32
  }
  func.func @transform_10(%arg0: i32) -> (i32, i32) {
    %c0_i32 = arith.constant 0 : i32
    %c0_i32_0 = arith.constant 0 : i32
    %c0_i32_1 = arith.constant 0 : i32
    return %c0_i32, %c0_i32_0 : i32, i32
  }
  func.func @transform_11(%arg0: i32) -> (i32, i32) {
    %c0_i32 = arith.constant 0 : i32
    %c0_i32_0 = arith.constant 0 : i32
    return %arg0, %c0_i32 : i32, i32
  }
}

module attributes {stable_mosaic.version = 11 : i64} {
  func.func @_fused_attn_kernel(%arg0: i32, %arg1: memref<8x64xf32, #tpu.memory_space<vmem>>, %arg2: memref<8x64xf32, #tpu.memory_space<vmem>>, %arg3: memref<1x64xf32, #tpu.memory_space<vmem>>, %arg4: memref<1x64xf32, #tpu.memory_space<vmem>>, %arg5: memref<1x64xf32, #tpu.memory_space<vmem>>, %arg6: memref<1x64xf32, #tpu.memory_space<vmem>>, %arg7: memref<64x64xbf16, #tpu.memory_space<vmem>>, %arg8: memref<64x64xbf16, #tpu.memory_space<vmem>>, %arg9: memref<64x64xbf16, #tpu.memory_space<vmem>>, %arg10: memref<64x64xbf16, #tpu.memory_space<vmem>>, %arg11: memref<1x64xf32, #tpu.memory_space<vmem>>, %arg12: memref<8x64xf32, #tpu.memory_space<vmem>>) attributes {dimension_semantics = [#tpu.dimension_semantics<parallel>], iteration_bounds = array<i64: 1>, scalar_prefetch = 0 : i64, scratch_operands = 0 : i64, tpu.core_type = #tpu.core_type<tc>, window_params = [{transform_indices = @transform_0, window_bounds = array<i64: 8, 64>}, {pipeline_mode = #tpu.pipeline_mode<synchronous>, transform_indices = @transform_1, window_bounds = array<i64: 8, 64>}, {pipeline_mode = #tpu.pipeline_mode<synchronous>, transform_indices = @transform_2, window_bounds = array<i64: 1, 64>}, {pipeline_mode = #tpu.pipeline_mode<synchronous>, transform_indices = @transform_3, window_bounds = array<i64: 1, 64>}, {pipeline_mode = #tpu.pipeline_mode<synchronous>, transform_indices = @transform_4, window_bounds = array<i64: 1, 64>}, {pipeline_mode = #tpu.pipeline_mode<synchronous>, transform_indices = @transform_5, window_bounds = array<i64: 1, 64>}, {pipeline_mode = #tpu.pipeline_mode<synchronous>, transform_indices = @transform_6, window_bounds = array<i64: 64, 64>}, {pipeline_mode = #tpu.pipeline_mode<synchronous>, transform_indices = @transform_7, window_bounds = array<i64: 64, 64>}, {pipeline_mode = #tpu.pipeline_mode<synchronous>, transform_indices = @transform_8, window_bounds = array<i64: 64, 64>}, {pipeline_mode = #tpu.pipeline_mode<synchronous>, transform_indices = @transform_9, window_bounds = array<i64: 64, 64>}, {pipeline_mode = #tpu.pipeline_mode<synchronous>, transform_indices = @transform_10, window_bounds = array<i64: 1, 64>}, {transform_indices = @transform_11, window_bounds = array<i64: 8, 64>}]} {
    %c0 = arith.constant 0 : index
    %c0_0 = arith.constant 0 : index
    %0 = vector.load %arg1[%c0, %c0_0] : memref<8x64xf32, #tpu.memory_space<vmem>>, vector<8x64xf32>
    %cst = arith.constant dense<0.000000e+00> : vector<8xf32>
    %1 = vector.multi_reduction <add>, %0, %cst [1] : vector<8x64xf32> to vector<8xf32>
    %2 = vector.shape_cast %1 : vector<8xf32> to vector<8x1xf32>
    %cst_1 = arith.constant 6.400000e+01 : f32
    %3 = vector.broadcast %cst_1 : f32 to vector<8x1xf32>
    %4 = arith.divf %2, %3 : vector<8x1xf32>
    %5 = vector.broadcast %4 : vector<8x1xf32> to vector<8x64xf32>
    %6 = arith.subf %0, %5 : vector<8x64xf32>
    %7 = arith.mulf %6, %6 : vector<8x64xf32>
    %cst_2 = arith.constant dense<0.000000e+00> : vector<8xf32>
    %8 = vector.multi_reduction <add>, %7, %cst_2 [1] : vector<8x64xf32> to vector<8xf32>
    %9 = vector.shape_cast %8 : vector<8xf32> to vector<8x1xf32>
    %cst_3 = arith.constant 6.400000e+01 : f32
    %10 = vector.broadcast %cst_3 : f32 to vector<8x1xf32>
    %11 = arith.divf %9, %10 : vector<8x1xf32>
    %12 = vector.broadcast %4 : vector<8x1xf32> to vector<8x64xf32>
    %13 = arith.subf %0, %12 : vector<8x64xf32>
    %cst_4 = arith.constant 9.99999974E-6 : f32
    %14 = vector.broadcast %cst_4 : f32 to vector<8x1xf32>
    %15 = arith.addf %11, %14 : vector<8x1xf32>
    %16 = math.rsqrt %15 : vector<8x1xf32>
    %17 = vector.broadcast %16 : vector<8x1xf32> to vector<8x64xf32>
    %18 = arith.mulf %13, %17 : vector<8x64xf32>
    %c0_5 = arith.constant 0 : index
    %c0_6 = arith.constant 0 : index
    %19 = vector.load %arg3[%c0_5, %c0_6] : memref<1x64xf32, #tpu.memory_space<vmem>>, vector<1x64xf32>
    %20 = vector.broadcast %19 : vector<1x64xf32> to vector<8x64xf32>
    %21 = arith.mulf %18, %20 : vector<8x64xf32>
    %c0_7 = arith.constant 0 : index
    %c0_8 = arith.constant 0 : index
    %22 = vector.load %arg4[%c0_7, %c0_8] : memref<1x64xf32, #tpu.memory_space<vmem>>, vector<1x64xf32>
    %23 = vector.broadcast %22 : vector<1x64xf32> to vector<8x64xf32>
    %24 = arith.addf %21, %23 : vector<8x64xf32>
    %c0_9 = arith.constant 0 : index
    %c0_10 = arith.constant 0 : index
    %25 = vector.load %arg2[%c0_9, %c0_10] : memref<8x64xf32, #tpu.memory_space<vmem>>, vector<8x64xf32>
    %cst_11 = arith.constant dense<0.000000e+00> : vector<8xf32>
    %26 = vector.multi_reduction <add>, %25, %cst_11 [1] : vector<8x64xf32> to vector<8xf32>
    %27 = vector.shape_cast %26 : vector<8xf32> to vector<8x1xf32>
    %cst_12 = arith.constant 6.400000e+01 : f32
    %28 = vector.broadcast %cst_12 : f32 to vector<8x1xf32>
    %29 = arith.divf %27, %28 : vector<8x1xf32>
    %30 = vector.broadcast %29 : vector<8x1xf32> to vector<8x64xf32>
    %31 = arith.subf %25, %30 : vector<8x64xf32>
    %32 = arith.mulf %31, %31 : vector<8x64xf32>
    %cst_13 = arith.constant dense<0.000000e+00> : vector<8xf32>
    %33 = vector.multi_reduction <add>, %32, %cst_13 [1] : vector<8x64xf32> to vector<8xf32>
    %34 = vector.shape_cast %33 : vector<8xf32> to vector<8x1xf32>
    %cst_14 = arith.constant 6.400000e+01 : f32
    %35 = vector.broadcast %cst_14 : f32 to vector<8x1xf32>
    %36 = arith.divf %34, %35 : vector<8x1xf32>
    %37 = vector.broadcast %29 : vector<8x1xf32> to vector<8x64xf32>
    %38 = arith.subf %25, %37 : vector<8x64xf32>
    %cst_15 = arith.constant 9.99999974E-6 : f32
    %39 = vector.broadcast %cst_15 : f32 to vector<8x1xf32>
    %40 = arith.addf %36, %39 : vector<8x1xf32>
    %41 = math.rsqrt %40 : vector<8x1xf32>
    %42 = vector.broadcast %41 : vector<8x1xf32> to vector<8x64xf32>
    %43 = arith.mulf %38, %42 : vector<8x64xf32>
    %c0_16 = arith.constant 0 : index
    %c0_17 = arith.constant 0 : index
    %44 = vector.load %arg5[%c0_16, %c0_17] : memref<1x64xf32, #tpu.memory_space<vmem>>, vector<1x64xf32>
    %45 = vector.broadcast %44 : vector<1x64xf32> to vector<8x64xf32>
    %46 = arith.mulf %43, %45 : vector<8x64xf32>
    %c0_18 = arith.constant 0 : index
    %c0_19 = arith.constant 0 : index
    %47 = vector.load %arg6[%c0_18, %c0_19] : memref<1x64xf32, #tpu.memory_space<vmem>>, vector<1x64xf32>
    %48 = vector.broadcast %47 : vector<1x64xf32> to vector<8x64xf32>
    %49 = arith.addf %46, %48 : vector<8x64xf32>
    %50 = arith.truncf %24 : vector<8x64xf32> to vector<8x64xbf16>
    %c0_20 = arith.constant 0 : index
    %c0_21 = arith.constant 0 : index
    %51 = vector.load %arg7[%c0_20, %c0_21] : memref<64x64xbf16, #tpu.memory_space<vmem>>, vector<64x64xbf16>
    %cst_22 = arith.constant dense<0.000000e+00> : vector<8x64xf32>
    %52 = tpu.matmul %50, %51, %cst_22 {dimension_numbers = #tpu.dot_dimension_numbers<[1], [0], [0], [1], [0, 0, 1, 1], [], []>} : vector<8x64xbf16>, vector<64x64xbf16>, vector<8x64xf32> -> vector<8x64xf32>
    %53 = arith.truncf %49 : vector<8x64xf32> to vector<8x64xbf16>
    %c0_23 = arith.constant 0 : index
    %c0_24 = arith.constant 0 : index
    %54 = vector.load %arg8[%c0_23, %c0_24] : memref<64x64xbf16, #tpu.memory_space<vmem>>, vector<64x64xbf16>
    %cst_25 = arith.constant dense<0.000000e+00> : vector<8x64xf32>
    %55 = tpu.matmul %53, %54, %cst_25 {dimension_numbers = #tpu.dot_dimension_numbers<[1], [0], [0], [1], [0, 0, 1, 1], [], []>} : vector<8x64xbf16>, vector<64x64xbf16>, vector<8x64xf32> -> vector<8x64xf32>
    %56 = arith.truncf %49 : vector<8x64xf32> to vector<8x64xbf16>
    %c0_26 = arith.constant 0 : index
    %c0_27 = arith.constant 0 : index
    %57 = vector.load %arg9[%c0_26, %c0_27] : memref<64x64xbf16, #tpu.memory_space<vmem>>, vector<64x64xbf16>
    %cst_28 = arith.constant dense<0.000000e+00> : vector<8x64xf32>
    %58 = tpu.matmul %56, %57, %cst_28 {dimension_numbers = #tpu.dot_dimension_numbers<[1], [0], [0], [1], [0, 0, 1, 1], [], []>} : vector<8x64xbf16>, vector<64x64xbf16>, vector<8x64xf32> -> vector<8x64xf32>
    %59 = vector.extract_strided_slice %52 {offsets = [0, 0], sizes = [8, 16], strides = [1, 1]} : vector<8x64xf32> to vector<8x16xf32>
    %60 = arith.truncf %59 : vector<8x16xf32> to vector<8x16xbf16>
    %61 = vector.extract_strided_slice %55 {offsets = [0, 0], sizes = [8, 16], strides = [1, 1]} : vector<8x64xf32> to vector<8x16xf32>
    %62 = arith.truncf %61 : vector<8x16xf32> to vector<8x16xbf16>
    %cst_29 = arith.constant dense<0.000000e+00> : vector<8x8xf32>
    %63 = tpu.matmul %60, %62, %cst_29 {dimension_numbers = #tpu.dot_dimension_numbers<[1], [1], [0], [0], [0, 0, 1, 0], [], []>} : vector<8x16xbf16>, vector<8x16xbf16>, vector<8x8xf32> -> vector<8x8xf32>
    %cst_30 = arith.constant 2.500000e-01 : f32
    %64 = vector.broadcast %cst_30 : f32 to vector<8x8xf32>
    %65 = arith.mulf %63, %64 : vector<8x8xf32>
    %cst_31 = arith.constant dense<0xFF800000> : vector<8xf32>
    %66 = vector.multi_reduction <maximumf>, %65, %cst_31 [1] : vector<8x8xf32> to vector<8xf32>
    %67 = vector.shape_cast %66 : vector<8xf32> to vector<8x1xf32>
    %68 = vector.broadcast %67 : vector<8x1xf32> to vector<8x8xf32>
    %69 = arith.subf %65, %68 : vector<8x8xf32>
    %70 = math.exp %69 : vector<8x8xf32>
    %cst_32 = arith.constant dense<0.000000e+00> : vector<8xf32>
    %71 = vector.multi_reduction <add>, %70, %cst_32 [1] : vector<8x8xf32> to vector<8xf32>
    %72 = vector.shape_cast %71 : vector<8xf32> to vector<8x1xf32>
    %73 = tpu.reciprocal %72 {approx = true} : vector<8x1xf32> -> vector<8x1xf32>
    %74 = vector.broadcast %73 : vector<8x1xf32> to vector<8x8xf32>
    %75 = arith.mulf %70, %74 : vector<8x8xf32>
    %76 = arith.truncf %75 : vector<8x8xf32> to vector<8x8xbf16>
    %77 = vector.extract_strided_slice %58 {offsets = [0, 0], sizes = [8, 16], strides = [1, 1]} : vector<8x64xf32> to vector<8x16xf32>
    %78 = arith.truncf %77 : vector<8x16xf32> to vector<8x16xbf16>
    %cst_33 = arith.constant dense<0.000000e+00> : vector<8x16xf32>
    %79 = tpu.matmul %76, %78, %cst_33 {dimension_numbers = #tpu.dot_dimension_numbers<[1], [0], [0], [1], [0, 0, 1, 1], [], []>} : vector<8x8xbf16>, vector<8x16xbf16>, vector<8x16xf32> -> vector<8x16xf32>
    %80 = vector.extract_strided_slice %52 {offsets = [0, 16], sizes = [8, 16], strides = [1, 1]} : vector<8x64xf32> to vector<8x16xf32>
    %81 = arith.truncf %80 : vector<8x16xf32> to vector<8x16xbf16>
    %82 = vector.extract_strided_slice %55 {offsets = [0, 16], sizes = [8, 16], strides = [1, 1]} : vector<8x64xf32> to vector<8x16xf32>
    %83 = arith.truncf %82 : vector<8x16xf32> to vector<8x16xbf16>
    %cst_34 = arith.constant dense<0.000000e+00> : vector<8x8xf32>
    %84 = tpu.matmul %81, %83, %cst_34 {dimension_numbers = #tpu.dot_dimension_numbers<[1], [1], [0], [0], [0, 0, 1, 0], [], []>} : vector<8x16xbf16>, vector<8x16xbf16>, vector<8x8xf32> -> vector<8x8xf32>
    %cst_35 = arith.constant 2.500000e-01 : f32
    %85 = vector.broadcast %cst_35 : f32 to vector<8x8xf32>
    %86 = arith.mulf %84, %85 : vector<8x8xf32>
    %cst_36 = arith.constant dense<0xFF800000> : vector<8xf32>
    %87 = vector.multi_reduction <maximumf>, %86, %cst_36 [1] : vector<8x8xf32> to vector<8xf32>
    %88 = vector.shape_cast %87 : vector<8xf32> to vector<8x1xf32>
    %89 = vector.broadcast %88 : vector<8x1xf32> to vector<8x8xf32>
    %90 = arith.subf %86, %89 : vector<8x8xf32>
    %91 = math.exp %90 : vector<8x8xf32>
    %cst_37 = arith.constant dense<0.000000e+00> : vector<8xf32>
    %92 = vector.multi_reduction <add>, %91, %cst_37 [1] : vector<8x8xf32> to vector<8xf32>
    %93 = vector.shape_cast %92 : vector<8xf32> to vector<8x1xf32>
    %94 = tpu.reciprocal %93 {approx = true} : vector<8x1xf32> -> vector<8x1xf32>
    %95 = vector.broadcast %94 : vector<8x1xf32> to vector<8x8xf32>
    %96 = arith.mulf %91, %95 : vector<8x8xf32>
    %97 = arith.truncf %96 : vector<8x8xf32> to vector<8x8xbf16>
    %98 = vector.extract_strided_slice %58 {offsets = [0, 16], sizes = [8, 16], strides = [1, 1]} : vector<8x64xf32> to vector<8x16xf32>
    %99 = arith.truncf %98 : vector<8x16xf32> to vector<8x16xbf16>
    %cst_38 = arith.constant dense<0.000000e+00> : vector<8x16xf32>
    %100 = tpu.matmul %97, %99, %cst_38 {dimension_numbers = #tpu.dot_dimension_numbers<[1], [0], [0], [1], [0, 0, 1, 1], [], []>} : vector<8x8xbf16>, vector<8x16xbf16>, vector<8x16xf32> -> vector<8x16xf32>
    %101 = vector.extract_strided_slice %52 {offsets = [0, 32], sizes = [8, 16], strides = [1, 1]} : vector<8x64xf32> to vector<8x16xf32>
    %102 = arith.truncf %101 : vector<8x16xf32> to vector<8x16xbf16>
    %103 = vector.extract_strided_slice %55 {offsets = [0, 32], sizes = [8, 16], strides = [1, 1]} : vector<8x64xf32> to vector<8x16xf32>
    %104 = arith.truncf %103 : vector<8x16xf32> to vector<8x16xbf16>
    %cst_39 = arith.constant dense<0.000000e+00> : vector<8x8xf32>
    %105 = tpu.matmul %102, %104, %cst_39 {dimension_numbers = #tpu.dot_dimension_numbers<[1], [1], [0], [0], [0, 0, 1, 0], [], []>} : vector<8x16xbf16>, vector<8x16xbf16>, vector<8x8xf32> -> vector<8x8xf32>
    %cst_40 = arith.constant 2.500000e-01 : f32
    %106 = vector.broadcast %cst_40 : f32 to vector<8x8xf32>
    %107 = arith.mulf %105, %106 : vector<8x8xf32>
    %cst_41 = arith.constant dense<0xFF800000> : vector<8xf32>
    %108 = vector.multi_reduction <maximumf>, %107, %cst_41 [1] : vector<8x8xf32> to vector<8xf32>
    %109 = vector.shape_cast %108 : vector<8xf32> to vector<8x1xf32>
    %110 = vector.broadcast %109 : vector<8x1xf32> to vector<8x8xf32>
    %111 = arith.subf %107, %110 : vector<8x8xf32>
    %112 = math.exp %111 : vector<8x8xf32>
    %cst_42 = arith.constant dense<0.000000e+00> : vector<8xf32>
    %113 = vector.multi_reduction <add>, %112, %cst_42 [1] : vector<8x8xf32> to vector<8xf32>
    %114 = vector.shape_cast %113 : vector<8xf32> to vector<8x1xf32>
    %115 = tpu.reciprocal %114 {approx = true} : vector<8x1xf32> -> vector<8x1xf32>
    %116 = vector.broadcast %115 : vector<8x1xf32> to vector<8x8xf32>
    %117 = arith.mulf %112, %116 : vector<8x8xf32>
    %118 = arith.truncf %117 : vector<8x8xf32> to vector<8x8xbf16>
    %119 = vector.extract_strided_slice %58 {offsets = [0, 32], sizes = [8, 16], strides = [1, 1]} : vector<8x64xf32> to vector<8x16xf32>
    %120 = arith.truncf %119 : vector<8x16xf32> to vector<8x16xbf16>
    %cst_43 = arith.constant dense<0.000000e+00> : vector<8x16xf32>
    %121 = tpu.matmul %118, %120, %cst_43 {dimension_numbers = #tpu.dot_dimension_numbers<[1], [0], [0], [1], [0, 0, 1, 1], [], []>} : vector<8x8xbf16>, vector<8x16xbf16>, vector<8x16xf32> -> vector<8x16xf32>
    %122 = vector.extract_strided_slice %52 {offsets = [0, 48], sizes = [8, 16], strides = [1, 1]} : vector<8x64xf32> to vector<8x16xf32>
    %123 = arith.truncf %122 : vector<8x16xf32> to vector<8x16xbf16>
    %124 = vector.extract_strided_slice %55 {offsets = [0, 48], sizes = [8, 16], strides = [1, 1]} : vector<8x64xf32> to vector<8x16xf32>
    %125 = arith.truncf %124 : vector<8x16xf32> to vector<8x16xbf16>
    %cst_44 = arith.constant dense<0.000000e+00> : vector<8x8xf32>
    %126 = tpu.matmul %123, %125, %cst_44 {dimension_numbers = #tpu.dot_dimension_numbers<[1], [1], [0], [0], [0, 0, 1, 0], [], []>} : vector<8x16xbf16>, vector<8x16xbf16>, vector<8x8xf32> -> vector<8x8xf32>
    %cst_45 = arith.constant 2.500000e-01 : f32
    %127 = vector.broadcast %cst_45 : f32 to vector<8x8xf32>
    %128 = arith.mulf %126, %127 : vector<8x8xf32>
    %cst_46 = arith.constant dense<0xFF800000> : vector<8xf32>
    %129 = vector.multi_reduction <maximumf>, %128, %cst_46 [1] : vector<8x8xf32> to vector<8xf32>
    %130 = vector.shape_cast %129 : vector<8xf32> to vector<8x1xf32>
    %131 = vector.broadcast %130 : vector<8x1xf32> to vector<8x8xf32>
    %132 = arith.subf %128, %131 : vector<8x8xf32>
    %133 = math.exp %132 : vector<8x8xf32>
    %cst_47 = arith.constant dense<0.000000e+00> : vector<8xf32>
    %134 = vector.multi_reduction <add>, %133, %cst_47 [1] : vector<8x8xf32> to vector<8xf32>
    %135 = vector.shape_cast %134 : vector<8xf32> to vector<8x1xf32>
    %136 = tpu.reciprocal %135 {approx = true} : vector<8x1xf32> -> vector<8x1xf32>
    %137 = vector.broadcast %136 : vector<8x1xf32> to vector<8x8xf32>
    %138 = arith.mulf %133, %137 : vector<8x8xf32>
    %139 = arith.truncf %138 : vector<8x8xf32> to vector<8x8xbf16>
    %140 = vector.extract_strided_slice %58 {offsets = [0, 48], sizes = [8, 16], strides = [1, 1]} : vector<8x64xf32> to vector<8x16xf32>
    %141 = arith.truncf %140 : vector<8x16xf32> to vector<8x16xbf16>
    %cst_48 = arith.constant dense<0.000000e+00> : vector<8x16xf32>
    %142 = tpu.matmul %139, %141, %cst_48 {dimension_numbers = #tpu.dot_dimension_numbers<[1], [0], [0], [1], [0, 0, 1, 1], [], []>} : vector<8x8xbf16>, vector<8x16xbf16>, vector<8x16xf32> -> vector<8x16xf32>
    %143 = tpu.concatenate %79, %100, %121, %142 in 1 : vector<8x16xf32>, vector<8x16xf32>, vector<8x16xf32>, vector<8x16xf32> -> vector<8x64xf32>
    %144 = arith.truncf %143 : vector<8x64xf32> to vector<8x64xbf16>
    %c0_49 = arith.constant 0 : index
    %c0_50 = arith.constant 0 : index
    %145 = vector.load %arg10[%c0_49, %c0_50] : memref<64x64xbf16, #tpu.memory_space<vmem>>, vector<64x64xbf16>
    %cst_51 = arith.constant dense<0.000000e+00> : vector<8x64xf32>
    %146 = tpu.matmul %144, %145, %cst_51 {dimension_numbers = #tpu.dot_dimension_numbers<[1], [0], [0], [1], [0, 0, 1, 1], [], []>} : vector<8x64xbf16>, vector<64x64xbf16>, vector<8x64xf32> -> vector<8x64xf32>
    %c0_52 = arith.constant 0 : index
    %c0_53 = arith.constant 0 : index
    %147 = vector.load %arg11[%c0_52, %c0_53] : memref<1x64xf32, #tpu.memory_space<vmem>>, vector<1x64xf32>
    %148 = vector.broadcast %147 : vector<1x64xf32> to vector<8x64xf32>
    %149 = arith.addf %146, %148 : vector<8x64xf32>
    %150 = arith.addf %149, %0 : vector<8x64xf32>
    %c0_54 = arith.constant 0 : index
    %c0_55 = arith.constant 0 : index
    %151 = vector.load %arg12[%c0_54, %c0_55] : memref<8x64xf32, #tpu.memory_space<vmem>>, vector<8x64xf32>
    tpu.vector_store %arg12[%c0_54, %c0_55], %150 {strides = array<i32>} : memref<8x64xf32, #tpu.memory_space<vmem>>, vector<8x64xf32>,
    return
  }
  func.func @transform_0(%arg0: i32) -> (i32, i32) {
    %c0_i32 = arith.constant 0 : i32
    %c0_i32_0 = arith.constant 0 : i32
    return %arg0, %c0_i32 : i32, i32
  }
  func.func @transform_1(%arg0: i32) -> (i32, i32) {
    %c0_i32 = arith.constant 0 : i32
    %c0_i32_0 = arith.constant 0 : i32
    %c0_i32_1 = arith.constant 0 : i32
    return %c0_i32, %c0_i32_0 : i32, i32
  }
  func.func @transform_2(%arg0: i32) -> (i32, i32) {
    %c0_i32 = arith.constant 0 : i32
    %c0_i32_0 = arith.constant 0 : i32
    %c0_i32_1 = arith.constant 0 : i32
    return %c0_i32, %c0_i32_0 : i32, i32
  }
  func.func @transform_3(%arg0: i32) -> (i32, i32) {
    %c0_i32 = arith.constant 0 : i32
    %c0_i32_0 = arith.constant 0 : i32
    %c0_i32_1 = arith.constant 0 : i32
    return %c0_i32, %c0_i32_0 : i32, i32
  }
  func.func @transform_4(%arg0: i32) -> (i32, i32) {
    %c0_i32 = arith.constant 0 : i32
    %c0_i32_0 = arith.constant 0 : i32
    %c0_i32_1 = arith.constant 0 : i32
    return %c0_i32, %c0_i32_0 : i32, i32
  }
  func.func @transform_5(%arg0: i32) -> (i32, i32) {
    %c0_i32 = arith.constant 0 : i32
    %c0_i32_0 = arith.constant 0 : i32
    %c0_i32_1 = arith.constant 0 : i32
    return %c0_i32, %c0_i32_0 : i32, i32
  }
  func.func @transform_6(%arg0: i32) -> (i32, i32) {
    %c0_i32 = arith.constant 0 : i32
    %c0_i32_0 = arith.constant 0 : i32
    %c0_i32_1 = arith.constant 0 : i32
    return %c0_i32, %c0_i32_0 : i32, i32
  }
  func.func @transform_7(%arg0: i32) -> (i32, i32) {
    %c0_i32 = arith.constant 0 : i32
    %c0_i32_0 = arith.constant 0 : i32
    %c0_i32_1 = arith.constant 0 : i32
    return %c0_i32, %c0_i32_0 : i32, i32
  }
  func.func @transform_8(%arg0: i32) -> (i32, i32) {
    %c0_i32 = arith.constant 0 : i32
    %c0_i32_0 = arith.constant 0 : i32
    %c0_i32_1 = arith.constant 0 : i32
    return %c0_i32, %c0_i32_0 : i32, i32
  }
  func.func @transform_9(%arg0: i32) -> (i32, i32) {
    %c0_i32 = arith.constant 0 : i32
    %c0_i32_0 = arith.constant 0 : i32
    %c0_i32_1 = arith.constant 0 : i32
    return %c0_i32, %c0_i32_0 : i32, i32
  }
  func.func @transform_10(%arg0: i32) -> (i32, i32) {
    %c0_i32 = arith.constant 0 : i32
    %c0_i32_0 = arith.constant 0 : i32
    %c0_i32_1 = arith.constant 0 : i32
    return %c0_i32, %c0_i32_0 : i32, i32
  }
  func.func @transform_11(%arg0: i32) -> (i32, i32) {
    %c0_i32 = arith.constant 0 : i32
    %c0_i32_0 = arith.constant 0 : i32
    return %arg0, %c0_i32 : i32, i32
  }
}

module attributes {stable_mosaic.version = 11 : i64} {
  func.func @_fused_attn_kernel(%arg0: i32, %arg1: memref<6x32xf32, #tpu.memory_space<vmem>>, %arg2: memref<8x64xf32, #tpu.memory_space<vmem>>, %arg3: memref<1x32xf32, #tpu.memory_space<vmem>>, %arg4: memref<1x32xf32, #tpu.memory_space<vmem>>, %arg5: memref<1x64xf32, #tpu.memory_space<vmem>>, %arg6: memref<1x64xf32, #tpu.memory_space<vmem>>, %arg7: memref<32x16xbf16, #tpu.memory_space<vmem>>, %arg8: memref<64x16xbf16, #tpu.memory_space<vmem>>, %arg9: memref<64x16xbf16, #tpu.memory_space<vmem>>, %arg10: memref<16x32xbf16, #tpu.memory_space<vmem>>, %arg11: memref<1x32xf32, #tpu.memory_space<vmem>>, %arg12: memref<32x32xbf16, #tpu.memory_space<vmem>>, %arg13: memref<1x32xf32, #tpu.memory_space<vmem>>, %arg14: memref<6x32xf32, #tpu.memory_space<vmem>>) attributes {dimension_semantics = [#tpu.dimension_semantics<parallel>], iteration_bounds = array<i64: 1>, scalar_prefetch = 0 : i64, scratch_operands = 0 : i64, tpu.core_type = #tpu.core_type<tc>, window_params = [{transform_indices = @transform_0, window_bounds = array<i64: 6, 32>}, {pipeline_mode = #tpu.pipeline_mode<synchronous>, transform_indices = @transform_1, window_bounds = array<i64: 8, 64>}, {pipeline_mode = #tpu.pipeline_mode<synchronous>, transform_indices = @transform_2, window_bounds = array<i64: 1, 32>}, {pipeline_mode = #tpu.pipeline_mode<synchronous>, transform_indices = @transform_3, window_bounds = array<i64: 1, 32>}, {pipeline_mode = #tpu.pipeline_mode<synchronous>, transform_indices = @transform_4, window_bounds = array<i64: 1, 64>}, {pipeline_mode = #tpu.pipeline_mode<synchronous>, transform_indices = @transform_5, window_bounds = array<i64: 1, 64>}, {pipeline_mode = #tpu.pipeline_mode<synchronous>, transform_indices = @transform_6, window_bounds = array<i64: 32, 16>}, {pipeline_mode = #tpu.pipeline_mode<synchronous>, transform_indices = @transform_7, window_bounds = array<i64: 64, 16>}, {pipeline_mode = #tpu.pipeline_mode<synchronous>, transform_indices = @transform_8, window_bounds = array<i64: 64, 16>}, {pipeline_mode = #tpu.pipeline_mode<synchronous>, transform_indices = @transform_9, window_bounds = array<i64: 16, 32>}, {pipeline_mode = #tpu.pipeline_mode<synchronous>, transform_indices = @transform_10, window_bounds = array<i64: 1, 32>}, {pipeline_mode = #tpu.pipeline_mode<synchronous>, transform_indices = @transform_11, window_bounds = array<i64: 32, 32>}, {pipeline_mode = #tpu.pipeline_mode<synchronous>, transform_indices = @transform_12, window_bounds = array<i64: 1, 32>}, {transform_indices = @transform_13, window_bounds = array<i64: 6, 32>}]} {
    %c0 = arith.constant 0 : index
    %c0_0 = arith.constant 0 : index
    %0 = vector.load %arg1[%c0, %c0_0] : memref<6x32xf32, #tpu.memory_space<vmem>>, vector<6x32xf32>
    %cst = arith.constant dense<0.000000e+00> : vector<6xf32>
    %1 = vector.multi_reduction <add>, %0, %cst [1] : vector<6x32xf32> to vector<6xf32>
    %2 = vector.shape_cast %1 : vector<6xf32> to vector<6x1xf32>
    %cst_1 = arith.constant 3.200000e+01 : f32
    %3 = vector.broadcast %cst_1 : f32 to vector<6x1xf32>
    %4 = arith.divf %2, %3 : vector<6x1xf32>
    %5 = vector.broadcast %4 : vector<6x1xf32> to vector<6x32xf32>
    %6 = arith.subf %0, %5 : vector<6x32xf32>
    %7 = arith.mulf %6, %6 : vector<6x32xf32>
    %cst_2 = arith.constant dense<0.000000e+00> : vector<6xf32>
    %8 = vector.multi_reduction <add>, %7, %cst_2 [1] : vector<6x32xf32> to vector<6xf32>
    %9 = vector.shape_cast %8 : vector<6xf32> to vector<6x1xf32>
    %cst_3 = arith.constant 3.200000e+01 : f32
    %10 = vector.broadcast %cst_3 : f32 to vector<6x1xf32>
    %11 = arith.divf %9, %10 : vector<6x1xf32>
    %12 = vector.broadcast %4 : vector<6x1xf32> to vector<6x32xf32>
    %13 = arith.subf %0, %12 : vector<6x32xf32>
    %cst_4 = arith.constant 9.99999974E-6 : f32
    %14 = vector.broadcast %cst_4 : f32 to vector<6x1xf32>
    %15 = arith.addf %11, %14 : vector<6x1xf32>
    %16 = math.rsqrt %15 : vector<6x1xf32>
    %17 = vector.broadcast %16 : vector<6x1xf32> to vector<6x32xf32>
    %18 = arith.mulf %13, %17 : vector<6x32xf32>
    %c0_5 = arith.constant 0 : index
    %c0_6 = arith.constant 0 : index
    %19 = vector.load %arg3[%c0_5, %c0_6] : memref<1x32xf32, #tpu.memory_space<vmem>>, vector<1x32xf32>
    %20 = vector.broadcast %19 : vector<1x32xf32> to vector<6x32xf32>
    %21 = arith.mulf %18, %20 : vector<6x32xf32>
    %c0_7 = arith.constant 0 : index
    %c0_8 = arith.constant 0 : index
    %22 = vector.load %arg4[%c0_7, %c0_8] : memref<1x32xf32, #tpu.memory_space<vmem>>, vector<1x32xf32>
    %23 = vector.broadcast %22 : vector<1x32xf32> to vector<6x32xf32>
    %24 = arith.addf %21, %23 : vector<6x32xf32>
    %c0_9 = arith.constant 0 : index
    %c0_10 = arith.constant 0 : index
    %25 = vector.load %arg2[%c0_9, %c0_10] : memref<8x64xf32, #tpu.memory_space<vmem>>, vector<8x64xf32>
    %cst_11 = arith.constant dense<0.000000e+00> : vector<8xf32>
    %26 = vector.multi_reduction <add>, %25, %cst_11 [1] : vector<8x64xf32> to vector<8xf32>
    %27 = vector.shape_cast %26 : vector<8xf32> to vector<8x1xf32>
    %cst_12 = arith.constant 6.400000e+01 : f32
    %28 = vector.broadcast %cst_12 : f32 to vector<8x1xf32>
    %29 = arith.divf %27, %28 : vector<8x1xf32>
    %30 = vector.broadcast %29 : vector<8x1xf32> to vector<8x64xf32>
    %31 = arith.subf %25, %30 : vector<8x64xf32>
    %32 = arith.mulf %31, %31 : vector<8x64xf32>
    %cst_13 = arith.constant dense<0.000000e+00> : vector<8xf32>
    %33 = vector.multi_reduction <add>, %32, %cst_13 [1] : vector<8x64xf32> to vector<8xf32>
    %34 = vector.shape_cast %33 : vector<8xf32> to vector<8x1xf32>
    %cst_14 = arith.constant 6.400000e+01 : f32
    %35 = vector.broadcast %cst_14 : f32 to vector<8x1xf32>
    %36 = arith.divf %34, %35 : vector<8x1xf32>
    %37 = vector.broadcast %29 : vector<8x1xf32> to vector<8x64xf32>
    %38 = arith.subf %25, %37 : vector<8x64xf32>
    %cst_15 = arith.constant 9.99999974E-6 : f32
    %39 = vector.broadcast %cst_15 : f32 to vector<8x1xf32>
    %40 = arith.addf %36, %39 : vector<8x1xf32>
    %41 = math.rsqrt %40 : vector<8x1xf32>
    %42 = vector.broadcast %41 : vector<8x1xf32> to vector<8x64xf32>
    %43 = arith.mulf %38, %42 : vector<8x64xf32>
    %c0_16 = arith.constant 0 : index
    %c0_17 = arith.constant 0 : index
    %44 = vector.load %arg5[%c0_16, %c0_17] : memref<1x64xf32, #tpu.memory_space<vmem>>, vector<1x64xf32>
    %45 = vector.broadcast %44 : vector<1x64xf32> to vector<8x64xf32>
    %46 = arith.mulf %43, %45 : vector<8x64xf32>
    %c0_18 = arith.constant 0 : index
    %c0_19 = arith.constant 0 : index
    %47 = vector.load %arg6[%c0_18, %c0_19] : memref<1x64xf32, #tpu.memory_space<vmem>>, vector<1x64xf32>
    %48 = vector.broadcast %47 : vector<1x64xf32> to vector<8x64xf32>
    %49 = arith.addf %46, %48 : vector<8x64xf32>
    %50 = arith.truncf %24 : vector<6x32xf32> to vector<6x32xbf16>
    %c0_20 = arith.constant 0 : index
    %c0_21 = arith.constant 0 : index
    %51 = vector.load %arg7[%c0_20, %c0_21] : memref<32x16xbf16, #tpu.memory_space<vmem>>, vector<32x16xbf16>
    %cst_22 = arith.constant dense<0.000000e+00> : vector<6x16xf32>
    %52 = tpu.matmul %50, %51, %cst_22 {dimension_numbers = #tpu.dot_dimension_numbers<[1], [0], [0], [1], [0, 0, 1, 1], [], []>} : vector<6x32xbf16>, vector<32x16xbf16>, vector<6x16xf32> -> vector<6x16xf32>
    %53 = arith.truncf %49 : vector<8x64xf32> to vector<8x64xbf16>
    %c0_23 = arith.constant 0 : index
    %c0_24 = arith.constant 0 : index
    %54 = vector.load %arg8[%c0_23, %c0_24] : memref<64x16xbf16, #tpu.memory_space<vmem>>, vector<64x16xbf16>
    %cst_25 = arith.constant dense<0.000000e+00> : vector<8x16xf32>
    %55 = tpu.matmul %53, %54, %cst_25 {dimension_numbers = #tpu.dot_dimension_numbers<[1], [0], [0], [1], [0, 0, 1, 1], [], []>} : vector<8x64xbf16>, vector<64x16xbf16>, vector<8x16xf32> -> vector<8x16xf32>
    %56 = arith.truncf %49 : vector<8x64xf32> to vector<8x64xbf16>
    %c0_26 = arith.constant 0 : index
    %c0_27 = arith.constant 0 : index
    %57 = vector.load %arg9[%c0_26, %c0_27] : memref<64x16xbf16, #tpu.memory_space<vmem>>, vector<64x16xbf16>
    %cst_28 = arith.constant dense<0.000000e+00> : vector<8x16xf32>
    %58 = tpu.matmul %56, %57, %cst_28 {dimension_numbers = #tpu.dot_dimension_numbers<[1], [0], [0], [1], [0, 0, 1, 1], [], []>} : vector<8x64xbf16>, vector<64x16xbf16>, vector<8x16xf32> -> vector<8x16xf32>
    %59 = arith.truncf %52 : vector<6x16xf32> to vector<6x16xbf16>
    %60 = arith.truncf %55 : vector<8x16xf32> to vector<8x16xbf16>
    %cst_29 = arith.constant dense<0.000000e+00> : vector<6x8xf32>
    %61 = tpu.matmul %59, %60, %cst_29 {dimension_numbers = #tpu.dot_dimension_numbers<[1], [1], [0], [0], [0, 0, 1, 0], [], []>} : vector<6x16xbf16>, vector<8x16xbf16>, vector<6x8xf32> -> vector<6x8xf32>
    %cst_30 = arith.constant 2.500000e-01 : f32
    %62 = vector.broadcast %cst_30 : f32 to vector<6x8xf32>
    %63 = arith.mulf %61, %62 : vector<6x8xf32>
    %cst_31 = arith.constant dense<0xFF800000> : vector<6xf32>
    %64 = vector.multi_reduction <maximumf>, %63, %cst_31 [1] : vector<6x8xf32> to vector<6xf32>
    %65 = vector.shape_cast %64 : vector<6xf32> to vector<6x1xf32>
    %66 = vector.broadcast %65 : vector<6x1xf32> to vector<6x8xf32>
    %67 = arith.subf %63, %66 : vector<6x8xf32>
    %68 = math.exp %67 : vector<6x8xf32>
    %cst_32 = arith.constant dense<0.000000e+00> : vector<6xf32>
    %69 = vector.multi_reduction <add>, %68, %cst_32 [1] : vector<6x8xf32> to vector<6xf32>
    %70 = vector.shape_cast %69 : vector<6xf32> to vector<6x1xf32>
    %71 = tpu.reciprocal %70 {approx = true} : vector<6x1xf32> -> vector<6x1xf32>
    %72 = vector.broadcast %71 : vector<6x1xf32> to vector<6x8xf32>
    %73 = arith.mulf %68, %72 : vector<6x8xf32>
    %74 = arith.truncf %73 : vector<6x8xf32> to vector<6x8xbf16>
    %75 = arith.truncf %58 : vector<8x16xf32> to vector<8x16xbf16>
    %cst_33 = arith.constant dense<0.000000e+00> : vector<6x16xf32>
    %76 = tpu.matmul %74, %75, %cst_33 {dimension_numbers = #tpu.dot_dimension_numbers<[1], [0], [0], [1], [0, 0, 1, 1], [], []>} : vector<6x8xbf16>, vector<8x16xbf16>, vector<6x16xf32> -> vector<6x16xf32>
    %77 = arith.truncf %76 : vector<6x16xf32> to vector<6x16xbf16>
    %c0_34 = arith.constant 0 : index
    %c0_35 = arith.constant 0 : index
    %78 = vector.load %arg10[%c0_34, %c0_35] : memref<16x32xbf16, #tpu.memory_space<vmem>>, vector<16x32xbf16>
    %cst_36 = arith.constant dense<0.000000e+00> : vector<6x32xf32>
    %79 = tpu.matmul %77, %78, %cst_36 {dimension_numbers = #tpu.dot_dimension_numbers<[1], [0], [0], [1], [0, 0, 1, 1], [], []>} : vector<6x16xbf16>, vector<16x32xbf16>, vector<6x32xf32> -> vector<6x32xf32>
    %c0_37 = arith.constant 0 : index
    %c0_38 = arith.constant 0 : index
    %80 = vector.load %arg11[%c0_37, %c0_38] : memref<1x32xf32, #tpu.memory_space<vmem>>, vector<1x32xf32>
    %81 = vector.broadcast %80 : vector<1x32xf32> to vector<6x32xf32>
    %82 = arith.addf %79, %81 : vector<6x32xf32>
    %83 = arith.truncf %82 : vector<6x32xf32> to vector<6x32xbf16>
    %c0_39 = arith.constant 0 : index
    %c0_40 = arith.constant 0 : index
    %84 = vector.load %arg12[%c0_39, %c0_40] : memref<32x32xbf16, #tpu.memory_space<vmem>>, vector<32x32xbf16>
    %cst_41 = arith.constant dense<0.000000e+00> : vector<6x32xf32>
    %85 = tpu.matmul %83, %84, %cst_41 {dimension_numbers = #tpu.dot_dimension_numbers<[1], [0], [0], [1], [0, 0, 1, 1], [], []>} : vector<6x32xbf16>, vector<32x32xbf16>, vector<6x32xf32> -> vector<6x32xf32>
    %c0_42 = arith.constant 0 : index
    %c0_43 = arith.constant 0 : index
    %86 = vector.load %arg13[%c0_42, %c0_43] : memref<1x32xf32, #tpu.memory_space<vmem>>, vector<1x32xf32>
    %87 = vector.broadcast %86 : vector<1x32xf32> to vector<6x32xf32>
    %88 = arith.addf %85, %87 : vector<6x32xf32>
    %c0_44 = arith.constant 0 : index
    %c0_45 = arith.constant 0 : index
    %89 = vector.load %arg14[%c0_44, %c0_45] : memref<6x32xf32, #tpu.memory_space<vmem>>, vector<6x32xf32>
    tpu.vector_store %arg14[%c0_44, %c0_45], %88 {strides = array<i32>} : memref<6x32xf32, #tpu.memory_space<vmem>>, vector<6x32xf32>,
    return
  }
  func.func @transform_0(%arg0: i32) -> (i32, i32) {
    %c0_i32 = arith.constant 0 : i32
    %c0_i32_0 = arith.constant 0 : i32
    return %arg0, %c0_i32 : i32, i32
  }
  func.func @transform_1(%arg0: i32) -> (i32, i32) {
    %c0_i32 = arith.constant 0 : i32
    %c0_i32_0 = arith.constant 0 : i32
    %c0_i32_1 = arith.constant 0 : i32
    return %c0_i32, %c0_i32_0 : i32, i32
  }
  func.func @transform_2(%arg0: i32) -> (i32, i32) {
    %c0_i32 = arith.constant 0 : i32
    %c0_i32_0 = arith.constant 0 : i32
    %c0_i32_1 = arith.constant 0 : i32
    return %c0_i32, %c0_i32_0 : i32, i32
  }
  func.func @transform_3(%arg0: i32) -> (i32, i32) {
    %c0_i32 = arith.constant 0 : i32
    %c0_i32_0 = arith.constant 0 : i32
    %c0_i32_1 = arith.constant 0 : i32
    return %c0_i32, %c0_i32_0 : i32, i32
  }
  func.func @transform_4(%arg0: i32) -> (i32, i32) {
    %c0_i32 = arith.constant 0 : i32
    %c0_i32_0 = arith.constant 0 : i32
    %c0_i32_1 = arith.constant 0 : i32
    return %c0_i32, %c0_i32_0 : i32, i32
  }
  func.func @transform_5(%arg0: i32) -> (i32, i32) {
    %c0_i32 = arith.constant 0 : i32
    %c0_i32_0 = arith.constant 0 : i32
    %c0_i32_1 = arith.constant 0 : i32
    return %c0_i32, %c0_i32_0 : i32, i32
  }
  func.func @transform_6(%arg0: i32) -> (i32, i32) {
    %c0_i32 = arith.constant 0 : i32
    %c0_i32_0 = arith.constant 0 : i32
    %c0_i32_1 = arith.constant 0 : i32
    return %c0_i32, %c0_i32_0 : i32, i32
  }
  func.func @transform_7(%arg0: i32) -> (i32, i32) {
    %c0_i32 = arith.constant 0 : i32
    %c0_i32_0 = arith.constant 0 : i32
    %c0_i32_1 = arith.constant 0 : i32
    return %c0_i32, %c0_i32_0 : i32, i32
  }
  func.func @transform_8(%arg0: i32) -> (i32, i32) {
    %c0_i32 = arith.constant 0 : i32
    %c0_i32_0 = arith.constant 0 : i32
    %c0_i32_1 = arith.constant 0 : i32
    return %c0_i32, %c0_i32_0 : i32, i32
  }
  func.func @transform_9(%arg0: i32) -> (i32, i32) {
    %c0_i32 = arith.constant 0 : i32
    %c0_i32_0 = arith.constant 0 : i32
    %c0_i32_1 = arith.constant 0 : i32
    return %c0_i32, %c0_i32_0 : i32, i32
  }
  func.func @transform_10(%arg0: i32) -> (i32, i32) {
    %c0_i32 = arith.constant 0 : i32
    %c0_i32_0 = arith.constant 0 : i32
    %c0_i32_1 = arith.constant 0 : i32
    return %c0_i32, %c0_i32_0 : i32, i32
  }
  func.func @transform_11(%arg0: i32) -> (i32, i32) {
    %c0_i32 = arith.constant 0 : i32
    %c0_i32_0 = arith.constant 0 : i32
    %c0_i32_1 = arith.constant 0 : i32
    return %c0_i32, %c0_i32_0 : i32, i32
  }
  func.func @transform_12(%arg0: i32) -> (i32, i32) {
    %c0_i32 = arith.constant 0 : i32
    %c0_i32_0 = arith.constant 0 : i32
    %c0_i32_1 = arith.constant 0 : i32
    return %c0_i32, %c0_i32_0 : i32, i32
  }
  func.func @transform_13(%arg0: i32) -> (i32, i32) {
    %c0_i32 = arith.constant 0 : i32
    %c0_i32_0 = arith.constant 0 : i32
    return %arg0, %c0_i32 : i32, i32
  }
}

</mosaic_0001>

<bundles_post_ra>
// kernel: _lambda_.11
= control target key start
LH: loop header
LB: loop body
LE: loop exit
PB: predicated region body
PF: predicated region fallthrough
CT: control target
= control target key end

     0   :  { %16 = vsyncpa [#allocation3], 0  ;;  %s1031_s0 = inlined_call_operand.vmem [shape: f32[8,64], index: 0, kind: input, shape index: {}, may-alias: {0,1}]   ;;  %s1032_s1 = inlined_call_operand.vmem [shape: f32[8,64], index: 1, kind: input, shape index: {}, may-alias: {0,1}]   ;;  %s1033_s2 = inlined_call_operand.vmem [shape: f32[1,64], index: 2, kind: input, shape index: {}, may-alias: {2,4}]   ;;  %s1034_s3 = inlined_call_operand.vmem [shape: f32[1,64], index: 3, kind: input, shape index: {}, may-alias: {3,5,10}]   ;;  %s1035_s4 = inlined_call_operand.vmem [shape: f32[1,64], index: 4, kind: input, shape index: {}, may-alias: {2,4}]   ;;  %s1036_s5 = inlined_call_operand.vmem [shape: f32[1,64], index: 5, kind: input, shape index: {}, may-alias: {3,5,10}]   ;;  %s1037_s6 = inlined_call_operand.hbm [shape: bf16[64,64], index: 6, kind: input, shape index: {}]   ;;  %s1038_s7 = inlined_call_operand.hbm [shape: bf16[64,64], index: 7, kind: input, shape index: {}]   ;;  %s1039_s8 = inlined_call_operand.hbm [shape: bf16[64,64], index: 8, kind: input, shape index: {}]   ;;  %s1040_s9 = inlined_call_operand.hbm [shape: bf16[64,64], index: 9, kind: input, shape index: {}]   ;;  %s1041_s10 = inlined_call_operand.vmem [shape: f32[1,64], index: 10, kind: input, shape index: {}, may-alias: {3,5,10}]   ;;  %s1042_s11 = inlined_call_operand.vmem [shape: f32[8,64], index: 11, kind: output, shape index: {}]  }
   0x1   :  { %17 = vsyncpa [#allocation5], 0 }
   0x2   :  { %18 = vsyncpa [#allocation8], 0  ;;  %s48_s19 = sshll.u32 %s1038_s7, 4  ;;  %s863_s20 = smov [#allocation4]   ;;  %s49_s19 = int_to_ptr.hbm [resolvable:$true] %s48_s19 }
   0x3   :  { %s50_s21 = sshll.u32 %s863_s20, 4  ;;  %s35_s24 = sshll.u32 %s1037_s6, 4  ;;  %s51_s21 = int_to_ptr.vmem [resolvable:$true] %s50_s21  ;;  %s36_s24 = int_to_ptr.hbm [resolvable:$true] %s35_s24 }
   0x4   :  { %s864_s25 = smov 64   ;;  %s865_s26 = smov 4  }
   0x5   :  { %56 = dma.hbm_to_vmem [thread:$0]  %s49_s19, 512, %s51_s21, [#allocation5], %s864_s25, %s864_s25, %s865_s26  }
   0x6   :  { %s866_s27 = smov [#allocation2]   ;;  %s61_s12 = sshll.u32 %s1039_s8, 4  ;;  %s62_s12 = int_to_ptr.hbm [resolvable:$true] %s61_s12 }
   0x7   :  { %s37_s28 = sshll.u32 %s866_s27, 4  ;;  %s74_s14 = sshll.u32 %s1040_s9, 4  ;;  %s38_s28 = int_to_ptr.vmem [resolvable:$true] %s37_s28  ;;  %s75_s14 = int_to_ptr.hbm [resolvable:$true] %s74_s14 }
   0x8   :  { %43 = dma.hbm_to_vmem [thread:$0]  %s36_s24, 512, %s38_s28, [#allocation3], %s864_s25, %s864_s25, %s865_s26  }
   0x9   :  { %s867_s15 = smov [#allocation6]   ;;  %s868_s6 = smov [#allocation7]  }
   0xa   :  { %s63_s16 = sshll.u32 %s867_s15, 4  ;;  %s76_s17 = sshll.u32 %s868_s6, 4  ;;  %s64_s16 = int_to_ptr.vmem [resolvable:$true] %s63_s16  ;;  %s77_s17 = int_to_ptr.vmem [resolvable:$true] %s76_s17 }
   0xb   :  { %69 = dma.hbm_to_vmem [thread:$0]  %s62_s12, 512, %s64_s16, [#allocation5], %s864_s25, %s864_s25, %s865_s26  }
   0xc   :  { %82 = dma.hbm_to_vmem [thread:$0]  %s75_s14, 512, %s77_s17, [#allocation8], %s864_s25, %s864_s25, %s865_s26  }
   0xd   :  { %857 = dma.done.wait [#allocation3], 512  }
   0xe   :  { %858 = vsyncadd [#allocation3], 4294966784 }
   0xf   :  { %859 = dma.done.wait [#allocation5], 1024  }
  0x10   :  { %860 = vsyncadd [#allocation5], 4294966272 }
  0x11   :  { %861 = dma.done.wait [#allocation8], 512  }
  0x12   :  { %862 = vsyncadd [#allocation8], 4294966784  ;;  %vm103_vm0 = vcmask 523264   ;;  %v143_v0 = vld [vmem:[%s1032_s1] sm:$0xff]  ;;  %v869_v4 = vmov 64.0   ;;  %v712_v21 = vld [vmem:[#allocation4 + $0x18] sm:$0xff] }
  0x13   :  { %v144_v1 = vsel %vm103_vm0, %v143_v0, 0.0  ;;  %v955_v2 = vld [vmem:[%s1031_s0] sm:$0xff]  ;;  %739 = vrcp.f32 %v869_v4  ;;  %v716_v22 = vld [vmem:[#allocation6 + $0x18] sm:$0xff]  ;;  %265 = vmatpush.bf16.msra.mxu1 %v712_v21  ;;  %v711_v23 = vld [vmem:[#allocation4 + $0x10] sm:$0xff]  ;;  %vm321_vm8 = vcmask 130048   ;;  %vm359_vm9 = vcmask 1043456  }
  0x14   :  { %145 = vadd.xlane.f32.xlu0 %v144_v1  ;;  %v104_v3 = vsel %vm103_vm0, %v955_v2, 0.0  ;;  %310 = vmatpush.bf16.msra.mxu2 %v716_v22  ;;  %v715_v24 = vld [vmem:[#allocation6 + $0x10] sm:$0xff]  ;;  %v708_v25 = vld [vmem:[#allocation2 + $0x18] sm:$0xff]  ;;  %v710_v26 = vld [vmem:[#allocation4 + $0x8] sm:$0xff]  ;;  %s872_s24 = smov 80   ;;  %vm342_vm10 = vcmask 64512  }
  0x15   :  { %v714_v27 = vld [vmem:[#allocation6 + $0x8] sm:$0xff]  ;;  %216 = vmatpush.bf16.msra.mxu0 %v708_v25  ;;  %v707_v28 = vld [vmem:[#allocation2 + $0x10] sm:$0xff]  ;;  %v709_v29 = vld [vmem:[#allocation4] sm:$0xff]  ;;  %s873_s25 = smov 16   ;;  %s874_s26 = smov 48   ;;  %vm563_vm11 = vcmask 261120  }
  0x16   :  { %v713_v30 = vld [vmem:[#allocation6] sm:$0xff]  ;;  %v706_v31 = vld [vmem:[#allocation2 + $0x8] sm:$0xff]  ;;  %s875_s27 = smov 32   ;;  %vm565_vm12 = vcmask 392192  }
  0x17   :  { %266 = vmatpush.bf16.msra.mxu1 %v711_v23  ;;  %v705_v33 = vld [vmem:[#allocation2] sm:$0xff] }
  0x18   :  { %311 = vmatpush.bf16.msra.mxu2 %v715_v24  ;;  %v734_v47 = vld [vmem:[%s1035_s4] ss:$0 sm:$0xff] }
  0x19   :  { %v740_v5 = vpop.eup %739  ;;  %217 = vmatpush.bf16.msra.mxu0 %v707_v28  ;;  %v735_v51 = vld [vmem:[%s1036_s5] ss:$0 sm:$0xff] }
  0x1a   :  { %v108_v6 = vmul.f32 64.0, %v740_v5  ;;  %vm112_vm1 = vweird.f32 %v740_v5  ;;  %v736_v58 = vld [vmem:[%s1033_s2] ss:$0 sm:$0xff]  ;;  %s870_s2 = smov 112  }
  0x1b   :  { %267 = vmatpush.bf16.msra.mxu1 %v710_v26  ;;  %v737_v61 = vld [vmem:[%s1034_s3] ss:$0 sm:$0xff]  ;;  %s871_s3 = smov 96  }
  0x1c   :  { %105 = vadd.xlane.f32.xlu0 %v104_v3  ;;  %v109_v7 = vsub.f32 1.0, %v108_v6  ;;  %312 = vmatpush.bf16.msra.mxu2 %v714_v27 }
  0x1d   :  { %218 = vmatpush.bf16.msra.mxu0 %v706_v31 }
  0x1e   :  { %v110_v8 = vmul.f32 %v740_v5, %v109_v7 }
  0x1f   :  { %268 = vmatpush.bf16.msra.mxu1 %v709_v29 }
  0x20   :  { %v111_v9 = vadd.f32 %v740_v5, %v110_v8  ;;  %313 = vmatpush.bf16.msra.mxu2 %v713_v30 }
  0x21   :  { %219 = vmatpush.bf16.msra.mxu0 %v705_v33 }
  0x22   :  { %v113_v10 = vsel %vm112_vm1, %v740_v5, %v111_v9 }
  0x87   :  { %v146_v11 = vpop.xlane.xlu0 %145 }
  0x88   :  { %v147_v12 = vmul.f32 %v146_v11, %v113_v10 }
  0x8a   :  { %v148_v13 = vsub.f32 %v143_v0, %v147_v12 }
  0x8c   :  { %v149_v14 = vmul.f32 %v148_v13, %v148_v13 }
  0x8e   :  { %v150_v15 = vsel %vm103_vm0, %v149_v14, 0.0 }
  0x8f   :  { %151 = vadd.xlane.f32.xlu1 %v150_v15  ;;  %v106_v16 = vpop.xlane.xlu0 %105 }
  0x90   :  { %v114_v17 = vmul.f32 %v113_v10, %v106_v16 }
  0x92   :  { %v961_v18 = vsub.f32 %v955_v2, %v114_v17 }
  0x94   :  { %v116_v19 = vmul.f32 %v961_v18, %v961_v18 }
  0x96   :  { %v117_v20 = vsel %vm103_vm0, %v116_v19, 0.0 }
  0x97   :  { %118 = vadd.xlane.f32.xlu1 %v117_v20 }
 0x102   :  { %v152_v32 = vpop.xlane.xlu1 %151 }
 0x103   :  { %v153_v34 = vmul.f32 %v152_v32, %v113_v10 }
 0x105   :  { %v154_v35 = vadd.f32 1e-05, %v153_v34 }
 0x107   :  { %741 = vrsqrt.f32 %v154_v35  ;;  %vm161_vm3 = vweird.f32 %v154_v35 }
 0x10a   :  { %v119_v36 = vpop.xlane.xlu1 %118 }
 0x10b   :  { %v120_v37 = vmul.f32 %v119_v36, %v113_v10 }
 0x10d   :  { %v742_v38 = vpop.eup %741  ;;  %v121_v39 = vadd.f32 1e-05, %v120_v37 }
 0x10e   :  { %v156_v40 = vmul.f32 %v742_v38, %v154_v35  ;;  %vm162_vm2 = vweird.f32 %v742_v38 }
 0x10f   :  { %743 = vrsqrt.f32 %v121_v39  ;;  %vm163_vm4 = vmor %vm161_vm3, %vm162_vm2  ;;  %vm128_vm6 = vweird.f32 %v121_v39 }
 0x110   :  { %v157_v41 = vmul.f32 %v742_v38, %v156_v40 }
 0x112   :  { %v158_v42 = vmul.f32 0.5, %v157_v41 }
 0x114   :  { %v159_v43 = vsub.f32 1.5, %v158_v42 }
 0x115   :  { %v744_v44 = vpop.eup %743 }
 0x116   :  { %v160_v45 = vmul.f32 %v742_v38, %v159_v43  ;;  %v123_v46 = vmul.f32 %v744_v44, %v121_v39  ;;  %vm129_vm5 = vweird.f32 %v744_v44 }
 0x117   :  { %vm130_vm7 = vmor %vm128_vm6, %vm129_vm5 }
 0x118   :  { %v164_v48 = vsel %vm163_vm4, %v742_v38, %v160_v45  ;;  %v124_v49 = vmul.f32 %v744_v44, %v123_v46 }
 0x119   :  { %v165_v50 = vmul.f32 %v164_v48, %v148_v13 }
 0x11a   :  { %v125_v52 = vmul.f32 0.5, %v124_v49 }
 0x11b   :  { %v170_v53 = vmul.f32 %v734_v47, %v165_v50 }
 0x11c   :  { %v126_v54 = vsub.f32 1.5, %v125_v52 }
 0x11d   :  { %v175_v55 = vadd.f32 %v735_v51, %v170_v53 }
 0x11e   :  { %v127_v56 = vmul.f32 %v744_v44, %v126_v54 }
 0x11f   :  { %v225_v57 = vpack.c.bf16 %v175_v55, %v175_v55 }
 0x120   :  { %v131_v59 = vsel %vm130_vm7, %v744_v44, %v127_v56 }
 0x121   :  { %662 = vmatmul.msk.bf16.vlgmr.msra.gmra.mxu1 %vm103_vm0, %v225_v57  ;;  %679 = vmatmul.msk.bf16.vlgmr.msra.gmra.mxu2 %vm103_vm0, %v225_v57  ;;  %v132_v60 = vmul.f32 %v131_v59, %v961_v18 }
 0x123   :  { %v137_v62 = vmul.f32 %v736_v58, %v132_v60 }
 0x125   :  { %v142_v63 = vadd.f32 %v737_v61, %v137_v62 }
 0x127   :  { %v176_v0 = vpack.c.bf16 %v142_v63, %v142_v63 }
 0x129   :  { %645 = vmatmul.msk.bf16.vlgmr.msra.gmra.mxu0 %vm103_vm0, %v176_v0 }
 0x19e   :  { %v270_v1 = vpop.f32.mrf.mxu1 }
 0x19f   :  { %v320_v3 = vpack.c.bf16 %v270_v1, %v270_v1 }
 0x1a1   :  { %380 = vrot.lane.b32.xlu2 %v320_v3, %s870_s2  ;;  %v326_v4 = vsel %vm321_vm8, %v320_v3, 0 }
 0x1a2   :  { %335 = vmatpush.bf16.xpose.msra.mxu3 %v326_v4 }
 0x1a4   :  { %v315_v5 = vpop.f32.mrf.mxu2 }
 0x1a5   :  { %v984_v6 = vpack.c.bf16 %v315_v5, %v315_v5 }
 0x1a6   :  { %v221_v7 = vpop.f32.mrf.mxu0  ;;  %v272_v8 = vpop.f32.mrf.mxu1 }
 0x1a7   :  { %v319_v9 = vpack.c.bf16 %v221_v7, %v221_v7  ;;  %v361_v10 = vsel %vm359_vm9, %v984_v6, 0 }
 0x1a9   :  { %438 = vrot.lane.b32.xlu2 %v320_v3, %s871_s3  ;;  %436 = vrot.lane.b32.xlu1 %v319_v9, %s871_s3 }
 0x1aa   :  { %370 = vmatpush.bf16.msrb.mxu3 %v361_v10  ;;  %377 = vrot.lane.b32.xlu0 %v319_v9, %s870_s2 }
 0x1ab   :  { %680 = vmatmul.msk.bf16.vlgmr.msra.gmra.mxu3 %vm321_vm8, %v319_v9 }
 0x1ac   :  { %v317_v11 = vpop.f32.mrf.mxu2 }
 0x1ae   :  { %v223_v12 = vpop.f32.mrf.mxu0 }
 0x1b1   :  { %495 = vrot.lane.b32.xlu2 %v320_v3, %s872_s24 }
 0x1b9   :  { %493 = vrot.lane.b32.xlu2 %v319_v9, %s872_s24 }
 0x1fb   :  { %v381_v13 = vpop.permute.xlu2 %380 }
 0x1fc   :  { %v386_v14 = vsel %vm321_vm8, %v381_v13, 0 }
 0x1fd   :  { %395 = vmatpush.bf16.xpose.msrb.mxu0 %v386_v14 }
 0x203   :  { %v439_v15 = vpop.permute.xlu2 %438 }
 0x204   :  { %v444_v16 = vsel %vm321_vm8, %v439_v15, 0 }
 0x205   :  { %453 = vmatpush.bf16.xpose.msrb.mxu2 %v444_v16 }
 0x20b   :  { %v496_v17 = vpop.permute.xlu2 %495 }
 0x20c   :  { %v501_v18 = vsel %vm321_vm8, %v496_v17, 0 }
 0x20d   :  { %510 = vmatpush.bf16.xpose.msra.mxu0 %v501_v18 }
 0x213   :  { %v494_v21 = vpop.permute.xlu2 %493 }
 0x21b   :  { %v437_v19 = vpop.permute.xlu1 %436 }
 0x21c   :  { %v378_v20 = vpop.permute.xlu0 %377  ;;  %684 = vmatmul.msk.bf16.vlgmr.msrb.gmra.mxu2 %vm321_vm8, %v437_v19 }
 0x21d   :  { %682 = vmatmul.msk.bf16.vlgmr.msrb.gmra.mxu0 %vm321_vm8, %v378_v20 }
 0x22d   :  { %686 = vmatmul.msk.bf16.vlgmr.msra.gmra.mxu0 %vm321_vm8, %v494_v21 }
 0x22e   :  { %v337_v22 = vpop.f32.mrf.mxu3 }
 0x22f   :  { %v341_v23 = vmul.f32 0.25, %v337_v22 }
 0x231   :  { %v343_v24 = vsel %vm342_vm10, %v341_v23, -inf }
 0x232   :  { %344 = vmax.xlane.f32.xlu2 %v343_v24 }
 0x236   :  { %v339_v25 = vpop.f32.mrf.mxu3 }
 0x237   :  { %v720_v25 = vld [vmem:[#allocation7 + $0x18] sm:$0xff] }
 0x238   :  { %611 = vmatpush.bf16.msra.mxu2 %v720_v25 }
 0x29a   :  { %v397_v26 = vpop.f32.mrf.mxu0 }
 0x29b   :  { %v401_v27 = vmul.f32 0.25, %v397_v26  ;;  %v719_v26 = vld [vmem:[#allocation7 + $0x10] sm:$0xff] }
 0x29c   :  { %612 = vmatpush.bf16.msra.mxu2 %v719_v26 }
 0x29d   :  { %v402_v28 = vsel %vm342_vm10, %v401_v27, -inf }
 0x29e   :  { %403 = vmax.xlane.f32.xlu0 %v402_v28  ;;  %v717_v28 = vld [vmem:[#allocation7] sm:$0xff] }
 0x29f   :  { %v455_v29 = vpop.f32.mrf.mxu2 }
 0x2a0   :  { %v459_v30 = vmul.f32 0.25, %v455_v29 }
 0x2a2   :  { %v399_v31 = vpop.f32.mrf.mxu0  ;;  %v460_v32 = vsel %vm342_vm10, %v459_v30, -inf }
 0x2a3   :  { %461 = vmax.xlane.f32.xlu1 %v460_v32 }
 0x2a5   :  { %v345_v33 = vpop.xlane.xlu2 %344 }
 0x2a6   :  { %v346_v34 = vsub.f32 %v341_v23, %v345_v33 }
 0x2a7   :  { %v457_v36 = vpop.f32.mrf.mxu2 }
 0x2a8   :  { %v347_v35 = vmul.f32 1.442695, %v346_v34  ;;  %v738_v36 = vld [vmem:[%s1041_s10] ss:$0 sm:$0xff] }
 0x2aa   :  { %745 = vpow2.f32 %v347_v35  ;;  %v512_v37 = vpop.f32.mrf.mxu0 }
 0x2ab   :  { %v516_v38 = vmul.f32 0.25, %v512_v37 }
 0x2ad   :  { %v517_v39 = vsel %vm342_vm10, %v516_v38, -inf }
 0x2ae   :  { %518 = vmax.xlane.f32.xlu2 %v517_v39 }
 0x2b0   :  { %v746_v40 = vpop.eup %745 }
 0x2b1   :  { %v349_v41 = vsel %vm342_vm10, %v746_v40, 0.0 }
 0x2b2   :  { %350 = vadd.xlane.f32.xlu0 %v349_v41  ;;  %v514_v42 = vpop.f32.mrf.mxu0 }
 0x2bc   :  { %415 = vrot.lane.b32.xlu1 %v984_v6, %s870_s2 }
 0x311   :  { %v404_v43 = vpop.xlane.xlu0 %403 }
 0x312   :  { %v405_v44 = vsub.f32 %v401_v27, %v404_v43  ;;  %v718_v27 = vld [vmem:[#allocation7 + $0x8] sm:$0xff] }
 0x313   :  { %613 = vmatpush.bf16.msra.mxu2 %v718_v27 }
 0x314   :  { %v406_v45 = vmul.f32 1.442695, %v405_v44 }
 0x316   :  { %747 = vpow2.f32 %v406_v45  ;;  %v462_v46 = vpop.xlane.xlu1 %461 }
 0x317   :  { %v463_v47 = vsub.f32 %v459_v30, %v462_v46  ;;  %614 = vmatpush.bf16.msra.mxu2 %v717_v28 }
 0x319   :  { %v464_v48 = vmul.f32 1.442695, %v463_v47 }
 0x31b   :  { %749 = vpow2.f32 %v464_v48 }
 0x31c   :  { %v748_v49 = vpop.eup %747 }
 0x31d   :  { %v408_v50 = vsel %vm342_vm10, %v748_v49, 0.0 }
 0x31e   :  { %409 = vadd.xlane.f32.xlu2 %v408_v50 }
 0x321   :  { %v750_v51 = vpop.eup %749  ;;  %v519_v52 = vpop.xlane.xlu2 %518 }
 0x322   :  { %v520_v53 = vsub.f32 %v516_v38, %v519_v52  ;;  %v466_v54 = vsel %vm342_vm10, %v750_v51, 0.0 }
 0x323   :  { %467 = vadd.xlane.f32.xlu0 %v466_v54 }
 0x324   :  { %v521_v55 = vmul.f32 1.442695, %v520_v53 }
 0x325   :  { %v351_v56 = vpop.xlane.xlu0 %350 }
 0x326   :  { %751 = vrcp.f32 %v351_v56 }
 0x327   :  { %753 = vpow2.f32 %v521_v55 }
 0x32c   :  { %v752_v57 = vpop.eup %751 }
 0x32d   :  { %v754_v58 = vpop.eup %753  ;;  %v353_v59 = vmul.f32 %v752_v57, %v746_v40 }
 0x32e   :  { %v523_v60 = vsel %vm342_vm10, %v754_v58, 0.0  ;;  %v416_v61 = vpop.permute.xlu1 %415 }
 0x32f   :  { %524 = vadd.xlane.f32.xlu2 %v523_v60  ;;  %v354_v62 = vpack.c.bf16 %v353_v59, %v353_v59  ;;  %v421_v63 = vsel %vm359_vm9, %v416_v61, 0 }
 0x330   :  { %430 = vmatpush.bf16.msrb.mxu1 %v421_v63 }
 0x331   :  { %681 = vmatmul.msk.bf16.vlgmr.msrb.gmra.mxu3 %vm342_vm10, %v354_v62 }
 0x337   :  { %472 = vrot.lane.b32.xlu0 %v984_v6, %s871_s3 }
 0x347   :  { %529 = vrot.lane.b32.xlu2 %v984_v6, %s872_s24 }
 0x391   :  { %v410_v0 = vpop.xlane.xlu2 %409 }
 0x392   :  { %755 = vrcp.f32 %v410_v0 }
 0x396   :  { %v468_v5 = vpop.xlane.xlu0 %467 }
 0x397   :  { %757 = vrcp.f32 %v468_v5 }
 0x398   :  { %v756_v1 = vpop.eup %755 }
 0x399   :  { %v412_v3 = vmul.f32 %v756_v1, %v748_v49 }
 0x39b   :  { %v413_v4 = vpack.c.bf16 %v412_v3, %v412_v3 }
 0x39d   :  { %683 = vmatmul.msk.bf16.vlgmr.msrb.gmra.mxu1 %vm342_vm10, %v413_v4  ;;  %v758_v8 = vpop.eup %757 }
 0x39e   :  { %v470_v10 = vmul.f32 %v758_v8, %v750_v51 }
 0x3a0   :  { %v471_v16 = vpack.c.bf16 %v470_v10, %v470_v10 }
 0x3a2   :  { %v525_v7 = vpop.xlane.xlu2 %524 }
 0x3a3   :  { %759 = vrcp.f32 %v525_v7 }
 0x3a9   :  { %v760_v9 = vpop.eup %759  ;;  %v473_v13 = vpop.permute.xlu0 %472 }
 0x3aa   :  { %v527_v11 = vmul.f32 %v760_v9, %v754_v58  ;;  %v530_v12 = vpop.permute.xlu2 %529  ;;  %v478_v6 = vsel %vm359_vm9, %v473_v13, 0 }
 0x3ab   :  { %v535_v14 = vsel %vm359_vm9, %v530_v12, 0  ;;  %487 = vmatpush.bf16.msra.mxu3 %v478_v6 }
 0x3ac   :  { %v528_v15 = vpack.c.bf16 %v527_v11, %v527_v11  ;;  %544 = vmatpush.bf16.msra.mxu1 %v535_v14 }
 0x3ae   :  { %685 = vmatmul.msk.bf16.vlgmr.msra.gmra.mxu3 %vm342_vm10, %v471_v16 }
 0x3af   :  { %687 = vmatmul.msk.bf16.vlgmr.msra.gmra.mxu1 %vm342_vm10, %v528_v15 }
 0x3b4   :  { %v372_v17 = vpop.f32.mrf.mxu3 }
 0x3bc   :  { %v374_v18 = vpop.f32.mrf.mxu3 }
 0x41a   :  { %v432_v19 = vpop.f32.mrf.mxu1 }
 0x41b   :  { %551 = vrot.lane.b32.xlu1 %v432_v19, %s873_s25 }
 0x422   :  { %v434_v20 = vpop.f32.mrf.mxu1 }
 0x42c   :  { %v546_v21 = vpop.f32.mrf.mxu1 }
 0x42d   :  { %559 = vrot.lane.b32.xlu1 %v546_v21, %s874_s26 }
 0x431   :  { %v489_v22 = vpop.f32.mrf.mxu3 }
 0x432   :  { %555 = vrot.lane.b32.xlu0 %v489_v22, %s875_s27 }
 0x434   :  { %v548_v23 = vpop.f32.mrf.mxu1 }
 0x439   :  { %v491_v24 = vpop.f32.mrf.mxu3 }
 0x48d   :  { %v552_v29 = vpop.permute.xlu1 %551 }
 0x48e   :  { %v562_v30 = vsel %vm321_vm8, %v372_v17, %v552_v29 }
 0x49f   :  { %v560_v32 = vpop.permute.xlu1 %559 }
 0x4a4   :  { %v556_v31 = vpop.permute.xlu0 %555 }
 0x4a5   :  { %v564_v33 = vsel %vm563_vm11, %v562_v30, %v556_v31 }
 0x4a6   :  { %v566_v34 = vsel %vm565_vm12, %v564_v33, %v560_v32 }
 0x4a7   :  { %v567_v35 = vpack.c.bf16 %v566_v34, %v566_v34 }
 0x4a9   :  { %704 = vmatmul.msk.bf16.vlgmr.msra.gmra.mxu2 %vm103_vm0, %v567_v35 }
 0x52c   :  { %v616_v37 = vpop.f32.mrf.mxu2 }
 0x52d   :  { %v617_v38 = vadd.f32 %v738_v36, %v616_v37 }
 0x52f   :  { %v620_v39 = vadd.f32 %v617_v38, %v955_v2 }
 0x531   :  { %621 = vst.msk [vmem:[%s1042_s11] sm:$0xff] %vm103_vm0, %v620_v39 }
 0x534   :  { %v618_v40 = vpop.f32.mrf.mxu2 }
 0x535   :  { %626 = vsyncpa [#allocation3], 1 }
 0x536   :  { %627 = vsyncpa [#allocation5], 1 }
 0x537   :  { %628 = vsyncpa [#allocation8], 1 }

// kernel: _lambda_.8
= control target key start
LH: loop header
LB: loop body
LE: loop exit
PB: predicated region body
PF: predicated region fallthrough
CT: control target
= control target key end

     0   :  { %14 = vsyncpa [#allocation3], 0  ;;  %s837_s0 = inlined_call_operand.vmem [shape: f32[8,64], index: 0, kind: input, shape index: {}]   ;;  %s838_s1 = inlined_call_operand.vmem [shape: f32[1,64], index: 1, kind: input, shape index: {}]   ;;  %s839_s2 = inlined_call_operand.vmem [shape: f32[1,64], index: 2, kind: input, shape index: {}, may-alias: {2,8}]   ;;  %s840_s3 = inlined_call_operand.hbm [shape: bf16[64,256], index: 3, kind: input, shape index: {}]   ;;  %s841_s4 = inlined_call_operand.vmem [shape: f32[1,256], index: 4, kind: input, shape index: {}, may-alias: {4,6}]   ;;  %s842_s5 = inlined_call_operand.hbm [shape: bf16[64,256], index: 5, kind: input, shape index: {}]   ;;  %s843_s6 = inlined_call_operand.vmem [shape: f32[1,256], index: 6, kind: input, shape index: {}, may-alias: {4,6}]   ;;  %s844_s7 = inlined_call_operand.hbm [shape: bf16[256,64], index: 7, kind: input, shape index: {}]   ;;  %s845_s8 = inlined_call_operand.vmem [shape: f32[1,64], index: 8, kind: input, shape index: {}, may-alias: {2,8}]   ;;  %s846_s9 = inlined_call_operand.vmem [shape: f32[8,64], index: 9, kind: output, shape index: {}]  }
   0x1   :  { %15 = vsyncpa [#allocation5], 0  ;;  %s41_s11 = sshll.u32 %s842_s5, 4  ;;  %s732_s12 = smov [#allocation4]   ;;  %s42_s11 = int_to_ptr.hbm [resolvable:$true] %s41_s11 }
   0x2   :  { %s43_s13 = sshll.u32 %s732_s12, 4  ;;  %s26_s16 = sshll.u32 %s840_s3, 4  ;;  %s44_s13 = int_to_ptr.vmem [resolvable:$true] %s43_s13  ;;  %s27_s16 = int_to_ptr.hbm [resolvable:$true] %s26_s16 }
   0x3   :  { %s733_s17 = smov 128   ;;  %s734_s18 = smov 8  }
   0x4   :  { %49 = dma.hbm_to_vmem [thread:$0]  %s42_s11, 1024, %s44_s13, [#allocation5], %s733_s17, %s733_s17, %s734_s18  }
   0x5   :  { %s735_s19 = smov [#allocation2]   ;;  %s56_s23 = sshll.u32 %s844_s7, 4  ;;  %s57_s23 = int_to_ptr.hbm [resolvable:$true] %s56_s23 }
   0x6   :  { %s28_s20 = sshll.u32 %s735_s19, 4  ;;  %s736_s5 = smov [#allocation6]   ;;  %s29_s20 = int_to_ptr.vmem [resolvable:$true] %s28_s20 }
   0x7   :  { %34 = dma.hbm_to_vmem [thread:$0]  %s27_s16, 1024, %s29_s20, [#allocation3], %s733_s17, %s733_s17, %s734_s18  }
   0x8   :  { %s58_s24 = sshll.u32 %s736_s5, 4  ;;  %s737_s25 = smov 64   ;;  %s59_s24 = int_to_ptr.vmem [resolvable:$true] %s58_s24 }
   0x9   :  { %s738_s26 = smov 4  }
   0xa   :  { %64 = dma.hbm_to_vmem [thread:$0]  %s57_s23, 2048, %s59_s24, [#allocation5], %s737_s25, %s737_s25, %s738_s26  }
   0xb   :  { %728 = dma.done.wait [#allocation3], 1024  }
   0xc   :  { %729 = vsyncadd [#allocation3], 4294966272 }
   0xd   :  { %730 = dma.done.wait [#allocation5], 3072  }
   0xe   :  { %731 = vsyncadd [#allocation5], 4294964224  ;;  %vm81_vm0 = vcmask 523264   ;;  %v802_v0 = vld [vmem:[%s837_s0] sm:$0xff]  ;;  %v739_v2 = vmov 64.0  }
   0xf   :  { %v82_v1 = vsel %vm81_vm0, %v802_v0, 0.0  ;;  %648 = vrcp.f32 %v739_v2  ;;  %v499_v14 = vld [vmem:[#allocation2 + $0x30] sm:$0xf]  ;;  %v612_v15 = vld [vmem:[#allocation2 + $0x34] sm:$0xf0] }
  0x10   :  { %83 = vadd.xlane.f32.xlu0 %v82_v1  ;;  %v611_v16 = vld [vmem:[#allocation2 + $0x34] sm:$0xf]  ;;  %v500_v17 = vor.u32 %v612_v15, %v499_v14  ;;  %v501_v18 = vld [vmem:[#allocation2 + $0x38] sm:$0xf0]  ;;  %v491_v20 = vld [vmem:[#allocation2 + $0x20] sm:$0xf] }
  0x11   :  { %v504_v19 = vor.u32 %v611_v16, %v501_v18  ;;  %v610_v21 = vld [vmem:[#allocation2 + $0x24] sm:$0xf0]  ;;  %v609_v22 = vld [vmem:[#allocation2 + $0x24] sm:$0xf]  ;;  %v493_v24 = vld [vmem:[#allocation2 + $0x28] sm:$0xf0] }
  0x12   :  { %183 = vmatpush.bf16.msra.mxu2 %v500_v17  ;;  %v492_v23 = vor.u32 %v610_v21, %v491_v20  ;;  %v496_v25 = vor.u32 %v609_v22, %v493_v24  ;;  %v483_v26 = vld [vmem:[#allocation2 + $0x10] sm:$0xf]  ;;  %v608_v27 = vld [vmem:[#allocation2 + $0x14] sm:$0xf0]  ;;  %v607_v28 = vld [vmem:[#allocation2 + $0x14] sm:$0xf] }
  0x13   :  { %196 = vmatpush.bf16.msra.mxu3 %v504_v19  ;;  %v484_v29 = vor.u32 %v608_v27, %v483_v26  ;;  %v485_v30 = vld [vmem:[#allocation2 + $0x18] sm:$0xf0]  ;;  %v475_v32 = vld [vmem:[#allocation2] sm:$0xf]  ;;  %v606_v33 = vld [vmem:[#allocation2 + $0x4] sm:$0xf0] }
  0x14   :  { %v488_v31 = vor.u32 %v607_v28, %v485_v30  ;;  %v605_v34 = vld [vmem:[#allocation2 + $0x4] sm:$0xf]  ;;  %v476_v35 = vor.u32 %v606_v33, %v475_v32  ;;  %v477_v36 = vld [vmem:[#allocation2 + $0x8] sm:$0xf0]  ;;  %v533_v38 = vld [vmem:[#allocation4 + $0x30] sm:$0xf] }
  0x15   :  { %v649_v3 = vpop.eup %648  ;;  %v480_v37 = vor.u32 %v605_v34, %v477_v36  ;;  %v620_v39 = vld [vmem:[#allocation4 + $0x34] sm:$0xf0]  ;;  %v619_v40 = vld [vmem:[#allocation4 + $0x34] sm:$0xf]  ;;  %v535_v42 = vld [vmem:[#allocation4 + $0x38] sm:$0xf0] }
  0x16   :  { %v86_v4 = vmul.f32 64.0, %v649_v3  ;;  %vm90_vm1 = vweird.f32 %v649_v3  ;;  %184 = vmatpush.bf16.msra.mxu2 %v492_v23  ;;  %v534_v41 = vor.u32 %v620_v39, %v533_v38  ;;  %v538_v43 = vor.u32 %v619_v40, %v535_v42  ;;  %v525_v44 = vld [vmem:[#allocation4 + $0x20] sm:$0xf]  ;;  %v618_v45 = vld [vmem:[#allocation4 + $0x24] sm:$0xf0]  ;;  %v628_v16 = vld [vmem:[#allocation6 + $0x38] sm:$0xff] }
  0x17   :  { %197 = vmatpush.bf16.msra.mxu3 %v496_v25  ;;  %v617_v46 = vld [vmem:[#allocation4 + $0x24] sm:$0xf]  ;;  %v526_v48 = vor.u32 %v618_v45, %v525_v44  ;;  %v527_v49 = vld [vmem:[#allocation4 + $0x28] sm:$0xf0]  ;;  %v517_v52 = vld [vmem:[#allocation4 + $0x10] sm:$0xf]  ;;  %439 = vmatpush.bf16.msra.mxu0 %v628_v16 }
  0x18   :  { %v87_v5 = vsub.f32 1.0, %v86_v4  ;;  %v530_v51 = vor.u32 %v617_v46, %v527_v49  ;;  %v616_v53 = vld [vmem:[#allocation4 + $0x14] sm:$0xf0]  ;;  %v615_v54 = vld [vmem:[#allocation4 + $0x14] sm:$0xf]  ;;  %v626_v19 = vld [vmem:[#allocation6 + $0x28] sm:$0xff] }
  0x19   :  { %v519_v55 = vld [vmem:[#allocation4 + $0x18] sm:$0xf0]  ;;  %v518_v57 = vor.u32 %v616_v53, %v517_v52  ;;  %v509_v59 = vld [vmem:[#allocation4] sm:$0xf]  ;;  %v614_v60 = vld [vmem:[#allocation4 + $0x4] sm:$0xf0] }
  0x1a   :  { %v88_v6 = vmul.f32 %v649_v3, %v87_v5  ;;  %185 = vmatpush.bf16.msra.mxu2 %v484_v29  ;;  %v522_v58 = vor.u32 %v615_v54, %v519_v55  ;;  %v613_v61 = vld [vmem:[#allocation4 + $0x4] sm:$0xf]  ;;  %v511_v62 = vld [vmem:[#allocation4 + $0x8] sm:$0xf0]  ;;  %v510_v63 = vor.u32 %v614_v60, %v509_v59  ;;  %v636_v17 = vld [vmem:[#allocation6 + $0x78] sm:$0xff] }
  0x1b   :  { %198 = vmatpush.bf16.msra.mxu3 %v488_v31  ;;  %v514_v1 = vor.u32 %v613_v61, %v511_v62  ;;  %452 = vmatpush.bf16.msra.mxu1 %v636_v17  ;;  %v635_v18 = vld [vmem:[#allocation6 + $0x70] sm:$0xff]  ;;  %v634_v20 = vld [vmem:[#allocation6 + $0x68] sm:$0xff]  ;;  %v625_v21 = vld [vmem:[#allocation6 + $0x20] sm:$0xff] }
  0x1c   :  { %v89_v7 = vadd.f32 %v649_v3, %v88_v6  ;;  %v633_v22 = vld [vmem:[#allocation6 + $0x60] sm:$0xff]  ;;  %v624_v23 = vld [vmem:[#allocation6 + $0x18] sm:$0xff]  ;;  %v623_v25 = vld [vmem:[#allocation6 + $0x10] sm:$0xff] }
  0x1d   :  { %v632_v24 = vld [vmem:[#allocation6 + $0x58] sm:$0xff]  ;;  %v631_v26 = vld [vmem:[#allocation6 + $0x50] sm:$0xff]  ;;  %v622_v29 = vld [vmem:[#allocation6 + $0x8] sm:$0xff] }
  0x1e   :  { %v91_v8 = vsel %vm90_vm1, %v649_v3, %v89_v7  ;;  %186 = vmatpush.bf16.msra.mxu2 %v476_v35  ;;  %v630_v30 = vld [vmem:[#allocation6 + $0x48] sm:$0xff]  ;;  %v621_v31 = vld [vmem:[#allocation6] sm:$0xff] }
  0x1f   :  { %199 = vmatpush.bf16.msra.mxu3 %v480_v37  ;;  %453 = vmatpush.bf16.msra.mxu1 %v635_v18  ;;  %v629_v32 = vld [vmem:[#allocation6 + $0x40] sm:$0xff] }
  0x20   :  { %v213_v35 = vld [vmem:[%s843_s6] sm:$0x3] }
  0x21   :  { %v215_v36 = vperm.slane %v213_v35, 0  ;;  %v216_v37 = vperm.slane %v213_v35, 1  ;;  %v130_v54 = vld [vmem:[%s841_s4] sm:$0x3] }
  0x22   :  { %263 = vmatpush.bf16.msrb.mxu2 %v534_v41  ;;  %v132_v55 = vperm.slane %v130_v54, 0 }
  0x23   :  { %276 = vmatpush.bf16.msrb.mxu3 %v538_v43  ;;  %454 = vmatpush.bf16.msra.mxu1 %v634_v20 }
  0x26   :  { %264 = vmatpush.bf16.msrb.mxu2 %v526_v48 }
  0x27   :  { %277 = vmatpush.bf16.msrb.mxu3 %v530_v51  ;;  %455 = vmatpush.bf16.msra.mxu1 %v633_v22 }
  0x2a   :  { %265 = vmatpush.bf16.msrb.mxu2 %v518_v57  ;;  %v133_v57 = vperm.slane %v130_v54, 1 }
  0x2b   :  { %278 = vmatpush.bf16.msrb.mxu3 %v522_v58  ;;  %456 = vmatpush.bf16.msra.mxu1 %v632_v24 }
  0x2e   :  { %266 = vmatpush.bf16.msrb.mxu2 %v510_v63 }
  0x2f   :  { %279 = vmatpush.bf16.msrb.mxu3 %v514_v1  ;;  %457 = vmatpush.bf16.msra.mxu1 %v631_v26 }
  0x33   :  { %458 = vmatpush.bf16.msra.mxu1 %v630_v30 }
  0x37   :  { %459 = vmatpush.bf16.msra.mxu1 %v629_v32 }
  0x83   :  { %v84_v9 = vpop.xlane.xlu0 %83 }
  0x84   :  { %v92_v10 = vmul.f32 %v91_v8, %v84_v9 }
  0x86   :  { %v807_v11 = vsub.f32 %v802_v0, %v92_v10 }
  0x88   :  { %v94_v12 = vmul.f32 %v807_v11, %v807_v11 }
  0x8a   :  { %v95_v13 = vsel %vm81_vm0, %v94_v12, 0.0  ;;  %v646_v12 = vld [vmem:[%s839_s2] ss:$0 sm:$0xff] }
  0x8b   :  { %96 = vadd.xlane.f32.xlu0 %v95_v13 }
  0xfe   :  { %v97_v47 = vpop.xlane.xlu0 %96 }
  0xff   :  { %v98_v50 = vmul.f32 %v97_v47, %v91_v8  ;;  %v645_v8 = vld [vmem:[%s838_s1] ss:$0 sm:$0xff] }
 0x101   :  { %v99_v56 = vadd.f32 1e-05, %v98_v50 }
 0x103   :  { %650 = vrsqrt.f32 %v99_v56  ;;  %vm106_vm3 = vweird.f32 %v99_v56 }
 0x109   :  { %v651_v2 = vpop.eup %650 }
 0x10a   :  { %v101_v3 = vmul.f32 %v651_v2, %v99_v56  ;;  %vm107_vm2 = vweird.f32 %v651_v2 }
 0x10b   :  { %vm108_vm4 = vmor %vm106_vm3, %vm107_vm2 }
 0x10c   :  { %v102_v4 = vmul.f32 %v651_v2, %v101_v3 }
 0x10e   :  { %v103_v5 = vmul.f32 0.5, %v102_v4 }
 0x110   :  { %v104_v6 = vsub.f32 1.5, %v103_v5 }
 0x112   :  { %v105_v7 = vmul.f32 %v651_v2, %v104_v6 }
 0x114   :  { %v109_v9 = vsel %vm108_vm4, %v651_v2, %v105_v7 }
 0x115   :  { %v110_v10 = vmul.f32 %v109_v9, %v807_v11  ;;  %v627_v11 = vld [vmem:[#allocation6 + $0x30] sm:$0xff] }
 0x116   :  { %440 = vmatpush.bf16.msra.mxu0 %v627_v11 }
 0x117   :  { %v115_v13 = vmul.f32 %v645_v8, %v110_v10  ;;  %v647_v8 = vld [vmem:[%s845_s8] ss:$0 sm:$0xff] }
 0x119   :  { %v120_v14 = vadd.f32 %v646_v12, %v115_v13 }
 0x11a   :  { %441 = vmatpush.bf16.msra.mxu0 %v626_v19 }
 0x11b   :  { %v121_v15 = vpack.c.bf16 %v120_v14, %v120_v14 }
 0x11d   :  { %505 = vmatmul.msk.bf16.vlgmr.msra.gmra.mxu2 %vm81_vm0, %v121_v15  ;;  %506 = vmatmul.msk.bf16.vlgmr.msra.gmra.mxu3 %vm81_vm0, %v121_v15 }
 0x11e   :  { %442 = vmatpush.bf16.msra.mxu0 %v625_v21 }
 0x122   :  { %443 = vmatpush.bf16.msra.mxu0 %v624_v23 }
 0x126   :  { %444 = vmatpush.bf16.msra.mxu0 %v623_v25 }
 0x12a   :  { %445 = vmatpush.bf16.msra.mxu0 %v622_v29 }
 0x12d   :  { %539 = vmatmul.msk.bf16.vlgmr.msrb.gmra.mxu2 %vm81_vm0, %v121_v15  ;;  %540 = vmatmul.msk.bf16.vlgmr.msrb.gmra.mxu3 %vm81_vm0, %v121_v15 }
 0x12e   :  { %446 = vmatpush.bf16.msra.mxu0 %v621_v31 }
 0x1a0   :  { %v188_v27 = vpop.f32.mrf.mxu2  ;;  %v201_v28 = vpop.f32.mrf.mxu3 }
 0x1a1   :  { %v189_v63 = vadd.f32 %v188_v27, %v132_v55  ;;  %v202_v2 = vadd.f32 %v201_v28, %v133_v57 }
 0x1a8   :  { %v190_v33 = vpop.f32.mrf.mxu2  ;;  %v203_v34 = vpop.f32.mrf.mxu3 }
 0x1b0   :  { %v268_v38 = vpop.f32.mrf.mxu2  ;;  %v281_v39 = vpop.f32.mrf.mxu3 }
 0x1b1   :  { %v269_v40 = vadd.f32 %v268_v38, %v215_v36  ;;  %v282_v41 = vadd.f32 %v281_v39, %v216_v37 }
 0x1b3   :  { %v287_v42 = vmul.f32 0.044715, %v269_v40  ;;  %v288_v43 = vmul.f32 0.044715, %v282_v41  ;;  %v285_v59 = vmul.f32 0.5, %v269_v40  ;;  %v286_v61 = vmul.f32 0.5, %v282_v41 }
 0x1b5   :  { %v289_v44 = vmul.f32 %v287_v42, %v269_v40  ;;  %v290_v45 = vmul.f32 %v288_v43, %v282_v41 }
 0x1b7   :  { %v291_v46 = vmul.f32 %v289_v44, %v269_v40  ;;  %v292_v47 = vmul.f32 %v290_v45, %v282_v41 }
 0x1b8   :  { %v270_v48 = vpop.f32.mrf.mxu2  ;;  %v283_v49 = vpop.f32.mrf.mxu3 }
 0x1b9   :  { %v293_v50 = vadd.f32 %v291_v46, %v269_v40  ;;  %v294_v51 = vadd.f32 %v292_v47, %v282_v41 }
 0x1bb   :  { %v295_v52 = vmul.f32 0.7978846, %v293_v50  ;;  %v296_v53 = vmul.f32 0.7978846, %v294_v51 }
 0x1bd   :  { %652 = vtanh.f32 %v295_v52 }
 0x1be   :  { %654 = vtanh.f32 %v296_v53 }
 0x1c3   :  { %v653_v56 = vpop.eup %652 }
 0x1c4   :  { %v655_v58 = vpop.eup %654  ;;  %v299_v60 = vadd.f32 1.0, %v653_v56 }
 0x1c5   :  { %v300_v62 = vadd.f32 1.0, %v655_v58 }
 0x1c6   :  { %v301_v1 = vmul.f32 %v299_v60, %v285_v59 }
 0x1c7   :  { %v302_v3 = vmul.f32 %v300_v62, %v286_v61 }
 0x1c8   :  { %v303_v4 = vmul.f32 %v301_v1, %v189_v63 }
 0x1c9   :  { %v304_v5 = vmul.f32 %v302_v3, %v202_v2 }
 0x1ca   :  { %v305_v6 = vpack.c.bf16 %v303_v4, %v303_v4 }
 0x1cb   :  { %v306_v7 = vpack.c.bf16 %v304_v5, %v304_v5 }
 0x1cc   :  { %447 = vmatmul.bf16.vlgmr.msra.gmra.mxu0 %v305_v6 }
 0x1cd   :  { %460 = vmatmul.bf16.vlgmr.msra.gmra.mxu1 %v306_v7 }
 0x249   :  { %v448_v9 = vpop.f32.mrf.mxu0 }
 0x24a   :  { %v449_v10 = vadd.f32 %v647_v8, %v448_v9  ;;  %v461_v12 = vpop.f32.mrf.mxu1 }
 0x24c   :  { %v462_v13 = vadd.f32 %v461_v12, %v449_v10 }
 0x24e   :  { %v465_v14 = vadd.f32 %v462_v13, %v802_v0 }
 0x250   :  { %466 = vst.msk [vmem:[%s846_s9] sm:$0xff] %vm81_vm0, %v465_v14 }
 0x251   :  { %v450_v15 = vpop.f32.mrf.mxu0 }
 0x252   :  { %v463_v16 = vpop.f32.mrf.mxu1 }
 0x253   :  { %471 = vsyncpa [#allocation3], 1 }
 0x254   :  { %472 = vsyncpa [#allocation5], 1 }

// kernel: _lambda_.7
= control target key start
LH: loop header
LB: loop body
LE: loop exit
PB: predicated region body
PF: predicated region fallthrough
CT: control target
= control target key end

     0   :  { %16 = vsyncpa [#allocation3], 0  ;;  %s728_s0 = inlined_call_operand.hbm [shape: f32[8,64], index: 0, kind: input, shape index: {}]   ;;  %s729_s1 = inlined_call_operand.hbm [shape: f32[8,32], index: 1, kind: input, shape index: {}]   ;;  %s730_s2 = inlined_call_operand.vmem [shape: f32[1,64], index: 2, kind: input, shape index: {}]   ;;  %s731_s3 = inlined_call_operand.vmem [shape: f32[1,64], index: 3, kind: input, shape index: {}, may-alias: {3,10}]   ;;  %s732_s4 = inlined_call_operand.vmem [shape: f32[1,32], index: 4, kind: input, shape index: {}]   ;;  %s733_s5 = inlined_call_operand.vmem [shape: f32[1,32], index: 5, kind: input, shape index: {}]   ;;  %s734_s6 = inlined_call_operand.hbm [shape: bf16[64,16], index: 6, kind: input, shape index: {}]   ;;  %s735_s7 = inlined_call_operand.hbm [shape: bf16[32,16], index: 7, kind: input, shape index: {}]   ;;  %s736_s8 = inlined_call_operand.hbm [shape: bf16[32,16], index: 8, kind: input, shape index: {}]   ;;  %s737_s9 = inlined_call_operand.vmem [shape: bf16[16,64], index: 9, kind: input, shape index: {}]   ;;  %s738_s10 = inlined_call_operand.vmem [shape: f32[1,64], index: 10, kind: input, shape index: {}, may-alias: {3,10}]   ;;  %s739_s11 = inlined_call_operand.vmem [shape: f32[8,64], index: 11, kind: output, shape index: {}]  }
   0x1   :  { %17 = vsyncpa [#allocation5], 0  ;;  %s35_s19 = sshll.u32 %s729_s1, 4  ;;  %s36_s19 = int_to_ptr.hbm [resolvable:$true] %s35_s19 }
   0x2   :  { %18 = vsyncpa [#allocation8], 0  ;;  %s604_s20 = smov [#allocation4]   ;;  %s66_s24 = sshll.u32 %s735_s7, 4  ;;  %s67_s24 = int_to_ptr.hbm [resolvable:$true] %s66_s24 }
   0x3   :  { %s37_s21 = sshll.u32 %s604_s20, 4  ;;  %s605_s25 = smov [#allocation7]   ;;  %s38_s21 = int_to_ptr.vmem [resolvable:$true] %s37_s21 }
   0x4   :  { %40 = dma.hbm_to_vmem [thread:$0]  %s36_s19, 128, %s38_s21, [#allocation5]  }
   0x5   :  { %s68_s26 = sshll.u32 %s605_s25, 4  ;;  %s24_s29 = sshll.u32 %s728_s0, 4  ;;  %s69_s26 = int_to_ptr.vmem [resolvable:$true] %s68_s26  ;;  %s25_s29 = int_to_ptr.hbm [resolvable:$true] %s24_s29 }
   0x6   :  { %s606_s1 = smov 64   ;;  %s607_s30 = smov 4  }
   0x7   :  { %74 = dma.hbm_to_vmem [thread:$0]  %s67_s24, 256, %s69_s26, [#allocation8], %s606_s1, %s606_s1, %s607_s30  }
   0x8   :  { %s53_s14 = sshll.u32 %s734_s6, 4  ;;  %s608_s15 = smov [#allocation2]   ;;  %s54_s14 = int_to_ptr.hbm [resolvable:$true] %s53_s14 }
   0x9   :  { %s26_s16 = sshll.u32 %s608_s15, 4  ;;  %s609_s7 = smov [#allocation6]   ;;  %s27_s16 = int_to_ptr.vmem [resolvable:$true] %s26_s16 }
   0xa   :  { %29 = dma.hbm_to_vmem [thread:$0]  %s25_s29, 128, %s27_s16, [#allocation3]  }
   0xb   :  { %s55_s17 = sshll.u32 %s609_s7, 4  ;;  %s79_s0 = sshll.u32 %s736_s8, 4  ;;  %s56_s17 = int_to_ptr.vmem [resolvable:$true] %s55_s17  ;;  %s80_s0 = int_to_ptr.hbm [resolvable:$true] %s79_s0 }
   0xc   :  { %61 = dma.hbm_to_vmem [thread:$0]  %s54_s14, 512, %s56_s17, [#allocation5], %s606_s1, %s606_s1, %s607_s30  }
   0xd   :  { %s610_s20 = smov [#allocation9]  }
   0xe   :  { %s81_s21 = sshll.u32 %s610_s20, 4  ;;  %s82_s21 = int_to_ptr.vmem [resolvable:$true] %s81_s21 }
   0xf   :  { %87 = dma.hbm_to_vmem [thread:$0]  %s80_s0, 256, %s82_s21, [#allocation8], %s606_s1, %s606_s1, %s607_s30  }
  0x10   :  { %598 = dma.done.wait [#allocation3], 128  }
  0x11   :  { %599 = vsyncadd [#allocation3], 4294967168 }
  0x12   :  { %600 = dma.done.wait [#allocation5], 640  }
  0x13   :  { %601 = vsyncadd [#allocation5], 4294966656 }
  0x14   :  { %602 = dma.done.wait [#allocation8], 512  }
  0x15   :  { %603 = vsyncadd [#allocation8], 4294966784  ;;  %vm155_vm0 = vcmask 261120   ;;  %v154_v0 = vld [vmem:[#allocation4] sm:$0xff]  ;;  %v689_v2 = vld [vmem:[#allocation2] sm:$0xff]  ;;  %vm114_vm1 = vcmask 523264  }
  0x16   :  { %v156_v1 = vsel %vm155_vm0, %v154_v0, 0.0  ;;  %v115_v3 = vsel %vm114_vm1, %v689_v2, 0.0  ;;  %v611_v4 = vmov 32.0   ;;  %v612_v6 = vmov 64.0   ;;  %v446_v28 = vld [vmem:[#allocation6 + $0x18] sm:$0xff]  ;;  %v448_v29 = vld [vmem:[#allocation7 + $0x8] sm:$0xff] }
  0x17   :  { %157 = vadd.xlane.f32.xlu0 %v156_v1  ;;  %466 = vrcp.f32 %v611_v4  ;;  %v450_v30 = vld [vmem:[#allocation9 + $0x8] sm:$0xff]  ;;  %235 = vmatpush.bf16.msra.mxu0 %v446_v28  ;;  %v445_v31 = vld [vmem:[#allocation6 + $0x10] sm:$0xff]  ;;  %v447_v32 = vld [vmem:[#allocation7] sm:$0xff]  ;;  %vm308_vm10 = vcmask 130048   ;;  %vm346_vm11 = vcmask 1043456   ;;  %vm329_vm12 = vcmask 64512  }
  0x18   :  { %468 = vrcp.f32 %v612_v6  ;;  %270 = vmatpush.bf16.msra.mxu1 %v448_v29  ;;  %299 = vmatpush.bf16.msra.mxu2 %v450_v30  ;;  %v449_v33 = vld [vmem:[#allocation9] sm:$0xff]  ;;  %v444_v34 = vld [vmem:[#allocation6 + $0x8] sm:$0xff]  ;;  %v443_v36 = vld [vmem:[#allocation6] sm:$0xff] }
  0x19   :  { %v461_v50 = vld [vmem:[%s732_s4] ss:$0 sm:$0xff] }
  0x1a   :  { %v462_v54 = vld [vmem:[%s733_s5] ss:$0 sm:$0xff] }
  0x1b   :  { %236 = vmatpush.bf16.msra.mxu0 %v445_v31  ;;  %v463_v61 = vld [vmem:[%s730_s2] ss:$0 sm:$0xff] }
  0x1c   :  { %271 = vmatpush.bf16.msra.mxu1 %v447_v32  ;;  %300 = vmatpush.bf16.msra.mxu2 %v449_v33  ;;  %v465_v33 = vld [vmem:[%s738_s10] ss:$0 sm:$0xff] }
  0x1d   :  { %v467_v5 = vpop.eup %466 }
  0x1e   :  { %v160_v7 = vmul.f32 32.0, %v467_v5  ;;  %v469_v9 = vpop.eup %468  ;;  %vm164_vm2 = vweird.f32 %v467_v5 }
  0x1f   :  { %116 = vadd.xlane.f32.xlu0 %v115_v3  ;;  %v119_v11 = vmul.f32 64.0, %v469_v9  ;;  %vm123_vm3 = vweird.f32 %v469_v9  ;;  %237 = vmatpush.bf16.msra.mxu0 %v444_v34 }
  0x20   :  { %v161_v8 = vsub.f32 1.0, %v160_v7 }
  0x21   :  { %v120_v13 = vsub.f32 1.0, %v119_v11 }
  0x22   :  { %v162_v10 = vmul.f32 %v467_v5, %v161_v8 }
  0x23   :  { %v121_v15 = vmul.f32 %v469_v9, %v120_v13  ;;  %238 = vmatpush.bf16.msra.mxu0 %v443_v36 }
  0x24   :  { %v163_v12 = vadd.f32 %v467_v5, %v162_v10 }
  0x25   :  { %v122_v18 = vadd.f32 %v469_v9, %v121_v15 }
  0x26   :  { %v165_v14 = vsel %vm164_vm2, %v467_v5, %v163_v12 }
  0x27   :  { %v124_v21 = vsel %vm123_vm3, %v469_v9, %v122_v18 }
  0x8a   :  { %v158_v16 = vpop.xlane.xlu0 %157 }
  0x8b   :  { %v166_v17 = vmul.f32 %v165_v14, %v158_v16 }
  0x8d   :  { %v167_v19 = vsub.f32 %v154_v0, %v166_v17  ;;  %v464_v0 = vld [vmem:[%s731_s3] ss:$0 sm:$0xff] }
  0x8f   :  { %v168_v20 = vmul.f32 %v167_v19, %v167_v19 }
  0x91   :  { %v169_v22 = vsel %vm155_vm0, %v168_v20, 0.0 }
  0x92   :  { %170 = vadd.xlane.f32.xlu1 %v169_v22  ;;  %v117_v23 = vpop.xlane.xlu0 %116 }
  0x93   :  { %v125_v24 = vmul.f32 %v124_v21, %v117_v23 }
  0x95   :  { %v126_v25 = vsub.f32 %v689_v2, %v125_v24 }
  0x97   :  { %v127_v26 = vmul.f32 %v126_v25, %v126_v25 }
  0x99   :  { %v128_v27 = vsel %vm114_vm1, %v127_v26, 0.0 }
  0x9a   :  { %129 = vadd.xlane.f32.xlu1 %v128_v27 }
 0x105   :  { %v171_v35 = vpop.xlane.xlu1 %170 }
 0x106   :  { %v172_v37 = vmul.f32 %v171_v35, %v165_v14 }
 0x108   :  { %v173_v38 = vadd.f32 1e-05, %v172_v37 }
 0x10a   :  { %470 = vrsqrt.f32 %v173_v38  ;;  %vm180_vm5 = vweird.f32 %v173_v38 }
 0x10d   :  { %v130_v39 = vpop.xlane.xlu1 %129 }
 0x10e   :  { %v131_v40 = vmul.f32 %v130_v39, %v124_v21 }
 0x110   :  { %v471_v41 = vpop.eup %470  ;;  %v132_v42 = vadd.f32 1e-05, %v131_v40 }
 0x111   :  { %v175_v43 = vmul.f32 %v471_v41, %v173_v38  ;;  %vm181_vm4 = vweird.f32 %v471_v41 }
 0x112   :  { %472 = vrsqrt.f32 %v132_v42  ;;  %vm182_vm6 = vmor %vm180_vm5, %vm181_vm4  ;;  %vm139_vm8 = vweird.f32 %v132_v42 }
 0x113   :  { %v176_v44 = vmul.f32 %v471_v41, %v175_v43 }
 0x115   :  { %v177_v45 = vmul.f32 0.5, %v176_v44 }
 0x117   :  { %v178_v46 = vsub.f32 1.5, %v177_v45 }
 0x118   :  { %v473_v47 = vpop.eup %472 }
 0x119   :  { %v179_v48 = vmul.f32 %v471_v41, %v178_v46  ;;  %v134_v49 = vmul.f32 %v473_v47, %v132_v42  ;;  %vm140_vm7 = vweird.f32 %v473_v47 }
 0x11a   :  { %vm141_vm9 = vmor %vm139_vm8, %vm140_vm7 }
 0x11b   :  { %v183_v51 = vsel %vm182_vm6, %v471_v41, %v179_v48  ;;  %v135_v52 = vmul.f32 %v473_v47, %v134_v49 }
 0x11c   :  { %v184_v53 = vmul.f32 %v183_v51, %v167_v19 }
 0x11d   :  { %v136_v55 = vmul.f32 0.5, %v135_v52 }
 0x11e   :  { %v189_v56 = vmul.f32 %v461_v50, %v184_v53 }
 0x11f   :  { %v137_v57 = vsub.f32 1.5, %v136_v55 }
 0x120   :  { %v194_v58 = vadd.f32 %v462_v54, %v189_v56 }
 0x121   :  { %v138_v59 = vmul.f32 %v473_v47, %v137_v57 }
 0x122   :  { %v244_v60 = vpack.c.bf16 %v194_v58, %v194_v58 }
 0x123   :  { %v142_v62 = vsel %vm141_vm9, %v473_v47, %v138_v59 }
 0x124   :  { %426 = vmatmul.msk.bf16.vlgmr.msra.gmra.mxu1 %vm155_vm0, %v244_v60  ;;  %435 = vmatmul.msk.bf16.vlgmr.msra.gmra.mxu2 %vm155_vm0, %v244_v60  ;;  %v143_v63 = vmul.f32 %v142_v62, %v126_v25  ;;  %v451_v25 = vld [vmem:[%s737_s9] sm:$0xff] }
 0x125   :  { %386 = vmatpush.bf16.msrb.mxu2 %v451_v25 }
 0x126   :  { %v148_v1 = vmul.f32 %v463_v61, %v143_v63 }
 0x128   :  { %v153_v3 = vadd.f32 %v464_v0, %v148_v1 }
 0x12a   :  { %v195_v4 = vpack.c.bf16 %v153_v3, %v153_v3 }
 0x12c   :  { %417 = vmatmul.msk.bf16.vlgmr.msra.gmra.mxu0 %vm114_vm1, %v195_v4 }
 0x1a1   :  { %v273_v5 = vpop.f32.mrf.mxu1 }
 0x1a2   :  { %v307_v6 = vpack.c.bf16 %v273_v5, %v273_v5 }
 0x1a4   :  { %v313_v7 = vsel %vm308_vm10, %v307_v6, 0 }
 0x1a5   :  { %322 = vmatpush.bf16.xpose.msra.mxu3 %v313_v7 }
 0x1a7   :  { %v302_v8 = vpop.f32.mrf.mxu2 }
 0x1a8   :  { %v342_v9 = vpack.c.bf16 %v302_v8, %v302_v8 }
 0x1a9   :  { %v240_v10 = vpop.f32.mrf.mxu0  ;;  %v275_v11 = vpop.f32.mrf.mxu1 }
 0x1aa   :  { %v306_v12 = vpack.c.bf16 %v240_v10, %v240_v10  ;;  %v348_v13 = vsel %vm346_vm11, %v342_v9, 0 }
 0x1ab   :  { %357 = vmatpush.bf16.msrb.mxu1 %v348_v13 }
 0x1ac   :  { %436 = vmatmul.msk.bf16.vlgmr.msra.gmra.mxu3 %vm308_vm10, %v306_v12 }
 0x1af   :  { %v304_v14 = vpop.f32.mrf.mxu2 }
 0x1b1   :  { %v242_v15 = vpop.f32.mrf.mxu0 }
 0x22f   :  { %v324_v16 = vpop.f32.mrf.mxu3 }
 0x230   :  { %v328_v17 = vmul.f32 0.25, %v324_v16 }
 0x232   :  { %v330_v18 = vsel %vm329_vm12, %v328_v17, -inf }
 0x233   :  { %331 = vmax.xlane.f32.xlu2 %v330_v18 }
 0x237   :  { %v326_v19 = vpop.f32.mrf.mxu3 }
 0x2a6   :  { %v332_v20 = vpop.xlane.xlu2 %331 }
 0x2a7   :  { %v333_v21 = vsub.f32 %v328_v17, %v332_v20 }
 0x2a9   :  { %v334_v22 = vmul.f32 1.442695, %v333_v21 }
 0x2ab   :  { %474 = vpow2.f32 %v334_v22 }
 0x2b1   :  { %v475_v23 = vpop.eup %474 }
 0x2b2   :  { %v336_v24 = vsel %vm329_vm12, %v475_v23, 0.0 }
 0x2b3   :  { %337 = vadd.xlane.f32.xlu2 %v336_v24 }
 0x326   :  { %v338_v26 = vpop.xlane.xlu2 %337 }
 0x327   :  { %476 = vrcp.f32 %v338_v26 }
 0x32d   :  { %v477_v27 = vpop.eup %476 }
 0x32e   :  { %v340_v28 = vmul.f32 %v477_v27, %v475_v23 }
 0x330   :  { %v341_v29 = vpack.c.bf16 %v340_v28, %v340_v28 }
 0x332   :  { %437 = vmatmul.msk.bf16.vlgmr.msrb.gmra.mxu1 %vm329_vm12, %v341_v29 }
 0x3af   :  { %v359_v30 = vpop.f32.mrf.mxu1 }
 0x3b0   :  { %v363_v31 = vpack.c.bf16 %v359_v30, %v359_v30 }
 0x3b2   :  { %442 = vmatmul.msk.bf16.vlgmr.msrb.gmra.mxu2 %vm308_vm10, %v363_v31 }
 0x3b7   :  { %v361_v32 = vpop.f32.mrf.mxu1 }
 0x435   :  { %v388_v34 = vpop.f32.mrf.mxu2 }
 0x436   :  { %v389_v35 = vadd.f32 %v465_v33, %v388_v34 }
 0x438   :  { %v392_v36 = vadd.f32 %v389_v35, %v689_v2 }
 0x43a   :  { %393 = vst.msk [vmem:[%s739_s11] sm:$0xff] %vm114_vm1, %v392_v36 }
 0x43d   :  { %v390_v37 = vpop.f32.mrf.mxu2 }
 0x43e   :  { %398 = vsyncpa [#allocation3], 1 }
 0x43f   :  { %399 = vsyncpa [#allocation5], 1 }
 0x440   :  { %400 = vsyncpa [#allocation8], 1 }

// kernel: _lambda_.9
= control target key start
LH: loop header
LB: loop body
LE: loop exit
PB: predicated region body
PF: predicated region fallthrough
CT: control target
= control target key end

     0   :  { %16 = vsyncpa [#allocation3], 0  ;;  %s995_s0 = inlined_call_operand.vmem [shape: f32[8,64], index: 0, kind: input, shape index: {}, may-alias: {0,1}]   ;;  %s996_s1 = inlined_call_operand.vmem [shape: f32[8,64], index: 1, kind: input, shape index: {}, may-alias: {0,1}]   ;;  %s997_s2 = inlined_call_operand.vmem [shape: f32[1,64], index: 2, kind: input, shape index: {}, may-alias: {2,4}]   ;;  %s998_s3 = inlined_call_operand.vmem [shape: f32[1,64], index: 3, kind: input, shape index: {}, may-alias: {3,5,10}]   ;;  %s999_s4 = inlined_call_operand.vmem [shape: f32[1,64], index: 4, kind: input, shape index: {}, may-alias: {2,4}]   ;;  %s1000_s5 = inlined_call_operand.vmem [shape: f32[1,64], index: 5, kind: input, shape index: {}, may-alias: {3,5,10}]   ;;  %s1001_s6 = inlined_call_operand.hbm [shape: bf16[64,64], index: 6, kind: input, shape index: {}]   ;;  %s1002_s7 = inlined_call_operand.hbm [shape: bf16[64,64], index: 7, kind: input, shape index: {}]   ;;  %s1003_s8 = inlined_call_operand.hbm [shape: bf16[64,64], index: 8, kind: input, shape index: {}]   ;;  %s1004_s9 = inlined_call_operand.vmem [shape: bf16[64,64], index: 9, kind: input, shape index: {}]   ;;  %s1005_s10 = inlined_call_operand.vmem [shape: f32[1,64], index: 10, kind: input, shape index: {}, may-alias: {3,5,10}]   ;;  %s1006_s11 = inlined_call_operand.vmem [shape: f32[8,64], index: 11, kind: output, shape index: {}]  }
   0x1   :  { %17 = vsyncpa [#allocation5], 0  ;;  %s47_s19 = sshll.u32 %s1002_s7, 4  ;;  %s819_s20 = smov [#allocation4]   ;;  %s48_s19 = int_to_ptr.hbm [resolvable:$true] %s47_s19 }
   0x2   :  { %s49_s21 = sshll.u32 %s819_s20, 4  ;;  %s34_s24 = sshll.u32 %s1001_s6, 4  ;;  %s50_s21 = int_to_ptr.vmem [resolvable:$true] %s49_s21  ;;  %s35_s24 = int_to_ptr.hbm [resolvable:$true] %s34_s24 }
   0x3   :  { %s820_s25 = smov 64   ;;  %s821_s26 = smov 4  }
   0x4   :  { %55 = dma.hbm_to_vmem [thread:$0]  %s48_s19, 512, %s50_s21, [#allocation5], %s820_s25, %s820_s25, %s821_s26  }
   0x5   :  { %s822_s27 = smov [#allocation2]   ;;  %s60_s12 = sshll.u32 %s1003_s8, 4  ;;  %s61_s12 = int_to_ptr.hbm [resolvable:$true] %s60_s12 }
   0x6   :  { %s36_s28 = sshll.u32 %s822_s27, 4  ;;  %s823_s7 = smov [#allocation6]   ;;  %s37_s28 = int_to_ptr.vmem [resolvable:$true] %s36_s28 }
   0x7   :  { %42 = dma.hbm_to_vmem [thread:$0]  %s35_s24, 512, %s37_s28, [#allocation3], %s820_s25, %s820_s25, %s821_s26  }
   0x8   :  { %s62_s13 = sshll.u32 %s823_s7, 4  ;;  %s63_s13 = int_to_ptr.vmem [resolvable:$true] %s62_s13 }
   0x9   :  { %68 = dma.hbm_to_vmem [thread:$0]  %s61_s12, 512, %s63_s13, [#allocation5], %s820_s25, %s820_s25, %s821_s26  }
   0xa   :  { %815 = dma.done.wait [#allocation3], 512  }
   0xb   :  { %816 = vsyncadd [#allocation3], 4294966784 }
   0xc   :  { %817 = dma.done.wait [#allocation5], 1024  }
   0xd   :  { %818 = vsyncadd [#allocation5], 4294966272  ;;  %vm87_vm0 = vcmask 523264   ;;  %v127_v0 = vld [vmem:[%s996_s1] sm:$0xff]  ;;  %v824_v4 = vmov 64.0   ;;  %v695_v21 = vld [vmem:[#allocation4 + $0x18] sm:$0xff] }
   0xe   :  { %v128_v1 = vsel %vm87_vm0, %v127_v0, 0.0  ;;  %v907_v2 = vld [vmem:[%s995_s0] sm:$0xff]  ;;  %721 = vrcp.f32 %v824_v4  ;;  %v699_v22 = vld [vmem:[#allocation6 + $0x18] sm:$0xff]  ;;  %249 = vmatpush.bf16.msra.mxu1 %v695_v21  ;;  %v694_v23 = vld [vmem:[#allocation4 + $0x10] sm:$0xff]  ;;  %vm305_vm8 = vcmask 130048   ;;  %vm343_vm9 = vcmask 1043456  }
   0xf   :  { %129 = vadd.xlane.f32.xlu0 %v128_v1  ;;  %v88_v3 = vsel %vm87_vm0, %v907_v2, 0.0  ;;  %294 = vmatpush.bf16.msra.mxu2 %v699_v22  ;;  %v698_v24 = vld [vmem:[#allocation6 + $0x10] sm:$0xff]  ;;  %v691_v25 = vld [vmem:[#allocation2 + $0x18] sm:$0xff]  ;;  %v693_v26 = vld [vmem:[#allocation4 + $0x8] sm:$0xff]  ;;  %s827_s20 = smov 80   ;;  %vm326_vm10 = vcmask 64512  }
  0x10   :  { %v697_v27 = vld [vmem:[#allocation6 + $0x8] sm:$0xff]  ;;  %200 = vmatpush.bf16.msra.mxu0 %v691_v25  ;;  %v690_v28 = vld [vmem:[#allocation2 + $0x10] sm:$0xff]  ;;  %v692_v29 = vld [vmem:[#allocation4] sm:$0xff]  ;;  %s828_s21 = smov 16   ;;  %s829_s22 = smov 48   ;;  %vm547_vm11 = vcmask 261120  }
  0x11   :  { %v696_v30 = vld [vmem:[#allocation6] sm:$0xff]  ;;  %v689_v31 = vld [vmem:[#allocation2 + $0x8] sm:$0xff]  ;;  %s830_s23 = smov 32   ;;  %vm549_vm12 = vcmask 392192  }
  0x12   :  { %250 = vmatpush.bf16.msra.mxu1 %v694_v23  ;;  %v688_v33 = vld [vmem:[#allocation2] sm:$0xff] }
  0x13   :  { %295 = vmatpush.bf16.msra.mxu2 %v698_v24  ;;  %v716_v47 = vld [vmem:[%s999_s4] ss:$0 sm:$0xff] }
  0x14   :  { %v722_v5 = vpop.eup %721  ;;  %201 = vmatpush.bf16.msra.mxu0 %v690_v28  ;;  %v717_v51 = vld [vmem:[%s1000_s5] ss:$0 sm:$0xff] }
  0x15   :  { %v92_v6 = vmul.f32 64.0, %v722_v5  ;;  %vm96_vm1 = vweird.f32 %v722_v5  ;;  %v718_v58 = vld [vmem:[%s997_s2] ss:$0 sm:$0xff]  ;;  %s825_s2 = smov 112  }
  0x16   :  { %251 = vmatpush.bf16.msra.mxu1 %v693_v26  ;;  %v719_v61 = vld [vmem:[%s998_s3] ss:$0 sm:$0xff]  ;;  %s826_s3 = smov 96  }
  0x17   :  { %89 = vadd.xlane.f32.xlu0 %v88_v3  ;;  %v93_v7 = vsub.f32 1.0, %v92_v6  ;;  %296 = vmatpush.bf16.msra.mxu2 %v697_v27 }
  0x18   :  { %202 = vmatpush.bf16.msra.mxu0 %v689_v31 }
  0x19   :  { %v94_v8 = vmul.f32 %v722_v5, %v93_v7 }
  0x1a   :  { %252 = vmatpush.bf16.msra.mxu1 %v692_v29 }
  0x1b   :  { %v95_v9 = vadd.f32 %v722_v5, %v94_v8  ;;  %297 = vmatpush.bf16.msra.mxu2 %v696_v30 }
  0x1c   :  { %203 = vmatpush.bf16.msra.mxu0 %v688_v33 }
  0x1d   :  { %v97_v10 = vsel %vm96_vm1, %v722_v5, %v95_v9 }
  0x82   :  { %v130_v11 = vpop.xlane.xlu0 %129 }
  0x83   :  { %v131_v12 = vmul.f32 %v130_v11, %v97_v10 }
  0x85   :  { %v132_v13 = vsub.f32 %v127_v0, %v131_v12 }
  0x87   :  { %v133_v14 = vmul.f32 %v132_v13, %v132_v13 }
  0x89   :  { %v134_v15 = vsel %vm87_vm0, %v133_v14, 0.0 }
  0x8a   :  { %135 = vadd.xlane.f32.xlu1 %v134_v15  ;;  %v90_v16 = vpop.xlane.xlu0 %89 }
  0x8b   :  { %v98_v17 = vmul.f32 %v97_v10, %v90_v16 }
  0x8d   :  { %v913_v18 = vsub.f32 %v907_v2, %v98_v17 }
  0x8f   :  { %v100_v19 = vmul.f32 %v913_v18, %v913_v18 }
  0x91   :  { %v101_v20 = vsel %vm87_vm0, %v100_v19, 0.0 }
  0x92   :  { %102 = vadd.xlane.f32.xlu1 %v101_v20 }
  0xfd   :  { %v136_v32 = vpop.xlane.xlu1 %135 }
  0xfe   :  { %v137_v34 = vmul.f32 %v136_v32, %v97_v10 }
 0x100   :  { %v138_v35 = vadd.f32 1e-05, %v137_v34 }
 0x102   :  { %723 = vrsqrt.f32 %v138_v35  ;;  %vm145_vm3 = vweird.f32 %v138_v35 }
 0x105   :  { %v103_v36 = vpop.xlane.xlu1 %102 }
 0x106   :  { %v104_v37 = vmul.f32 %v103_v36, %v97_v10 }
 0x108   :  { %v724_v38 = vpop.eup %723  ;;  %v105_v39 = vadd.f32 1e-05, %v104_v37 }
 0x109   :  { %v140_v40 = vmul.f32 %v724_v38, %v138_v35  ;;  %vm146_vm2 = vweird.f32 %v724_v38 }
 0x10a   :  { %725 = vrsqrt.f32 %v105_v39  ;;  %vm147_vm4 = vmor %vm145_vm3, %vm146_vm2  ;;  %vm112_vm6 = vweird.f32 %v105_v39 }
 0x10b   :  { %v141_v41 = vmul.f32 %v724_v38, %v140_v40 }
 0x10d   :  { %v142_v42 = vmul.f32 0.5, %v141_v41 }
 0x10f   :  { %v143_v43 = vsub.f32 1.5, %v142_v42 }
 0x110   :  { %v726_v44 = vpop.eup %725 }
 0x111   :  { %v144_v45 = vmul.f32 %v724_v38, %v143_v43  ;;  %v107_v46 = vmul.f32 %v726_v44, %v105_v39  ;;  %vm113_vm5 = vweird.f32 %v726_v44 }
 0x112   :  { %vm114_vm7 = vmor %vm112_vm6, %vm113_vm5 }
 0x113   :  { %v148_v48 = vsel %vm147_vm4, %v724_v38, %v144_v45  ;;  %v108_v49 = vmul.f32 %v726_v44, %v107_v46 }
 0x114   :  { %v149_v50 = vmul.f32 %v148_v48, %v132_v13 }
 0x115   :  { %v109_v52 = vmul.f32 0.5, %v108_v49 }
 0x116   :  { %v154_v53 = vmul.f32 %v716_v47, %v149_v50 }
 0x117   :  { %v110_v54 = vsub.f32 1.5, %v109_v52 }
 0x118   :  { %v159_v55 = vadd.f32 %v717_v51, %v154_v53 }
 0x119   :  { %v111_v56 = vmul.f32 %v726_v44, %v110_v54 }
 0x11a   :  { %v209_v57 = vpack.c.bf16 %v159_v55, %v159_v55 }
 0x11b   :  { %v115_v59 = vsel %vm114_vm7, %v726_v44, %v111_v56 }
 0x11c   :  { %645 = vmatmul.msk.bf16.vlgmr.msra.gmra.mxu1 %vm87_vm0, %v209_v57  ;;  %662 = vmatmul.msk.bf16.vlgmr.msra.gmra.mxu2 %vm87_vm0, %v209_v57  ;;  %v116_v60 = vmul.f32 %v115_v59, %v913_v18 }
 0x11e   :  { %v121_v62 = vmul.f32 %v718_v58, %v116_v60 }
 0x120   :  { %v126_v63 = vadd.f32 %v719_v61, %v121_v62 }
 0x122   :  { %v160_v0 = vpack.c.bf16 %v126_v63, %v126_v63 }
 0x124   :  { %628 = vmatmul.msk.bf16.vlgmr.msra.gmra.mxu0 %vm87_vm0, %v160_v0 }
 0x199   :  { %v254_v1 = vpop.f32.mrf.mxu1 }
 0x19a   :  { %v304_v3 = vpack.c.bf16 %v254_v1, %v254_v1 }
 0x19c   :  { %364 = vrot.lane.b32.xlu2 %v304_v3, %s825_s2  ;;  %v310_v4 = vsel %vm305_vm8, %v304_v3, 0 }
 0x19d   :  { %319 = vmatpush.bf16.xpose.msra.mxu3 %v310_v4 }
 0x19f   :  { %v299_v5 = vpop.f32.mrf.mxu2 }
 0x1a0   :  { %v936_v6 = vpack.c.bf16 %v299_v5, %v299_v5 }
 0x1a1   :  { %v205_v7 = vpop.f32.mrf.mxu0  ;;  %v256_v8 = vpop.f32.mrf.mxu1 }
 0x1a2   :  { %v303_v9 = vpack.c.bf16 %v205_v7, %v205_v7  ;;  %v345_v10 = vsel %vm343_vm9, %v936_v6, 0 }
 0x1a4   :  { %422 = vrot.lane.b32.xlu2 %v304_v3, %s826_s3  ;;  %420 = vrot.lane.b32.xlu1 %v303_v9, %s826_s3 }
 0x1a5   :  { %354 = vmatpush.bf16.msrb.mxu3 %v345_v10  ;;  %361 = vrot.lane.b32.xlu0 %v303_v9, %s825_s2 }
 0x1a6   :  { %663 = vmatmul.msk.bf16.vlgmr.msra.gmra.mxu3 %vm305_vm8, %v303_v9 }
 0x1a7   :  { %v301_v11 = vpop.f32.mrf.mxu2 }
 0x1a9   :  { %v207_v12 = vpop.f32.mrf.mxu0 }
 0x1ac   :  { %479 = vrot.lane.b32.xlu2 %v304_v3, %s827_s20 }
 0x1b4   :  { %477 = vrot.lane.b32.xlu2 %v303_v9, %s827_s20 }
 0x1f6   :  { %v365_v13 = vpop.permute.xlu2 %364 }
 0x1f7   :  { %v370_v14 = vsel %vm305_vm8, %v365_v13, 0 }
 0x1f8   :  { %379 = vmatpush.bf16.xpose.msrb.mxu0 %v370_v14 }
 0x1fe   :  { %v423_v15 = vpop.permute.xlu2 %422 }
 0x1ff   :  { %v428_v16 = vsel %vm305_vm8, %v423_v15, 0 }
 0x200   :  { %437 = vmatpush.bf16.xpose.msrb.mxu2 %v428_v16 }
 0x206   :  { %v480_v17 = vpop.permute.xlu2 %479 }
 0x207   :  { %v485_v18 = vsel %vm305_vm8, %v480_v17, 0 }
 0x208   :  { %494 = vmatpush.bf16.xpose.msra.mxu0 %v485_v18 }
 0x20e   :  { %v478_v21 = vpop.permute.xlu2 %477 }
 0x216   :  { %v421_v19 = vpop.permute.xlu1 %420 }
 0x217   :  { %v362_v20 = vpop.permute.xlu0 %361  ;;  %667 = vmatmul.msk.bf16.vlgmr.msrb.gmra.mxu2 %vm305_vm8, %v421_v19 }
 0x218   :  { %665 = vmatmul.msk.bf16.vlgmr.msrb.gmra.mxu0 %vm305_vm8, %v362_v20 }
 0x228   :  { %669 = vmatmul.msk.bf16.vlgmr.msra.gmra.mxu0 %vm305_vm8, %v478_v21 }
 0x229   :  { %v321_v22 = vpop.f32.mrf.mxu3 }
 0x22a   :  { %v325_v23 = vmul.f32 0.25, %v321_v22 }
 0x22c   :  { %v327_v24 = vsel %vm326_vm10, %v325_v23, -inf }
 0x22d   :  { %328 = vmax.xlane.f32.xlu2 %v327_v24 }
 0x231   :  { %v323_v25 = vpop.f32.mrf.mxu3 }
 0x232   :  { %v703_v25 = vld [vmem:[%s1004_s9 + $0x18] sm:$0xff] }
 0x233   :  { %595 = vmatpush.bf16.msra.mxu2 %v703_v25 }
 0x295   :  { %v381_v26 = vpop.f32.mrf.mxu0 }
 0x296   :  { %v385_v27 = vmul.f32 0.25, %v381_v26  ;;  %v702_v26 = vld [vmem:[%s1004_s9 + $0x10] sm:$0xff] }
 0x297   :  { %596 = vmatpush.bf16.msra.mxu2 %v702_v26 }
 0x298   :  { %v386_v28 = vsel %vm326_vm10, %v385_v27, -inf }
 0x299   :  { %387 = vmax.xlane.f32.xlu0 %v386_v28  ;;  %v700_v28 = vld [vmem:[%s1004_s9] sm:$0xff] }
 0x29a   :  { %v439_v29 = vpop.f32.mrf.mxu2 }
 0x29b   :  { %v443_v30 = vmul.f32 0.25, %v439_v29 }
 0x29d   :  { %v383_v31 = vpop.f32.mrf.mxu0  ;;  %v444_v32 = vsel %vm326_vm10, %v443_v30, -inf }
 0x29e   :  { %445 = vmax.xlane.f32.xlu1 %v444_v32 }
 0x2a0   :  { %v329_v33 = vpop.xlane.xlu2 %328 }
 0x2a1   :  { %v330_v34 = vsub.f32 %v325_v23, %v329_v33 }
 0x2a2   :  { %v441_v36 = vpop.f32.mrf.mxu2 }
 0x2a3   :  { %v331_v35 = vmul.f32 1.442695, %v330_v34  ;;  %v720_v36 = vld [vmem:[%s1005_s10] ss:$0 sm:$0xff] }
 0x2a5   :  { %727 = vpow2.f32 %v331_v35  ;;  %v496_v37 = vpop.f32.mrf.mxu0 }
 0x2a6   :  { %v500_v38 = vmul.f32 0.25, %v496_v37 }
 0x2a8   :  { %v501_v39 = vsel %vm326_vm10, %v500_v38, -inf }
 0x2a9   :  { %502 = vmax.xlane.f32.xlu2 %v501_v39 }
 0x2ab   :  { %v728_v40 = vpop.eup %727 }
 0x2ac   :  { %v333_v41 = vsel %vm326_vm10, %v728_v40, 0.0 }
 0x2ad   :  { %334 = vadd.xlane.f32.xlu0 %v333_v41  ;;  %v498_v42 = vpop.f32.mrf.mxu0 }
 0x2b7   :  { %399 = vrot.lane.b32.xlu1 %v936_v6, %s825_s2 }
 0x30c   :  { %v388_v43 = vpop.xlane.xlu0 %387 }
 0x30d   :  { %v389_v44 = vsub.f32 %v385_v27, %v388_v43  ;;  %v701_v27 = vld [vmem:[%s1004_s9 + $0x8] sm:$0xff] }
 0x30e   :  { %597 = vmatpush.bf16.msra.mxu2 %v701_v27 }
 0x30f   :  { %v390_v45 = vmul.f32 1.442695, %v389_v44 }
 0x311   :  { %729 = vpow2.f32 %v390_v45  ;;  %v446_v46 = vpop.xlane.xlu1 %445 }
 0x312   :  { %v447_v47 = vsub.f32 %v443_v30, %v446_v46  ;;  %598 = vmatpush.bf16.msra.mxu2 %v700_v28 }
 0x314   :  { %v448_v48 = vmul.f32 1.442695, %v447_v47 }
 0x316   :  { %731 = vpow2.f32 %v448_v48 }
 0x317   :  { %v730_v49 = vpop.eup %729 }
 0x318   :  { %v392_v50 = vsel %vm326_vm10, %v730_v49, 0.0 }
 0x319   :  { %393 = vadd.xlane.f32.xlu2 %v392_v50 }
 0x31c   :  { %v732_v51 = vpop.eup %731  ;;  %v503_v52 = vpop.xlane.xlu2 %502 }
 0x31d   :  { %v504_v53 = vsub.f32 %v500_v38, %v503_v52  ;;  %v450_v54 = vsel %vm326_vm10, %v732_v51, 0.0 }
 0x31e   :  { %451 = vadd.xlane.f32.xlu0 %v450_v54 }
 0x31f   :  { %v505_v55 = vmul.f32 1.442695, %v504_v53 }
 0x320   :  { %v335_v56 = vpop.xlane.xlu0 %334 }
 0x321   :  { %733 = vrcp.f32 %v335_v56 }
 0x322   :  { %735 = vpow2.f32 %v505_v55 }
 0x327   :  { %v734_v57 = vpop.eup %733 }
 0x328   :  { %v736_v58 = vpop.eup %735  ;;  %v337_v59 = vmul.f32 %v734_v57, %v728_v40 }
 0x329   :  { %v507_v60 = vsel %vm326_vm10, %v736_v58, 0.0  ;;  %v400_v61 = vpop.permute.xlu1 %399 }
 0x32a   :  { %508 = vadd.xlane.f32.xlu2 %v507_v60  ;;  %v338_v62 = vpack.c.bf16 %v337_v59, %v337_v59  ;;  %v405_v63 = vsel %vm343_vm9, %v400_v61, 0 }
 0x32b   :  { %414 = vmatpush.bf16.msrb.mxu1 %v405_v63 }
 0x32c   :  { %664 = vmatmul.msk.bf16.vlgmr.msrb.gmra.mxu3 %vm326_vm10, %v338_v62 }
 0x332   :  { %456 = vrot.lane.b32.xlu0 %v936_v6, %s826_s3 }
 0x342   :  { %513 = vrot.lane.b32.xlu2 %v936_v6, %s827_s20 }
 0x38c   :  { %v394_v0 = vpop.xlane.xlu2 %393 }
 0x38d   :  { %737 = vrcp.f32 %v394_v0 }
 0x391   :  { %v452_v5 = vpop.xlane.xlu0 %451 }
 0x392   :  { %739 = vrcp.f32 %v452_v5 }
 0x393   :  { %v738_v1 = vpop.eup %737 }
 0x394   :  { %v396_v3 = vmul.f32 %v738_v1, %v730_v49 }
 0x396   :  { %v397_v4 = vpack.c.bf16 %v396_v3, %v396_v3 }
 0x398   :  { %666 = vmatmul.msk.bf16.vlgmr.msrb.gmra.mxu1 %vm326_vm10, %v397_v4  ;;  %v740_v8 = vpop.eup %739 }
 0x399   :  { %v454_v10 = vmul.f32 %v740_v8, %v732_v51 }
 0x39b   :  { %v455_v16 = vpack.c.bf16 %v454_v10, %v454_v10 }
 0x39d   :  { %v509_v7 = vpop.xlane.xlu2 %508 }
 0x39e   :  { %741 = vrcp.f32 %v509_v7 }
 0x3a4   :  { %v742_v9 = vpop.eup %741  ;;  %v457_v13 = vpop.permute.xlu0 %456 }
 0x3a5   :  { %v511_v11 = vmul.f32 %v742_v9, %v736_v58  ;;  %v514_v12 = vpop.permute.xlu2 %513  ;;  %v462_v6 = vsel %vm343_vm9, %v457_v13, 0 }
 0x3a6   :  { %v519_v14 = vsel %vm343_vm9, %v514_v12, 0  ;;  %471 = vmatpush.bf16.msra.mxu3 %v462_v6 }
 0x3a7   :  { %v512_v15 = vpack.c.bf16 %v511_v11, %v511_v11  ;;  %528 = vmatpush.bf16.msra.mxu1 %v519_v14 }
 0x3a9   :  { %668 = vmatmul.msk.bf16.vlgmr.msra.gmra.mxu3 %vm326_vm10, %v455_v16 }
 0x3aa   :  { %670 = vmatmul.msk.bf16.vlgmr.msra.gmra.mxu1 %vm326_vm10, %v512_v15 }
 0x3af   :  { %v356_v17 = vpop.f32.mrf.mxu3 }
 0x3b7   :  { %v358_v18 = vpop.f32.mrf.mxu3 }
 0x415   :  { %v416_v19 = vpop.f32.mrf.mxu1 }
 0x416   :  { %535 = vrot.lane.b32.xlu1 %v416_v19, %s828_s21 }
 0x41d   :  { %v418_v20 = vpop.f32.mrf.mxu1 }
 0x427   :  { %v530_v21 = vpop.f32.mrf.mxu1 }
 0x428   :  { %543 = vrot.lane.b32.xlu1 %v530_v21, %s829_s22 }
 0x42c   :  { %v473_v22 = vpop.f32.mrf.mxu3 }
 0x42d   :  { %539 = vrot.lane.b32.xlu0 %v473_v22, %s830_s23 }
 0x42f   :  { %v532_v23 = vpop.f32.mrf.mxu1 }
 0x434   :  { %v475_v24 = vpop.f32.mrf.mxu3 }
 0x488   :  { %v536_v29 = vpop.permute.xlu1 %535 }
 0x489   :  { %v546_v30 = vsel %vm305_vm8, %v356_v17, %v536_v29 }
 0x49a   :  { %v544_v32 = vpop.permute.xlu1 %543 }
 0x49f   :  { %v540_v31 = vpop.permute.xlu0 %539 }
 0x4a0   :  { %v548_v33 = vsel %vm547_vm11, %v546_v30, %v540_v31 }
 0x4a1   :  { %v550_v34 = vsel %vm549_vm12, %v548_v33, %v544_v32 }
 0x4a2   :  { %v551_v35 = vpack.c.bf16 %v550_v34, %v550_v34 }
 0x4a4   :  { %687 = vmatmul.msk.bf16.vlgmr.msra.gmra.mxu2 %vm87_vm0, %v551_v35 }
 0x527   :  { %v600_v37 = vpop.f32.mrf.mxu2 }
 0x528   :  { %v601_v38 = vadd.f32 %v720_v36, %v600_v37 }
 0x52a   :  { %v604_v39 = vadd.f32 %v601_v38, %v907_v2 }
 0x52c   :  { %605 = vst.msk [vmem:[%s1006_s11] sm:$0xff] %vm87_vm0, %v604_v39 }
 0x52f   :  { %v602_v40 = vpop.f32.mrf.mxu2 }
 0x530   :  { %610 = vsyncpa [#allocation3], 1 }
 0x531   :  { %611 = vsyncpa [#allocation5], 1 }

// kernel: _lambda_.13
= control target key start
LH: loop header
LB: loop body
LE: loop exit
PB: predicated region body
PF: predicated region fallthrough
CT: control target
= control target key end

     0   :  { %18 = vsyncpa [#allocation3], 0  ;;  %s881_s0 = inlined_call_operand.hbm [shape: f32[6,32], index: 0, kind: input, shape index: {}]   ;;  %s882_s1 = inlined_call_operand.vmem [shape: f32[8,64], index: 1, kind: input, shape index: {}]   ;;  %s883_s2 = inlined_call_operand.vmem [shape: f32[1,32], index: 2, kind: input, shape index: {}]   ;;  %s884_s3 = inlined_call_operand.vmem [shape: f32[1,32], index: 3, kind: input, shape index: {}, may-alias: {3,10,12}]   ;;  %s885_s4 = inlined_call_operand.vmem [shape: f32[1,64], index: 4, kind: input, shape index: {}]   ;;  %s886_s5 = inlined_call_operand.vmem [shape: f32[1,64], index: 5, kind: input, shape index: {}]   ;;  %s887_s6 = inlined_call_operand.hbm [shape: bf16[32,16], index: 6, kind: input, shape index: {}]   ;;  %s888_s7 = inlined_call_operand.hbm [shape: bf16[64,16], index: 7, kind: input, shape index: {}]   ;;  %s889_s8 = inlined_call_operand.hbm [shape: bf16[64,16], index: 8, kind: input, shape index: {}]   ;;  %s890_s9 = inlined_call_operand.hbm [shape: bf16[16,32], index: 9, kind: input, shape index: {}]   ;;  %s891_s10 = inlined_call_operand.vmem [shape: f32[1,32], index: 10, kind: input, shape index: {}, may-alias: {3,10,12}]   ;;  %s892_s11 = inlined_call_operand.hbm [shape: bf16[32,32], index: 11, kind: input, shape index: {}]   ;;  %s893_s12 = inlined_call_operand.vmem [shape: f32[1,32], index: 12, kind: input, shape index: {}, may-alias: {3,10,12}]   ;;  %s894_s13 = inlined_call_operand.vmem [shape: f32[6,32], index: 13, kind: output, shape index: {}]  }
   0x1   :  { %19 = vsyncpa [#allocation5], 0 }
   0x2   :  { %20 = vsyncpa [#allocation8], 0  ;;  %s47_s27 = sshll.u32 %s887_s6, 4  ;;  %s48_s27 = int_to_ptr.hbm [resolvable:$true] %s47_s27 }
   0x3   :  { %21 = vsyncpa [#allocation11], 0  ;;  %s732_s28 = smov [#allocation4]   ;;  %s73_s15 = sshll.u32 %s889_s8, 4  ;;  %s74_s15 = int_to_ptr.hbm [resolvable:$true] %s73_s15 }
   0x4   :  { %s49_s29 = sshll.u32 %s732_s28, 4  ;;  %s733_s16 = smov 64   ;;  %s50_s29 = int_to_ptr.vmem [resolvable:$true] %s49_s29 }
   0x5   :  { %s734_s17 = smov 4   ;;  %s735_s18 = smov [#allocation7]  }
   0x6   :  { %55 = dma.hbm_to_vmem [thread:$0]  %s48_s27, 256, %s50_s29, [#allocation5], %s733_s16, %s733_s16, %s734_s17  }
   0x7   :  { %s75_s19 = sshll.u32 %s735_s18, 4  ;;  %s27_s21 = sshll.u32 %s881_s0, 4  ;;  %s76_s19 = int_to_ptr.vmem [resolvable:$true] %s75_s19  ;;  %s28_s21 = int_to_ptr.hbm [resolvable:$true] %s27_s21 }
   0x8   :  { %81 = dma.hbm_to_vmem [thread:$0]  %s74_s15, 512, %s76_s19, [#allocation8], %s733_s16, %s733_s16, %s734_s17  }
   0x9   :  { %s60_s23 = sshll.u32 %s888_s7, 4  ;;  %s736_s24 = smov [#allocation2]   ;;  %s61_s23 = int_to_ptr.hbm [resolvable:$true] %s60_s23 }
   0xa   :  { %s29_s25 = sshll.u32 %s736_s24, 4  ;;  %s737_s26 = smov [#allocation6]   ;;  %s30_s25 = int_to_ptr.vmem [resolvable:$true] %s29_s25 }
   0xb   :  { %32 = dma.hbm_to_vmem [thread:$0]  %s28_s21, 128, %s30_s25, [#allocation3]  }
   0xc   :  { %s62_s27 = sshll.u32 %s737_s26, 4  ;;  %s86_s0 = sshll.u32 %s890_s9, 4  ;;  %s63_s27 = int_to_ptr.vmem [resolvable:$true] %s62_s27  ;;  %s87_s0 = int_to_ptr.hbm [resolvable:$true] %s86_s0 }
   0xd   :  { %68 = dma.hbm_to_vmem [thread:$0]  %s61_s23, 512, %s63_s27, [#allocation5], %s733_s16, %s733_s16, %s734_s17  }
   0xe   :  { %s101_s7 = sshll.u32 %s892_s11, 4  ;;  %s738_s15 = smov [#allocation9]   ;;  %s102_s7 = int_to_ptr.hbm [resolvable:$true] %s101_s7 }
   0xf   :  { %s88_s18 = sshll.u32 %s738_s15, 4  ;;  %s739_s19 = smov [#allocation10]   ;;  %s89_s18 = int_to_ptr.vmem [resolvable:$true] %s88_s18 }
  0x10   :  { %94 = dma.hbm_to_vmem [thread:$0]  %s87_s0, 128, %s89_s18, [#allocation8], %s733_s16, %s733_s16, %s734_s17  }
  0x11   :  { %s103_s9 = sshll.u32 %s739_s19, 4  ;;  %s104_s9 = int_to_ptr.vmem [resolvable:$true] %s103_s9 }
  0x12   :  { %109 = dma.hbm_to_vmem [thread:$0]  %s102_s7, 256, %s104_s9, [#allocation11], %s733_s16, %s733_s16, %s734_s17  }
  0x13   :  { %724 = dma.done.wait [#allocation3], 128  }
  0x14   :  { %725 = vsyncadd [#allocation3], 4294967168 }
  0x15   :  { %726 = dma.done.wait [#allocation5], 768  }
  0x16   :  { %727 = vsyncadd [#allocation5], 4294966528 }
  0x17   :  { %728 = dma.done.wait [#allocation8], 640  }
  0x18   :  { %729 = vsyncadd [#allocation8], 4294966656 }
  0x19   :  { %730 = dma.done.wait [#allocation11], 256  }
  0x1a   :  { %731 = vsyncadd [#allocation11], 4294967040  ;;  %vm179_vm0 = vcmask 523264   ;;  %v178_v0 = vld [vmem:[%s882_s1] sm:$0xff]  ;;  %vm138_vm1 = vcmask 259072   ;;  %v740_v4 = vmov 64.0  }
  0x1b   :  { %v180_v1 = vsel %vm179_vm0, %v178_v0, 0.0  ;;  %v137_v2 = vld [vmem:[#allocation2] sm:$0x3f]  ;;  %568 = vrcp.f32 %v740_v4  ;;  %v741_v6 = vmov 32.0   ;;  %v544_v28 = vld [vmem:[#allocation6 + $0x18] sm:$0xff]  ;;  %v543_v30 = vld [vmem:[#allocation6 + $0x10] sm:$0xff] }
  0x1c   :  { %181 = vadd.xlane.f32.xlu0 %v180_v1  ;;  %v139_v3 = vsel %vm138_vm1, %v137_v2, 0.0  ;;  %570 = vrcp.f32 %v741_v6  ;;  %v548_v29 = vld [vmem:[#allocation7 + $0x18] sm:$0xff]  ;;  %293 = vmatpush.bf16.msra.mxu1 %v544_v28  ;;  %v547_v31 = vld [vmem:[#allocation7 + $0x10] sm:$0xff]  ;;  %v542_v32 = vld [vmem:[#allocation6 + $0x8] sm:$0xff]  ;;  %vm236_vm10 = vcmask 261120   ;;  %vm349_vm11 = vcmask 130048  }
  0x1d   :  { %338 = vmatpush.bf16.msra.mxu2 %v548_v29  ;;  %v546_v33 = vld [vmem:[#allocation7 + $0x8] sm:$0xff]  ;;  %v541_v34 = vld [vmem:[#allocation6] sm:$0xff]  ;;  %v540_v36 = vld [vmem:[#allocation4 + $0x8] sm:$0xff]  ;;  %vm388_vm12 = vcmask 1043456   ;;  %vm370_vm13 = vcmask 62464   ;;  %vm384_vm14 = vcmask 64512  }
  0x1e   :  { %v545_v35 = vld [vmem:[#allocation7] sm:$0xff]  ;;  %246 = vmatpush.bf16.msra.mxu0 %v540_v36  ;;  %v539_v38 = vld [vmem:[#allocation4] sm:$0xff]  ;;  %v562_v52 = vld [vmem:[%s885_s4] ss:$0 sm:$0xff] }
  0x1f   :  { %v563_v56 = vld [vmem:[%s886_s5] ss:$0 sm:$0xff] }
  0x20   :  { %294 = vmatpush.bf16.msra.mxu1 %v543_v30  ;;  %v564_v63 = vld [vmem:[%s883_s2] ss:$0 sm:$0xff] }
  0x21   :  { %v569_v5 = vpop.eup %568  ;;  %339 = vmatpush.bf16.msra.mxu2 %v547_v31  ;;  %v551_v31 = vld [vmem:[#allocation10 + $0x8] sm:$0xff]  ;;  %v566_v36 = vld [vmem:[%s891_s10] ss:$0 sm:$0xff] }
  0x22   :  { %v184_v7 = vmul.f32 64.0, %v569_v5  ;;  %v571_v9 = vpop.eup %570  ;;  %vm188_vm2 = vweird.f32 %v569_v5  ;;  %247 = vmatpush.bf16.msra.mxu0 %v539_v38 }
  0x23   :  { %v143_v11 = vmul.f32 32.0, %v571_v9  ;;  %vm147_vm3 = vweird.f32 %v571_v9 }
  0x24   :  { %140 = vadd.xlane.f32.xlu0 %v139_v3  ;;  %v185_v8 = vsub.f32 1.0, %v184_v7  ;;  %295 = vmatpush.bf16.msra.mxu1 %v542_v32  ;;  %v550_v32 = vld [vmem:[#allocation10] sm:$0xff] }
  0x25   :  { %v144_v13 = vsub.f32 1.0, %v143_v11  ;;  %340 = vmatpush.bf16.msra.mxu2 %v546_v33 }
  0x26   :  { %v186_v10 = vmul.f32 %v569_v5, %v185_v8 }
  0x27   :  { %v145_v15 = vmul.f32 %v571_v9, %v144_v13 }
  0x28   :  { %v187_v12 = vadd.f32 %v569_v5, %v186_v10  ;;  %296 = vmatpush.bf16.msra.mxu1 %v541_v34 }
  0x29   :  { %v146_v18 = vadd.f32 %v571_v9, %v145_v15  ;;  %341 = vmatpush.bf16.msra.mxu2 %v545_v35 }
  0x2a   :  { %v189_v14 = vsel %vm188_vm2, %v569_v5, %v187_v12 }
  0x2b   :  { %v148_v21 = vsel %vm147_vm3, %v571_v9, %v146_v18 }
  0x2c   :  { %464 = vmatpush.bf16.msrb.mxu1 %v551_v31 }
  0x30   :  { %465 = vmatpush.bf16.msrb.mxu1 %v550_v32 }
  0x8f   :  { %v182_v16 = vpop.xlane.xlu0 %181 }
  0x90   :  { %v190_v17 = vmul.f32 %v189_v14, %v182_v16 }
  0x92   :  { %v191_v19 = vsub.f32 %v178_v0, %v190_v17 }
  0x94   :  { %v192_v20 = vmul.f32 %v191_v19, %v191_v19 }
  0x96   :  { %v193_v22 = vsel %vm179_vm0, %v192_v20, 0.0 }
  0x97   :  { %194 = vadd.xlane.f32.xlu1 %v193_v22  ;;  %v141_v23 = vpop.xlane.xlu0 %140 }
  0x98   :  { %v149_v24 = vmul.f32 %v148_v21, %v141_v23 }
  0x9a   :  { %v150_v25 = vsub.f32 %v137_v2, %v149_v24  ;;  %v565_v2 = vld [vmem:[%s884_s3] ss:$0 sm:$0xff] }
  0x9c   :  { %v151_v26 = vmul.f32 %v150_v25, %v150_v25 }
  0x9e   :  { %v152_v27 = vsel %vm138_vm1, %v151_v26, 0.0  ;;  %v549_v26 = vld [vmem:[#allocation9] sm:$0xff] }
  0x9f   :  { %153 = vadd.xlane.f32.xlu1 %v152_v27 }
 0x10a   :  { %v195_v37 = vpop.xlane.xlu1 %194 }
 0x10b   :  { %v196_v39 = vmul.f32 %v195_v37, %v189_v14 }
 0x10d   :  { %v197_v40 = vadd.f32 1e-05, %v196_v39 }
 0x10f   :  { %572 = vrsqrt.f32 %v197_v40  ;;  %vm204_vm5 = vweird.f32 %v197_v40 }
 0x112   :  { %v154_v41 = vpop.xlane.xlu1 %153 }
 0x113   :  { %v155_v42 = vmul.f32 %v154_v41, %v148_v21  ;;  %v567_v41 = vld [vmem:[%s893_s12] ss:$0 sm:$0xff] }
 0x115   :  { %v573_v43 = vpop.eup %572  ;;  %v156_v44 = vadd.f32 1e-05, %v155_v42 }
 0x116   :  { %v199_v45 = vmul.f32 %v573_v43, %v197_v40  ;;  %vm205_vm4 = vweird.f32 %v573_v43 }
 0x117   :  { %574 = vrsqrt.f32 %v156_v44  ;;  %vm206_vm6 = vmor %vm204_vm5, %vm205_vm4  ;;  %vm163_vm8 = vweird.f32 %v156_v44 }
 0x118   :  { %v200_v46 = vmul.f32 %v573_v43, %v199_v45 }
 0x11a   :  { %v201_v47 = vmul.f32 0.5, %v200_v46 }
 0x11c   :  { %v202_v48 = vsub.f32 1.5, %v201_v47 }
 0x11d   :  { %v575_v49 = vpop.eup %574 }
 0x11e   :  { %v203_v50 = vmul.f32 %v573_v43, %v202_v48  ;;  %v158_v51 = vmul.f32 %v575_v49, %v156_v44  ;;  %vm164_vm7 = vweird.f32 %v575_v49 }
 0x11f   :  { %vm165_vm9 = vmor %vm163_vm8, %vm164_vm7 }
 0x120   :  { %v207_v53 = vsel %vm206_vm6, %v573_v43, %v203_v50  ;;  %v159_v54 = vmul.f32 %v575_v49, %v158_v51 }
 0x121   :  { %v208_v55 = vmul.f32 %v207_v53, %v191_v19 }
 0x122   :  { %v160_v57 = vmul.f32 0.5, %v159_v54 }
 0x123   :  { %v213_v58 = vmul.f32 %v562_v52, %v208_v55 }
 0x124   :  { %v161_v59 = vsub.f32 1.5, %v160_v57 }
 0x125   :  { %v218_v60 = vadd.f32 %v563_v56, %v213_v58 }
 0x126   :  { %v162_v61 = vmul.f32 %v575_v49, %v161_v59 }
 0x127   :  { %v253_v62 = vpack.c.bf16 %v218_v60, %v218_v60 }
 0x128   :  { %v166_v0 = vsel %vm165_vm9, %v575_v49, %v162_v61 }
 0x129   :  { %505 = vmatmul.msk.bf16.vlgmr.msra.gmra.mxu1 %vm179_vm0, %v253_v62  ;;  %522 = vmatmul.msk.bf16.vlgmr.msra.gmra.mxu2 %vm179_vm0, %v253_v62  ;;  %v167_v1 = vmul.f32 %v166_v0, %v150_v25 }
 0x12b   :  { %v172_v3 = vmul.f32 %v564_v63, %v167_v1 }
 0x12d   :  { %v177_v4 = vadd.f32 %v565_v2, %v172_v3 }
 0x12f   :  { %v219_v5 = vpack.c.bf16 %v177_v4, %v177_v4 }
 0x131   :  { %488 = vmatmul.msk.bf16.vlgmr.msra.gmra.mxu0 %vm236_vm10, %v219_v5 }
 0x1a6   :  { %v298_v6 = vpop.f32.mrf.mxu1 }
 0x1a7   :  { %v348_v7 = vpack.c.bf16 %v298_v6, %v298_v6 }
 0x1a9   :  { %v354_v8 = vsel %vm349_vm11, %v348_v7, 0 }
 0x1aa   :  { %363 = vmatpush.bf16.xpose.msra.mxu3 %v354_v8 }
 0x1ac   :  { %v343_v9 = vpop.f32.mrf.mxu2 }
 0x1ad   :  { %v383_v10 = vpack.c.bf16 %v343_v9, %v343_v9 }
 0x1ae   :  { %v249_v11 = vpop.f32.mrf.mxu0  ;;  %v300_v12 = vpop.f32.mrf.mxu1 }
 0x1af   :  { %v347_v13 = vpack.c.bf16 %v249_v11, %v249_v11  ;;  %v390_v14 = vsel %vm388_vm12, %v383_v10, 0 }
 0x1b0   :  { %399 = vmatpush.bf16.msrb.mxu0 %v390_v14 }
 0x1b1   :  { %523 = vmatmul.msk.bf16.vlgmr.msra.gmra.mxu3 %vm349_vm11, %v347_v13 }
 0x1b2   :  { %428 = vmatpush.bf16.msrb.mxu3 %v549_v26 }
 0x1b4   :  { %v345_v15 = vpop.f32.mrf.mxu2 }
 0x1b6   :  { %v251_v16 = vpop.f32.mrf.mxu0 }
 0x234   :  { %v365_v17 = vpop.f32.mrf.mxu3 }
 0x235   :  { %v369_v18 = vmul.f32 0.25, %v365_v17 }
 0x237   :  { %v371_v19 = vsel %vm370_vm13, %v369_v18, -inf }
 0x238   :  { %372 = vmax.xlane.f32.xlu2 %v371_v19 }
 0x23c   :  { %v367_v20 = vpop.f32.mrf.mxu3 }
 0x2ab   :  { %v373_v21 = vpop.xlane.xlu2 %372 }
 0x2ac   :  { %v374_v22 = vsub.f32 %v369_v18, %v373_v21 }
 0x2ae   :  { %v375_v23 = vmul.f32 1.442695, %v374_v22 }
 0x2b0   :  { %576 = vpow2.f32 %v375_v23 }
 0x2b6   :  { %v577_v24 = vpop.eup %576 }
 0x2b7   :  { %v377_v25 = vsel %vm370_vm13, %v577_v24, 0.0 }
 0x2b8   :  { %378 = vadd.xlane.f32.xlu2 %v377_v25 }
 0x32b   :  { %v379_v27 = vpop.xlane.xlu2 %378 }
 0x32c   :  { %578 = vrcp.f32 %v379_v27 }
 0x332   :  { %v579_v28 = vpop.eup %578 }
 0x333   :  { %v381_v29 = vmul.f32 %v579_v28, %v577_v24 }
 0x335   :  { %v382_v30 = vpack.c.bf16 %v381_v29, %v381_v29 }
 0x337   :  { %524 = vmatmul.msk.bf16.vlgmr.msrb.gmra.mxu0 %vm384_vm14, %v382_v30 }
 0x3b4   :  { %v401_v33 = vpop.f32.mrf.mxu0 }
 0x3b5   :  { %v405_v34 = vpack.c.bf16 %v401_v33, %v401_v33 }
 0x3b7   :  { %529 = vmatmul.msk.bf16.vlgmr.msrb.gmra.mxu3 %vm349_vm11, %v405_v34 }
 0x3bc   :  { %v403_v35 = vpop.f32.mrf.mxu0 }
 0x43a   :  { %v430_v37 = vpop.f32.mrf.mxu3 }
 0x43b   :  { %v431_v38 = vadd.f32 %v566_v36, %v430_v37 }
 0x43d   :  { %v434_v39 = vpack.c.bf16 %v431_v38, %v431_v38 }
 0x43f   :  { %538 = vmatmul.msk.bf16.vlgmr.msrb.gmra.mxu1 %vm236_vm10, %v434_v39 }
 0x442   :  { %v432_v40 = vpop.f32.mrf.mxu3 }
 0x4bc   :  { %v467_v42 = vpop.f32.mrf.mxu1 }
 0x4bd   :  { %v468_v43 = vadd.f32 %v567_v41, %v467_v42 }
 0x4bf   :  { %471 = vst.msk [vmem:[%s894_s13] sm:$0x3f] %vm138_vm1, %v468_v43 }
 0x4c4   :  { %v469_v44 = vpop.f32.mrf.mxu1 }
 0x4c5   :  { %476 = vsyncpa [#allocation3], 1 }
 0x4c6   :  { %477 = vsyncpa [#allocation5], 1 }
 0x4c7   :  { %478 = vsyncpa [#allocation8], 1 }
 0x4c8   :  { %479 = vsyncpa [#allocation11], 1 }

</bundles_post_ra>
